<compile_context>
chip_gen: v6e
topology: v6e:2x2x1
jax: 0.10.0
libtpu: 0.0.40
codegen_flags: <defaults>
</compile_context>

<pallas_src>
import jax
import jax.numpy as jnp
from jax import lax
from jax.experimental import pallas as pl
from jax.experimental.pallas import tpu as pltpu

# Sizes implied by the module: nn.Linear(64*22, ...) forces conv output length
# 22 -> input length 88 (k=3, p=1, strides 1,2,2).
_L_IN = 88
_L_PH = 22                 # conv output length (and phase length)
_C1, _C2, _C3 = 32, 64, 64
_F_IN = _C3 * _L_PH        # 1408
_F_H1, _F_H2 = 1024, 128

_NPH = 7                   # conv1 phases: a1[4m-3 .. 4m+3]
_W1C_N = _NPH * _C1        # 224
_W2C_N = 3 * _C2           # 192 : [o2[m-1] | e2 | o2]


def _leaky(v):
    return jnp.where(v > 0, v, 0.2 * v)


# ----------------------------------------------------------------------------
# Fused Pallas kernel: whole Discriminator forward in one call.
# ----------------------------------------------------------------------------
def _discriminator_kernel(
    xc_ref,                      # (N*22, 9)    f32  conv1 input taps
    m1_ref,                      # (N*22, 224)  f32  batch-boundary mask (conv1)
    m2_ref,                      # (N*22, 192)  f32  batch-boundary mask (conv2)
    w1c_ref, b1c_ref,            # (9, 224), (1, 224)       f32
    w2c_ref, b2c_ref,            # (224, 192), (1, 192)     f32
    w3c_ref, b3_ref,             # (192, 64), (1, 64)       f32
    wk1_hbm,                     # (1408, 1024) bf16 in HBM (pl.ANY)
    fb1_ref,                     # (1, 1024) f32
    wk2_ref, fb2_ref,            # (1024, 128) bf16, (1, 128) f32
    wk3_ref, fb3_ref,            # (128, O) f32, (1, O) f32
    out_ref,                     # (N, O) f32
    wk1_vmem,                    # scratch (1408, 1024) bf16
    wk1_sem,                     # scratch DMA semaphore (1,)
    abuf_ref,                    # scratch (N*22, 64) f32   conv3 output
    fbuf_ref,                    # scratch (N, 1408) f32    flattened features
):
    f32 = jnp.float32
    n_batch = out_ref.shape[0]

    # Kick off the big fc1-weight DMA immediately so it overlaps the convs.
    wk1_copy = pltpu.make_async_copy(wk1_hbm, wk1_vmem, wk1_sem.at[0])
    wk1_copy.start()

    # ---- conv stack: one matmul per layer, batch folded into sublanes ------
    # conv1 (1->32, k=3, s=1, p=1): 7 phases a1[4m-3..4m+3] packed along lanes.
    y1 = jnp.dot(xc_ref[...], w1c_ref[...], preferred_element_type=f32)
    y1 = _leaky(y1 + b1c_ref[...]) * m1_ref[...]     # zero shifted phases at row m==0

    # conv2 (32->64, k=3, s=2, p=1): columns = [o2[m-1] | e2[m] | o2[m]].
    y2 = jnp.dot(y1, w2c_ref[...], preferred_element_type=f32)
    y2 = _leaky(y2 + b2c_ref[...]) * m2_ref[...]     # zero o2[-1] at row m==0

    # conv3 (64->64, k=3, s=2, p=1): a3[i] from (o2[i-1], e2[i], o2[i]).
    a3 = jnp.dot(y2, w3c_ref[...], preferred_element_type=f32)
    a3 = _leaky(a3 + b3_ref[...])                    # (N*22, 64) channel-last

    # ---- flatten to (N, 1408) in (position, channel) order ------------------
    # (fc1 weight was permuted to this order in prepare_params.)
    abuf_ref[...] = a3
    for n in range(n_batch):                         # small static batch
        base = n * _L_PH
        for l in range(_L_PH):
            fbuf_ref[n:n + 1, l * _C3:(l + 1) * _C3] = abuf_ref[base + l:base + l + 1, :]

    # ---- FC stack (bf16 MXU operands, f32 accumulation) ---------------------
    feats = fbuf_ref[...].astype(jnp.bfloat16)       # (N, 1408)
    wk1_copy.wait()                                  # fc1 weight now in VMEM
    f1 = jnp.dot(feats, wk1_vmem[...], preferred_element_type=f32) + fb1_ref[...]
    f1 = _leaky(f1)
    f2 = jnp.dot(f1.astype(jnp.bfloat16), wk2_ref[...],
                 preferred_element_type=f32) + fb2_ref[...]
    f2 = _leaky(f2)
    f3 = jnp.dot(f2, wk3_ref[...], preferred_element_type=f32) + fb3_ref[...]
    # Sigmoid (f32 epilogue): exp on the EUP + reciprocal.
    out_ref[...] = pl.reciprocal(1.0 + jnp.exp(-f3)).astype(out_ref.dtype)


# ----------------------------------------------------------------------------
# One-time parameter re-layout (outside the hot path)
# ----------------------------------------------------------------------------
def prepare_params(p):
    w1, w2, w3 = p["w1"], p["w2"], p["w3"]           # (32,1,3), (64,32,3), (64,64,3)

    # conv1: block-banded (9, 224) weight. Phase ph computes a1[4m + ph - 3];
    # tap d of that output reads xc[:, ph + d].
    w1c = jnp.zeros((9, _W1C_N), jnp.float32)
    for ph in range(_NPH):
        for d in range(3):
            w1c = w1c.at[ph + d, ph * _C1:(ph + 1) * _C1].set(w1[:, 0, d])
    b1c = jnp.tile(p["b1"].reshape(1, -1), (1, _NPH))                 # (1, 224)

    # conv2: block-sparse (224, 192). Output blocks: 0=o2[m-1], 1=e2[m], 2=o2[m];
    # block `blk`, tap d reads conv1 phase p = 2*blk + d.
    w2c = jnp.zeros((_W1C_N, _W2C_N), jnp.float32)
    for blk in range(3):
        for d in range(3):
            ph = 2 * blk + d
            w2c = w2c.at[ph * _C1:(ph + 1) * _C1,
                         blk * _C2:(blk + 1) * _C2].set(w2[:, :, d].T)
    b2c = jnp.tile(p["b2"].reshape(1, -1), (1, 3))                    # (1, 192)

    # conv3: taps stacked along K: rows [o2[i-1] | e2 | o2].
    w3c = jnp.concatenate([w3[:, :, d].T for d in range(3)], axis=0)  # (192, 64)
    b3 = p["b3"].reshape(1, -1)

    # fc1: PyTorch flattening is feature = c*22 + l; the kernel flattens as
    # l*64 + c, so permute the weight once here (and cast to bf16).
    wk1 = jnp.transpose(p["fw1"].reshape(_F_H1, _C3, _L_PH), (2, 1, 0))
    wk1 = wk1.reshape(_F_IN, _F_H1).astype(jnp.bfloat16)              # (1408, 1024)
    wk2 = p["fw2"].T.astype(jnp.bfloat16)                             # (1024, 128)
    wk3 = p["fw3"].T                                                  # (128, O) f32
    return dict(
        w1c=w1c, b1c=b1c, w2c=w2c, b2c=b2c, w3c=w3c, b3=b3,
        wk1=wk1, fb1=p["fb1"].reshape(1, -1),
        wk2=wk2, fb2=p["fb2"].reshape(1, -1),
        wk3=wk3, fb3=p["fb3"].reshape(1, -1),
    )


def _prepare_inputs(x):
    """(N, 1, 88) NCL input -> (N*22, 9) conv1 tap tensor.

    xc[n*22 + m, j] = x[n, 0, 4m + j - 4] (zero outside [0, 88)); conv1 phase
    ph (output positions 4m + ph - 3) reads taps xc[:, ph:ph+3].
    """
    xs = x[:, 0, :]                                              # (N, 88)
    xs_ext = jnp.pad(xs, ((0, 0), (4, 4)))                       # (N, 96)
    idx = 4 * jnp.arange(_L_PH)[:, None] + jnp.arange(9)[None, :]
    return xs_ext[:, idx].reshape(-1, 9)                         # (N*22, 9)


def _zero_index_map(ndim):
    return lambda *_: (0,) * ndim


@jax.jit
def discriminator_forward(x, kp):
    """Fused forward: the whole Discriminator in a single pallas_call."""
    n = x.shape[0]
    rows = n * _L_PH
    outputn = kp["wk3"].shape[1]
    xc = _prepare_inputs(x)

    # Batch-boundary masks (row m == 0 of each sample):
    #   m1 zeroes the shifted conv1 phases (cols < 96)  -> a1[-1] padding.
    #   m2 zeroes the o2[m-1] block        (cols < 64)  -> a2[-1] padding.
    row_start = (jnp.arange(rows) % _L_PH) == 0
    m1 = jnp.where(row_start[:, None] & (jnp.arange(_W1C_N)[None, :] < 3 * _C1),
                   0.0, 1.0).astype(jnp.float32)
    m2 = jnp.where(row_start[:, None] & (jnp.arange(_W2C_N)[None, :] < _C2),
                   0.0, 1.0).astype(jnp.float32)

    args = (xc, m1, m2,
            kp["w1c"], kp["b1c"], kp["w2c"], kp["b2c"], kp["w3c"], kp["b3"],
            kp["wk1"], kp["fb1"], kp["wk2"], kp["fb2"], kp["wk3"], kp["fb3"])

    in_specs = []
    for i, a in enumerate(args):
        if i == 9:   # wk1 stays in HBM; DMA'd manually inside the kernel.
            in_specs.append(pl.BlockSpec(memory_space=pl.ANY))
        else:
            in_specs.append(pl.BlockSpec(a.shape, _zero_index_map(a.ndim)))

    flops = (2 * rows * (9 * _W1C_N + _W1C_N * _W2C_N + _W2C_N * _C3)
             + 2 * n * (_F_IN * _F_H1 + _F_H1 * _F_H2 + _F_H2 * outputn))
    bytes_accessed = sum(int(a.size) * a.dtype.itemsize for a in args) + n * outputn * 4

    out = pl.pallas_call(
        _discriminator_kernel,
        out_shape=jax.ShapeDtypeStruct((n, outputn), jnp.float32),
        grid=(1,),
        in_specs=in_specs,
        out_specs=pl.BlockSpec((n, outputn), _zero_index_map(2)),
        scratch_shapes=[
            pltpu.VMEM((_F_IN, _F_H1), jnp.bfloat16),     # fc1 weight landing buffer
            pltpu.SemaphoreType.DMA((1,)),                # its DMA semaphore
            pltpu.VMEM((rows, _C3), jnp.float32),         # conv3 output (contiguous)
            pltpu.VMEM((n, _F_IN), jnp.float32),          # flattened features
        ],
        cost_estimate=pl.CostEstimate(flops=flops,
                                      transcendentals=n * outputn,
                                      bytes_accessed=bytes_accessed),
        compiler_params=pltpu.CompilerParams(dimension_semantics=("arbitrary",)),
    )(*args)
    return out[:, 0] if outputn == 1 else out


# ----------------------------------------------------------------------------
# Parameters (deterministic synthetic init, PyTorch shapes)
# ----------------------------------------------------------------------------
def init_params(key, outputn=1):
    ks = jax.random.split(key, 12)

    def w(k, shape, scale=0.05):
        return scale * jax.random.normal(k, shape, jnp.float32)

    return dict(
        w1=w(ks[0], (_C1, 1, 3)), b1=w(ks[1], (_C1,)),
        w2=w(ks[2], (_C2, _C1, 3)), b2=w(ks[3], (_C2,)),
        w3=w(ks[4], (_C3, _C2, 3)), b3=w(ks[5], (_C3,)),
        fw1=w(ks[6], (_F_H1, _F_IN)), fb1=w(ks[7], (_F_H1,)),
        fw2=w(ks[8], (_F_H2, _F_H1)), fb2=w(ks[9], (_F_H2,)),
        fw3=w(ks[10], (outputn, _F_H2)), fb3=w(ks[11], (outputn,)),
    )


# ----------------------------------------------------------------------------
# Pure-JAX reference (correctness check only, f32 weights)
# ----------------------------------------------------------------------------
def reference_forward(x, p):
    def conv_lrelu(h, w, b, stride):
        y = lax.conv_general_dilated(
            h, w, (stride,), ((1, 1),), dimension_numbers=("NCH", "OIH", "NCH"))
        y = y + b[None, :, None]
        return jnp.where(y > 0, y, 0.2 * y)

    h = conv_lrelu(x, p["w1"], p["b1"], 1)
    h = conv_lrelu(h, p["w2"], p["b2"], 2)
    h = conv_lrelu(h, p["w3"], p["b3"], 2)
    f = h.reshape(h.shape[0], -1)

    def lin(v, w, b):
        return v @ w.T + b

    f = lin(f, p["fw1"], p["fb1"]); f = jnp.where(f > 0, f, 0.2 * f)
    f = lin(f, p["fw2"], p["fb2"]); f = jnp.where(f > 0, f, 0.2 * f)
    f = lin(f, p["fw3"], p["fb3"]); f = jax.nn.sigmoid(f)
    return jnp.squeeze(f, axis=1)


if __name__ == "__main__":
    key = jax.random.PRNGKey(0)
    kx, kparam = jax.random.split(key)
    x = jax.random.normal(kx, (2, 1, _L_IN), jnp.float32)   # (batch, channels=1, length=88)
    params = init_params(kparam, outputn=1)
    kparams = prepare_params(params)     # one-time weight re-layout / bf16 cast

    out = jax.block_until_ready(discriminator_forward(x, kparams))
    ref = jax.block_until_ready(reference_forward(x, params))

    assert out.shape == (2,), out.shape
    # bf16 FC weights vs. f32 reference -> slightly loosened tolerance.
    assert jnp.allclose(out, ref, atol=5e-3, rtol=5e-3), (out, ref)
    print("KERNEL_OK")
</pallas_src>

<mosaic_0001>
module attributes {stable_mosaic.version = 11 : i64} {
  func.func @_discriminator_kernel(%arg0: i32, %arg1: memref<44x9xf32, #tpu.memory_space<vmem>>, %arg2: memref<44x224xf32, #tpu.memory_space<vmem>>, %arg3: memref<44x192xf32, #tpu.memory_space<vmem>>, %arg4: memref<9x224xf32, #tpu.memory_space<vmem>>, %arg5: memref<1x224xf32, #tpu.memory_space<vmem>>, %arg6: memref<224x192xf32, #tpu.memory_space<vmem>>, %arg7: memref<1x192xf32, #tpu.memory_space<vmem>>, %arg8: memref<192x64xf32, #tpu.memory_space<vmem>>, %arg9: memref<1x64xf32, #tpu.memory_space<vmem>>, %arg10: memref<1408x1024xbf16, #tpu.memory_space<any>>, %arg11: memref<1x1024xf32, #tpu.memory_space<vmem>>, %arg12: memref<1024x128xbf16, #tpu.memory_space<vmem>>, %arg13: memref<1x128xf32, #tpu.memory_space<vmem>>, %arg14: memref<128x1xf32, #tpu.memory_space<vmem>>, %arg15: memref<1x1xf32, #tpu.memory_space<vmem>>, %arg16: memref<2x1xf32, #tpu.memory_space<vmem>>, %arg17: memref<1408x1024xbf16, #tpu.memory_space<vmem>>, %arg18: memref<1x!tpu.dma_semaphore, #tpu.memory_space<semaphore_mem>>, %arg19: memref<44x64xf32, #tpu.memory_space<vmem>>, %arg20: memref<2x1408xf32, #tpu.memory_space<vmem>>) attributes {dimension_semantics = [#tpu.dimension_semantics<arbitrary>], iteration_bounds = array<i64: 1>, scalar_prefetch = 0 : i64, scratch_operands = 4 : i64, tpu.core_type = #tpu.core_type<tc>, window_params = [{pipeline_mode = #tpu.pipeline_mode<synchronous>, transform_indices = @transform_0, window_bounds = array<i64: 44, 9>}, {pipeline_mode = #tpu.pipeline_mode<synchronous>, transform_indices = @transform_1, window_bounds = array<i64: 44, 224>}, {pipeline_mode = #tpu.pipeline_mode<synchronous>, transform_indices = @transform_2, window_bounds = array<i64: 44, 192>}, {pipeline_mode = #tpu.pipeline_mode<synchronous>, transform_indices = @transform_3, window_bounds = array<i64: 9, 224>}, {pipeline_mode = #tpu.pipeline_mode<synchronous>, transform_indices = @transform_4, window_bounds = array<i64: 1, 224>}, {pipeline_mode = #tpu.pipeline_mode<synchronous>, transform_indices = @transform_5, window_bounds = array<i64: 224, 192>}, {pipeline_mode = #tpu.pipeline_mode<synchronous>, transform_indices = @transform_6, window_bounds = array<i64: 1, 192>}, {pipeline_mode = #tpu.pipeline_mode<synchronous>, transform_indices = @transform_7, window_bounds = array<i64: 192, 64>}, {pipeline_mode = #tpu.pipeline_mode<synchronous>, transform_indices = @transform_8, window_bounds = array<i64: 1, 64>}, {}, {pipeline_mode = #tpu.pipeline_mode<synchronous>, transform_indices = @transform_10, window_bounds = array<i64: 1, 1024>}, {pipeline_mode = #tpu.pipeline_mode<synchronous>, transform_indices = @transform_11, window_bounds = array<i64: 1024, 128>}, {pipeline_mode = #tpu.pipeline_mode<synchronous>, transform_indices = @transform_12, window_bounds = array<i64: 1, 128>}, {pipeline_mode = #tpu.pipeline_mode<synchronous>, transform_indices = @transform_13, window_bounds = array<i64: 128, 1>}, {pipeline_mode = #tpu.pipeline_mode<synchronous>, transform_indices = @transform_14, window_bounds = array<i64: 1, 1>}, {pipeline_mode = #tpu.pipeline_mode<synchronous>, transform_indices = @transform_15, window_bounds = array<i64: 2, 1>}]} {
    %c0_i32 = arith.constant 0 : i32
    %0 = tpu.memref_slice %arg18[%c0_i32] : memref<1x!tpu.dma_semaphore, #tpu.memory_space<semaphore_mem>> -> memref<1x!tpu.dma_semaphore, #tpu.memory_space<semaphore_mem>>
    %1 = tpu.memref_squeeze %0 : memref<1x!tpu.dma_semaphore, #tpu.memory_space<semaphore_mem>> -> memref<!tpu.dma_semaphore, #tpu.memory_space<semaphore_mem>>
    tpu.enqueue_dma source(%arg10 : memref<1408x1024xbf16, #tpu.memory_space<any>>) target(%arg17 : memref<1408x1024xbf16, #tpu.memory_space<vmem>>) target_semaphore(%1 : memref<!tpu.dma_semaphore, #tpu.memory_space<semaphore_mem>>)
    %c0 = arith.constant 0 : index
    %c0_0 = arith.constant 0 : index
    %2 = vector.load %arg1[%c0, %c0_0] : memref<44x9xf32, #tpu.memory_space<vmem>>, vector<44x9xf32>
    %c0_1 = arith.constant 0 : index
    %c0_2 = arith.constant 0 : index
    %3 = vector.load %arg4[%c0_1, %c0_2] : memref<9x224xf32, #tpu.memory_space<vmem>>, vector<9x224xf32>
    %cst = arith.constant dense<0.000000e+00> : vector<44x224xf32>
    %4 = tpu.matmul %2, %3, %cst {dimension_numbers = #tpu.dot_dimension_numbers<[1], [0], [0], [1], [0, 0, 1, 1], [], []>} : vector<44x9xf32>, vector<9x224xf32>, vector<44x224xf32> -> vector<44x224xf32>
    %c0_3 = arith.constant 0 : index
    %c0_4 = arith.constant 0 : index
    %5 = vector.load %arg5[%c0_3, %c0_4] : memref<1x224xf32, #tpu.memory_space<vmem>>, vector<1x224xf32>
    %6 = vector.broadcast %5 : vector<1x224xf32> to vector<44x224xf32>
    %7 = arith.addf %4, %6 : vector<44x224xf32>
    %cst_5 = arith.constant 0.000000e+00 : f32
    %8 = vector.broadcast %cst_5 : f32 to vector<44x224xf32>
    %9 = arith.cmpf ogt, %7, %8 : vector<44x224xf32>
    %cst_6 = arith.constant 2.000000e-01 : f32
    %10 = vector.broadcast %cst_6 : f32 to vector<44x224xf32>
    %11 = arith.mulf %10, %7 : vector<44x224xf32>
    %12 = arith.select %9, %7, %11 : vector<44x224xi1>, vector<44x224xf32>
    %c0_7 = arith.constant 0 : index
    %c0_8 = arith.constant 0 : index
    %13 = vector.load %arg2[%c0_7, %c0_8] : memref<44x224xf32, #tpu.memory_space<vmem>>, vector<44x224xf32>
    %14 = arith.mulf %12, %13 : vector<44x224xf32>
    %c0_9 = arith.constant 0 : index
    %c0_10 = arith.constant 0 : index
    %15 = vector.load %arg6[%c0_9, %c0_10] : memref<224x192xf32, #tpu.memory_space<vmem>>, vector<224x192xf32>
    %cst_11 = arith.constant dense<0.000000e+00> : vector<44x192xf32>
    %16 = tpu.matmul %14, %15, %cst_11 {dimension_numbers = #tpu.dot_dimension_numbers<[1], [0], [0], [1], [0, 0, 1, 1], [], []>} : vector<44x224xf32>, vector<224x192xf32>, vector<44x192xf32> -> vector<44x192xf32>
    %c0_12 = arith.constant 0 : index
    %c0_13 = arith.constant 0 : index
    %17 = vector.load %arg7[%c0_12, %c0_13] : memref<1x192xf32, #tpu.memory_space<vmem>>, vector<1x192xf32>
    %18 = vector.broadcast %17 : vector<1x192xf32> to vector<44x192xf32>
    %19 = arith.addf %16, %18 : vector<44x192xf32>
    %cst_14 = arith.constant 0.000000e+00 : f32
    %20 = vector.broadcast %cst_14 : f32 to vector<44x192xf32>
    %21 = arith.cmpf ogt, %19, %20 : vector<44x192xf32>
    %cst_15 = arith.constant 2.000000e-01 : f32
    %22 = vector.broadcast %cst_15 : f32 to vector<44x192xf32>
    %23 = arith.mulf %22, %19 : vector<44x192xf32>
    %24 = arith.select %21, %19, %23 : vector<44x192xi1>, vector<44x192xf32>
    %c0_16 = arith.constant 0 : index
    %c0_17 = arith.constant 0 : index
    %25 = vector.load %arg3[%c0_16, %c0_17] : memref<44x192xf32, #tpu.memory_space<vmem>>, vector<44x192xf32>
    %26 = arith.mulf %24, %25 : vector<44x192xf32>
    %c0_18 = arith.constant 0 : index
    %c0_19 = arith.constant 0 : index
    %27 = vector.load %arg8[%c0_18, %c0_19] : memref<192x64xf32, #tpu.memory_space<vmem>>, vector<192x64xf32>
    %cst_20 = arith.constant dense<0.000000e+00> : vector<44x64xf32>
    %28 = tpu.matmul %26, %27, %cst_20 {dimension_numbers = #tpu.dot_dimension_numbers<[1], [0], [0], [1], [0, 0, 1, 1], [], []>} : vector<44x192xf32>, vector<192x64xf32>, vector<44x64xf32> -> vector<44x64xf32>
    %c0_21 = arith.constant 0 : index
    %c0_22 = arith.constant 0 : index
    %29 = vector.load %arg9[%c0_21, %c0_22] : memref<1x64xf32, #tpu.memory_space<vmem>>, vector<1x64xf32>
    %30 = vector.broadcast %29 : vector<1x64xf32> to vector<44x64xf32>
    %31 = arith.addf %28, %30 : vector<44x64xf32>
    %cst_23 = arith.constant 0.000000e+00 : f32
    %32 = vector.broadcast %cst_23 : f32 to vector<44x64xf32>
    %33 = arith.cmpf ogt, %31, %32 : vector<44x64xf32>
    %cst_24 = arith.constant 2.000000e-01 : f32
    %34 = vector.broadcast %cst_24 : f32 to vector<44x64xf32>
    %35 = arith.mulf %34, %31 : vector<44x64xf32>
    %36 = arith.select %33, %31, %35 : vector<44x64xi1>, vector<44x64xf32>
    %c0_25 = arith.constant 0 : index
    %c0_26 = arith.constant 0 : index
    %37 = vector.load %arg19[%c0_25, %c0_26] : memref<44x64xf32, #tpu.memory_space<vmem>>, vector<44x64xf32>
    tpu.vector_store %arg19[%c0_25, %c0_26], %36 {strides = array<i32>} : memref<44x64xf32, #tpu.memory_space<vmem>>, vector<44x64xf32>,
    %c0_27 = arith.constant 0 : index
    %c0_28 = arith.constant 0 : index
    %38 = vector.load %arg19[%c0_27, %c0_28] : memref<44x64xf32, #tpu.memory_space<vmem>>, vector<1x64xf32>
    %c0_29 = arith.constant 0 : index
    %c0_30 = arith.constant 0 : index
    %39 = vector.load %arg20[%c0_29, %c0_30] : memref<2x1408xf32, #tpu.memory_space<vmem>>, vector<1x64xf32>
    tpu.vector_store %arg20[%c0_29, %c0_30], %38 {strides = array<i32>} : memref<2x1408xf32, #tpu.memory_space<vmem>>, vector<1x64xf32>,
    %c1 = arith.constant 1 : index
    %c0_31 = arith.constant 0 : index
    %40 = vector.load %arg19[%c1, %c0_31] : memref<44x64xf32, #tpu.memory_space<vmem>>, vector<1x64xf32>
    %c0_32 = arith.constant 0 : index
    %c64 = arith.constant 64 : index
    %41 = vector.load %arg20[%c0_32, %c64] : memref<2x1408xf32, #tpu.memory_space<vmem>>, vector<1x64xf32>
    tpu.vector_store %arg20[%c0_32, %c64], %40 {strides = array<i32>} : memref<2x1408xf32, #tpu.memory_space<vmem>>, vector<1x64xf32>,
    %c2 = arith.constant 2 : index
    %c0_33 = arith.constant 0 : index
    %42 = vector.load %arg19[%c2, %c0_33] : memref<44x64xf32, #tpu.memory_space<vmem>>, vector<1x64xf32>
    %c0_34 = arith.constant 0 : index
    %c128 = arith.constant 128 : index
    %43 = vector.load %arg20[%c0_34, %c128] : memref<2x1408xf32, #tpu.memory_space<vmem>>, vector<1x64xf32>
    tpu.vector_store %arg20[%c0_34, %c128], %42 {strides = array<i32>} : memref<2x1408xf32, #tpu.memory_space<vmem>>, vector<1x64xf32>,
    %c3 = arith.constant 3 : index
    %c0_35 = arith.constant 0 : index
    %44 = vector.load %arg19[%c3, %c0_35] : memref<44x64xf32, #tpu.memory_space<vmem>>, vector<1x64xf32>
    %c0_36 = arith.constant 0 : index
    %c192 = arith.constant 192 : index
    %45 = vector.load %arg20[%c0_36, %c192] : memref<2x1408xf32, #tpu.memory_space<vmem>>, vector<1x64xf32>
    tpu.vector_store %arg20[%c0_36, %c192], %44 {strides = array<i32>} : memref<2x1408xf32, #tpu.memory_space<vmem>>, vector<1x64xf32>,
    %c4 = arith.constant 4 : index
    %c0_37 = arith.constant 0 : index
    %46 = vector.load %arg19[%c4, %c0_37] : memref<44x64xf32, #tpu.memory_space<vmem>>, vector<1x64xf32>
    %c0_38 = arith.constant 0 : index
    %c256 = arith.constant 256 : index
    %47 = vector.load %arg20[%c0_38, %c256] : memref<2x1408xf32, #tpu.memory_space<vmem>>, vector<1x64xf32>
    tpu.vector_store %arg20[%c0_38, %c256], %46 {strides = array<i32>} : memref<2x1408xf32, #tpu.memory_space<vmem>>, vector<1x64xf32>,
    %c5 = arith.constant 5 : index
    %c0_39 = arith.constant 0 : index
    %48 = vector.load %arg19[%c5, %c0_39] : memref<44x64xf32, #tpu.memory_space<vmem>>, vector<1x64xf32>
    %c0_40 = arith.constant 0 : index
    %c320 = arith.constant 320 : index
    %49 = vector.load %arg20[%c0_40, %c320] : memref<2x1408xf32, #tpu.memory_space<vmem>>, vector<1x64xf32>
    tpu.vector_store %arg20[%c0_40, %c320], %48 {strides = array<i32>} : memref<2x1408xf32, #tpu.memory_space<vmem>>, vector<1x64xf32>,
    %c6 = arith.constant 6 : index
    %c0_41 = arith.constant 0 : index
    %50 = vector.load %arg19[%c6, %c0_41] : memref<44x64xf32, #tpu.memory_space<vmem>>, vector<1x64xf32>
    %c0_42 = arith.constant 0 : index
    %c384 = arith.constant 384 : index
    %51 = vector.load %arg20[%c0_42, %c384] : memref<2x1408xf32, #tpu.memory_space<vmem>>, vector<1x64xf32>
    tpu.vector_store %arg20[%c0_42, %c384], %50 {strides = array<i32>} : memref<2x1408xf32, #tpu.memory_space<vmem>>, vector<1x64xf32>,
    %c7 = arith.constant 7 : index
    %c0_43 = arith.constant 0 : index
    %52 = vector.load %arg19[%c7, %c0_43] : memref<44x64xf32, #tpu.memory_space<vmem>>, vector<1x64xf32>
    %c0_44 = arith.constant 0 : index
    %c448 = arith.constant 448 : index
    %53 = vector.load %arg20[%c0_44, %c448] : memref<2x1408xf32, #tpu.memory_space<vmem>>, vector<1x64xf32>
    tpu.vector_store %arg20[%c0_44, %c448], %52 {strides = array<i32>} : memref<2x1408xf32, #tpu.memory_space<vmem>>, vector<1x64xf32>,
    %c8 = arith.constant 8 : index
    %c0_45 = arith.constant 0 : index
    %54 = vector.load %arg19[%c8, %c0_45] : memref<44x64xf32, #tpu.memory_space<vmem>>, vector<1x64xf32>
    %c0_46 = arith.constant 0 : index
    %c512 = arith.constant 512 : index
    %55 = vector.load %arg20[%c0_46, %c512] : memref<2x1408xf32, #tpu.memory_space<vmem>>, vector<1x64xf32>
    tpu.vector_store %arg20[%c0_46, %c512], %54 {strides = array<i32>} : memref<2x1408xf32, #tpu.memory_space<vmem>>, vector<1x64xf32>,
    %c9 = arith.constant 9 : index
    %c0_47 = arith.constant 0 : index
    %56 = vector.load %arg19[%c9, %c0_47] : memref<44x64xf32, #tpu.memory_space<vmem>>, vector<1x64xf32>
    %c0_48 = arith.constant 0 : index
    %c576 = arith.constant 576 : index
    %57 = vector.load %arg20[%c0_48, %c576] : memref<2x1408xf32, #tpu.memory_space<vmem>>, vector<1x64xf32>
    tpu.vector_store %arg20[%c0_48, %c576], %56 {strides = array<i32>} : memref<2x1408xf32, #tpu.memory_space<vmem>>, vector<1x64xf32>,
    %c10 = arith.constant 10 : index
    %c0_49 = arith.constant 0 : index
    %58 = vector.load %arg19[%c10, %c0_49] : memref<44x64xf32, #tpu.memory_space<vmem>>, vector<1x64xf32>
    %c0_50 = arith.constant 0 : index
    %c640 = arith.constant 640 : index
    %59 = vector.load %arg20[%c0_50, %c640] : memref<2x1408xf32, #tpu.memory_space<vmem>>, vector<1x64xf32>
    tpu.vector_store %arg20[%c0_50, %c640], %58 {strides = array<i32>} : memref<2x1408xf32, #tpu.memory_space<vmem>>, vector<1x64xf32>,
    %c11 = arith.constant 11 : index
    %c0_51 = arith.constant 0 : index
    %60 = vector.load %arg19[%c11, %c0_51] : memref<44x64xf32, #tpu.memory_space<vmem>>, vector<1x64xf32>
    %c0_52 = arith.constant 0 : index
    %c704 = arith.constant 704 : index
    %61 = vector.load %arg20[%c0_52, %c704] : memref<2x1408xf32, #tpu.memory_space<vmem>>, vector<1x64xf32>
    tpu.vector_store %arg20[%c0_52, %c704], %60 {strides = array<i32>} : memref<2x1408xf32, #tpu.memory_space<vmem>>, vector<1x64xf32>,
    %c12 = arith.constant 12 : index
    %c0_53 = arith.constant 0 : index
    %62 = vector.load %arg19[%c12, %c0_53] : memref<44x64xf32, #tpu.memory_space<vmem>>, vector<1x64xf32>
    %c0_54 = arith.constant 0 : index
    %c768 = arith.constant 768 : index
    %63 = vector.load %arg20[%c0_54, %c768] : memref<2x1408xf32, #tpu.memory_space<vmem>>, vector<1x64xf32>
    tpu.vector_store %arg20[%c0_54, %c768], %62 {strides = array<i32>} : memref<2x1408xf32, #tpu.memory_space<vmem>>, vector<1x64xf32>,
    %c13 = arith.constant 13 : index
    %c0_55 = arith.constant 0 : index
    %64 = vector.load %arg19[%c13, %c0_55] : memref<44x64xf32, #tpu.memory_space<vmem>>, vector<1x64xf32>
    %c0_56 = arith.constant 0 : index
    %c832 = arith.constant 832 : index
    %65 = vector.load %arg20[%c0_56, %c832] : memref<2x1408xf32, #tpu.memory_space<vmem>>, vector<1x64xf32>
    tpu.vector_store %arg20[%c0_56, %c832], %64 {strides = array<i32>} : memref<2x1408xf32, #tpu.memory_space<vmem>>, vector<1x64xf32>,
    %c14 = arith.constant 14 : index
    %c0_57 = arith.constant 0 : index
    %66 = vector.load %arg19[%c14, %c0_57] : memref<44x64xf32, #tpu.memory_space<vmem>>, vector<1x64xf32>
    %c0_58 = arith.constant 0 : index
    %c896 = arith.constant 896 : index
    %67 = vector.load %arg20[%c0_58, %c896] : memref<2x1408xf32, #tpu.memory_space<vmem>>, vector<1x64xf32>
    tpu.vector_store %arg20[%c0_58, %c896], %66 {strides = array<i32>} : memref<2x1408xf32, #tpu.memory_space<vmem>>, vector<1x64xf32>,
    %c15 = arith.constant 15 : index
    %c0_59 = arith.constant 0 : index
    %68 = vector.load %arg19[%c15, %c0_59] : memref<44x64xf32, #tpu.memory_space<vmem>>, vector<1x64xf32>
    %c0_60 = arith.constant 0 : index
    %c960 = arith.constant 960 : index
    %69 = vector.load %arg20[%c0_60, %c960] : memref<2x1408xf32, #tpu.memory_space<vmem>>, vector<1x64xf32>
    tpu.vector_store %arg20[%c0_60, %c960], %68 {strides = array<i32>} : memref<2x1408xf32, #tpu.memory_space<vmem>>, vector<1x64xf32>,
    %c16 = arith.constant 16 : index
    %c0_61 = arith.constant 0 : index
    %70 = vector.load %arg19[%c16, %c0_61] : memref<44x64xf32, #tpu.memory_space<vmem>>, vector<1x64xf32>
    %c0_62 = arith.constant 0 : index
    %c1024 = arith.constant 1024 : index
    %71 = vector.load %arg20[%c0_62, %c1024] : memref<2x1408xf32, #tpu.memory_space<vmem>>, vector<1x64xf32>
    tpu.vector_store %arg20[%c0_62, %c1024], %70 {strides = array<i32>} : memref<2x1408xf32, #tpu.memory_space<vmem>>, vector<1x64xf32>,
    %c17 = arith.constant 17 : index
    %c0_63 = arith.constant 0 : index
    %72 = vector.load %arg19[%c17, %c0_63] : memref<44x64xf32, #tpu.memory_space<vmem>>, vector<1x64xf32>
    %c0_64 = arith.constant 0 : index
    %c1088 = arith.constant 1088 : index
    %73 = vector.load %arg20[%c0_64, %c1088] : memref<2x1408xf32, #tpu.memory_space<vmem>>, vector<1x64xf32>
    tpu.vector_store %arg20[%c0_64, %c1088], %72 {strides = array<i32>} : memref<2x1408xf32, #tpu.memory_space<vmem>>, vector<1x64xf32>,
    %c18 = arith.constant 18 : index
    %c0_65 = arith.constant 0 : index
    %74 = vector.load %arg19[%c18, %c0_65] : memref<44x64xf32, #tpu.memory_space<vmem>>, vector<1x64xf32>
    %c0_66 = arith.constant 0 : index
    %c1152 = arith.constant 1152 : index
    %75 = vector.load %arg20[%c0_66, %c1152] : memref<2x1408xf32, #tpu.memory_space<vmem>>, vector<1x64xf32>
    tpu.vector_store %arg20[%c0_66, %c1152], %74 {strides = array<i32>} : memref<2x1408xf32, #tpu.memory_space<vmem>>, vector<1x64xf32>,
    %c19 = arith.constant 19 : index
    %c0_67 = arith.constant 0 : index
    %76 = vector.load %arg19[%c19, %c0_67] : memref<44x64xf32, #tpu.memory_space<vmem>>, vector<1x64xf32>
    %c0_68 = arith.constant 0 : index
    %c1216 = arith.constant 1216 : index
    %77 = vector.load %arg20[%c0_68, %c1216] : memref<2x1408xf32, #tpu.memory_space<vmem>>, vector<1x64xf32>
    tpu.vector_store %arg20[%c0_68, %c1216], %76 {strides = array<i32>} : memref<2x1408xf32, #tpu.memory_space<vmem>>, vector<1x64xf32>,
    %c20 = arith.constant 20 : index
    %c0_69 = arith.constant 0 : index
    %78 = vector.load %arg19[%c20, %c0_69] : memref<44x64xf32, #tpu.memory_space<vmem>>, vector<1x64xf32>
    %c0_70 = arith.constant 0 : index
    %c1280 = arith.constant 1280 : index
    %79 = vector.load %arg20[%c0_70, %c1280] : memref<2x1408xf32, #tpu.memory_space<vmem>>, vector<1x64xf32>
    tpu.vector_store %arg20[%c0_70, %c1280], %78 {strides = array<i32>} : memref<2x1408xf32, #tpu.memory_space<vmem>>, vector<1x64xf32>,
    %c21 = arith.constant 21 : index
    %c0_71 = arith.constant 0 : index
    %80 = vector.load %arg19[%c21, %c0_71] : memref<44x64xf32, #tpu.memory_space<vmem>>, vector<1x64xf32>
    %c0_72 = arith.constant 0 : index
    %c1344 = arith.constant 1344 : index
    %81 = vector.load %arg20[%c0_72, %c1344] : memref<2x1408xf32, #tpu.memory_space<vmem>>, vector<1x64xf32>
    tpu.vector_store %arg20[%c0_72, %c1344], %80 {strides = array<i32>} : memref<2x1408xf32, #tpu.memory_space<vmem>>, vector<1x64xf32>,
    %c22 = arith.constant 22 : index
    %c0_73 = arith.constant 0 : index
    %82 = vector.load %arg19[%c22, %c0_73] : memref<44x64xf32, #tpu.memory_space<vmem>>, vector<1x64xf32>
    %c1_74 = arith.constant 1 : index
    %c0_75 = arith.constant 0 : index
    %83 = vector.load %arg20[%c1_74, %c0_75] : memref<2x1408xf32, #tpu.memory_space<vmem>>, vector<1x64xf32>
    tpu.vector_store %arg20[%c1_74, %c0_75], %82 {strides = array<i32>} : memref<2x1408xf32, #tpu.memory_space<vmem>>, vector<1x64xf32>,
    %c23 = arith.constant 23 : index
    %c0_76 = arith.constant 0 : index
    %84 = vector.load %arg19[%c23, %c0_76] : memref<44x64xf32, #tpu.memory_space<vmem>>, vector<1x64xf32>
    %c1_77 = arith.constant 1 : index
    %c64_78 = arith.constant 64 : index
    %85 = vector.load %arg20[%c1_77, %c64_78] : memref<2x1408xf32, #tpu.memory_space<vmem>>, vector<1x64xf32>
    tpu.vector_store %arg20[%c1_77, %c64_78], %84 {strides = array<i32>} : memref<2x1408xf32, #tpu.memory_space<vmem>>, vector<1x64xf32>,
    %c24 = arith.constant 24 : index
    %c0_79 = arith.constant 0 : index
    %86 = vector.load %arg19[%c24, %c0_79] : memref<44x64xf32, #tpu.memory_space<vmem>>, vector<1x64xf32>
    %c1_80 = arith.constant 1 : index
    %c128_81 = arith.constant 128 : index
    %87 = vector.load %arg20[%c1_80, %c128_81] : memref<2x1408xf32, #tpu.memory_space<vmem>>, vector<1x64xf32>
    tpu.vector_store %arg20[%c1_80, %c128_81], %86 {strides = array<i32>} : memref<2x1408xf32, #tpu.memory_space<vmem>>, vector<1x64xf32>,
    %c25 = arith.constant 25 : index
    %c0_82 = arith.constant 0 : index
    %88 = vector.load %arg19[%c25, %c0_82] : memref<44x64xf32, #tpu.memory_space<vmem>>, vector<1x64xf32>
    %c1_83 = arith.constant 1 : index
    %c192_84 = arith.constant 192 : index
    %89 = vector.load %arg20[%c1_83, %c192_84] : memref<2x1408xf32, #tpu.memory_space<vmem>>, vector<1x64xf32>
    tpu.vector_store %arg20[%c1_83, %c192_84], %88 {strides = array<i32>} : memref<2x1408xf32, #tpu.memory_space<vmem>>, vector<1x64xf32>,
    %c26 = arith.constant 26 : index
    %c0_85 = arith.constant 0 : index
    %90 = vector.load %arg19[%c26, %c0_85] : memref<44x64xf32, #tpu.memory_space<vmem>>, vector<1x64xf32>
    %c1_86 = arith.constant 1 : index
    %c256_87 = arith.constant 256 : index
    %91 = vector.load %arg20[%c1_86, %c256_87] : memref<2x1408xf32, #tpu.memory_space<vmem>>, vector<1x64xf32>
    tpu.vector_store %arg20[%c1_86, %c256_87], %90 {strides = array<i32>} : memref<2x1408xf32, #tpu.memory_space<vmem>>, vector<1x64xf32>,
    %c27 = arith.constant 27 : index
    %c0_88 = arith.constant 0 : index
    %92 = vector.load %arg19[%c27, %c0_88] : memref<44x64xf32, #tpu.memory_space<vmem>>, vector<1x64xf32>
    %c1_89 = arith.constant 1 : index
    %c320_90 = arith.constant 320 : index
    %93 = vector.load %arg20[%c1_89, %c320_90] : memref<2x1408xf32, #tpu.memory_space<vmem>>, vector<1x64xf32>
    tpu.vector_store %arg20[%c1_89, %c320_90], %92 {strides = array<i32>} : memref<2x1408xf32, #tpu.memory_space<vmem>>, vector<1x64xf32>,
    %c28 = arith.constant 28 : index
    %c0_91 = arith.constant 0 : index
    %94 = vector.load %arg19[%c28, %c0_91] : memref<44x64xf32, #tpu.memory_space<vmem>>, vector<1x64xf32>
    %c1_92 = arith.constant 1 : index
    %c384_93 = arith.constant 384 : index
    %95 = vector.load %arg20[%c1_92, %c384_93] : memref<2x1408xf32, #tpu.memory_space<vmem>>, vector<1x64xf32>
    tpu.vector_store %arg20[%c1_92, %c384_93], %94 {strides = array<i32>} : memref<2x1408xf32, #tpu.memory_space<vmem>>, vector<1x64xf32>,
    %c29 = arith.constant 29 : index
    %c0_94 = arith.constant 0 : index
    %96 = vector.load %arg19[%c29, %c0_94] : memref<44x64xf32, #tpu.memory_space<vmem>>, vector<1x64xf32>
    %c1_95 = arith.constant 1 : index
    %c448_96 = arith.constant 448 : index
    %97 = vector.load %arg20[%c1_95, %c448_96] : memref<2x1408xf32, #tpu.memory_space<vmem>>, vector<1x64xf32>
    tpu.vector_store %arg20[%c1_95, %c448_96], %96 {strides = array<i32>} : memref<2x1408xf32, #tpu.memory_space<vmem>>, vector<1x64xf32>,
    %c30 = arith.constant 30 : index
    %c0_97 = arith.constant 0 : index
    %98 = vector.load %arg19[%c30, %c0_97] : memref<44x64xf32, #tpu.memory_space<vmem>>, vector<1x64xf32>
    %c1_98 = arith.constant 1 : index
    %c512_99 = arith.constant 512 : index
    %99 = vector.load %arg20[%c1_98, %c512_99] : memref<2x1408xf32, #tpu.memory_space<vmem>>, vector<1x64xf32>
    tpu.vector_store %arg20[%c1_98, %c512_99], %98 {strides = array<i32>} : memref<2x1408xf32, #tpu.memory_space<vmem>>, vector<1x64xf32>,
    %c31 = arith.constant 31 : index
    %c0_100 = arith.constant 0 : index
    %100 = vector.load %arg19[%c31, %c0_100] : memref<44x64xf32, #tpu.memory_space<vmem>>, vector<1x64xf32>
    %c1_101 = arith.constant 1 : index
    %c576_102 = arith.constant 576 : index
    %101 = vector.load %arg20[%c1_101, %c576_102] : memref<2x1408xf32, #tpu.memory_space<vmem>>, vector<1x64xf32>
    tpu.vector_store %arg20[%c1_101, %c576_102], %100 {strides = array<i32>} : memref<2x1408xf32, #tpu.memory_space<vmem>>, vector<1x64xf32>,
    %c32 = arith.constant 32 : index
    %c0_103 = arith.constant 0 : index
    %102 = vector.load %arg19[%c32, %c0_103] : memref<44x64xf32, #tpu.memory_space<vmem>>, vector<1x64xf32>
    %c1_104 = arith.constant 1 : index
    %c640_105 = arith.constant 640 : index
    %103 = vector.load %arg20[%c1_104, %c640_105] : memref<2x1408xf32, #tpu.memory_space<vmem>>, vector<1x64xf32>
    tpu.vector_store %arg20[%c1_104, %c640_105], %102 {strides = array<i32>} : memref<2x1408xf32, #tpu.memory_space<vmem>>, vector<1x64xf32>,
    %c33 = arith.constant 33 : index
    %c0_106 = arith.constant 0 : index
    %104 = vector.load %arg19[%c33, %c0_106] : memref<44x64xf32, #tpu.memory_space<vmem>>, vector<1x64xf32>
    %c1_107 = arith.constant 1 : index
    %c704_108 = arith.constant 704 : index
    %105 = vector.load %arg20[%c1_107, %c704_108] : memref<2x1408xf32, #tpu.memory_space<vmem>>, vector<1x64xf32>
    tpu.vector_store %arg20[%c1_107, %c704_108], %104 {strides = array<i32>} : memref<2x1408xf32, #tpu.memory_space<vmem>>, vector<1x64xf32>,
    %c34 = arith.constant 34 : index
    %c0_109 = arith.constant 0 : index
    %106 = vector.load %arg19[%c34, %c0_109] : memref<44x64xf32, #tpu.memory_space<vmem>>, vector<1x64xf32>
    %c1_110 = arith.constant 1 : index
    %c768_111 = arith.constant 768 : index
    %107 = vector.load %arg20[%c1_110, %c768_111] : memref<2x1408xf32, #tpu.memory_space<vmem>>, vector<1x64xf32>
    tpu.vector_store %arg20[%c1_110, %c768_111], %106 {strides = array<i32>} : memref<2x1408xf32, #tpu.memory_space<vmem>>, vector<1x64xf32>,
    %c35 = arith.constant 35 : index
    %c0_112 = arith.constant 0 : index
    %108 = vector.load %arg19[%c35, %c0_112] : memref<44x64xf32, #tpu.memory_space<vmem>>, vector<1x64xf32>
    %c1_113 = arith.constant 1 : index
    %c832_114 = arith.constant 832 : index
    %109 = vector.load %arg20[%c1_113, %c832_114] : memref<2x1408xf32, #tpu.memory_space<vmem>>, vector<1x64xf32>
    tpu.vector_store %arg20[%c1_113, %c832_114], %108 {strides = array<i32>} : memref<2x1408xf32, #tpu.memory_space<vmem>>, vector<1x64xf32>,
    %c36 = arith.constant 36 : index
    %c0_115 = arith.constant 0 : index
    %110 = vector.load %arg19[%c36, %c0_115] : memref<44x64xf32, #tpu.memory_space<vmem>>, vector<1x64xf32>
    %c1_116 = arith.constant 1 : index
    %c896_117 = arith.constant 896 : index
    %111 = vector.load %arg20[%c1_116, %c896_117] : memref<2x1408xf32, #tpu.memory_space<vmem>>, vector<1x64xf32>
    tpu.vector_store %arg20[%c1_116, %c896_117], %110 {strides = array<i32>} : memref<2x1408xf32, #tpu.memory_space<vmem>>, vector<1x64xf32>,
    %c37 = arith.constant 37 : index
    %c0_118 = arith.constant 0 : index
    %112 = vector.load %arg19[%c37, %c0_118] : memref<44x64xf32, #tpu.memory_space<vmem>>, vector<1x64xf32>
    %c1_119 = arith.constant 1 : index
    %c960_120 = arith.constant 960 : index
    %113 = vector.load %arg20[%c1_119, %c960_120] : memref<2x1408xf32, #tpu.memory_space<vmem>>, vector<1x64xf32>
    tpu.vector_store %arg20[%c1_119, %c960_120], %112 {strides = array<i32>} : memref<2x1408xf32, #tpu.memory_space<vmem>>, vector<1x64xf32>,
    %c38 = arith.constant 38 : index
    %c0_121 = arith.constant 0 : index
    %114 = vector.load %arg19[%c38, %c0_121] : memref<44x64xf32, #tpu.memory_space<vmem>>, vector<1x64xf32>
    %c1_122 = arith.constant 1 : index
    %c1024_123 = arith.constant 1024 : index
    %115 = vector.load %arg20[%c1_122, %c1024_123] : memref<2x1408xf32, #tpu.memory_space<vmem>>, vector<1x64xf32>
    tpu.vector_store %arg20[%c1_122, %c1024_123], %114 {strides = array<i32>} : memref<2x1408xf32, #tpu.memory_space<vmem>>, vector<1x64xf32>,
    %c39 = arith.constant 39 : index
    %c0_124 = arith.constant 0 : index
    %116 = vector.load %arg19[%c39, %c0_124] : memref<44x64xf32, #tpu.memory_space<vmem>>, vector<1x64xf32>
    %c1_125 = arith.constant 1 : index
    %c1088_126 = arith.constant 1088 : index
    %117 = vector.load %arg20[%c1_125, %c1088_126] : memref<2x1408xf32, #tpu.memory_space<vmem>>, vector<1x64xf32>
    tpu.vector_store %arg20[%c1_125, %c1088_126], %116 {strides = array<i32>} : memref<2x1408xf32, #tpu.memory_space<vmem>>, vector<1x64xf32>,
    %c40 = arith.constant 40 : index
    %c0_127 = arith.constant 0 : index
    %118 = vector.load %arg19[%c40, %c0_127] : memref<44x64xf32, #tpu.memory_space<vmem>>, vector<1x64xf32>
    %c1_128 = arith.constant 1 : index
    %c1152_129 = arith.constant 1152 : index
    %119 = vector.load %arg20[%c1_128, %c1152_129] : memref<2x1408xf32, #tpu.memory_space<vmem>>, vector<1x64xf32>
    tpu.vector_store %arg20[%c1_128, %c1152_129], %118 {strides = array<i32>} : memref<2x1408xf32, #tpu.memory_space<vmem>>, vector<1x64xf32>,
    %c41 = arith.constant 41 : index
    %c0_130 = arith.constant 0 : index
    %120 = vector.load %arg19[%c41, %c0_130] : memref<44x64xf32, #tpu.memory_space<vmem>>, vector<1x64xf32>
    %c1_131 = arith.constant 1 : index
    %c1216_132 = arith.constant 1216 : index
    %121 = vector.load %arg20[%c1_131, %c1216_132] : memref<2x1408xf32, #tpu.memory_space<vmem>>, vector<1x64xf32>
    tpu.vector_store %arg20[%c1_131, %c1216_132], %120 {strides = array<i32>} : memref<2x1408xf32, #tpu.memory_space<vmem>>, vector<1x64xf32>,
    %c42 = arith.constant 42 : index
    %c0_133 = arith.constant 0 : index
    %122 = vector.load %arg19[%c42, %c0_133] : memref<44x64xf32, #tpu.memory_space<vmem>>, vector<1x64xf32>
    %c1_134 = arith.constant 1 : index
    %c1280_135 = arith.constant 1280 : index
    %123 = vector.load %arg20[%c1_134, %c1280_135] : memref<2x1408xf32, #tpu.memory_space<vmem>>, vector<1x64xf32>
    tpu.vector_store %arg20[%c1_134, %c1280_135], %122 {strides = array<i32>} : memref<2x1408xf32, #tpu.memory_space<vmem>>, vector<1x64xf32>,
    %c43 = arith.constant 43 : index
    %c0_136 = arith.constant 0 : index
    %124 = vector.load %arg19[%c43, %c0_136] : memref<44x64xf32, #tpu.memory_space<vmem>>, vector<1x64xf32>
    %c1_137 = arith.constant 1 : index
    %c1344_138 = arith.constant 1344 : index
    %125 = vector.load %arg20[%c1_137, %c1344_138] : memref<2x1408xf32, #tpu.memory_space<vmem>>, vector<1x64xf32>
    tpu.vector_store %arg20[%c1_137, %c1344_138], %124 {strides = array<i32>} : memref<2x1408xf32, #tpu.memory_space<vmem>>, vector<1x64xf32>,
    %c0_139 = arith.constant 0 : index
    %c0_140 = arith.constant 0 : index
    %126 = vector.load %arg20[%c0_139, %c0_140] : memref<2x1408xf32, #tpu.memory_space<vmem>>, vector<2x1408xf32>
    %127 = arith.truncf %126 : vector<2x1408xf32> to vector<2x1408xbf16>
    %c0_i32_141 = arith.constant 0 : i32
    %128 = tpu.memref_slice %arg18[%c0_i32_141] : memref<1x!tpu.dma_semaphore, #tpu.memory_space<semaphore_mem>> -> memref<1x!tpu.dma_semaphore, #tpu.memory_space<semaphore_mem>>
    %129 = tpu.memref_squeeze %128 : memref<1x!tpu.dma_semaphore, #tpu.memory_space<semaphore_mem>> -> memref<!tpu.dma_semaphore, #tpu.memory_space<semaphore_mem>>
    tpu.wait_dma2 semaphore(%129 : memref<!tpu.dma_semaphore, #tpu.memory_space<semaphore_mem>>) src(%arg10 : memref<1408x1024xbf16, #tpu.memory_space<any>>) dst(%arg17 : memref<1408x1024xbf16, #tpu.memory_space<vmem>>)
    %c0_142 = arith.constant 0 : index
    %c0_143 = arith.constant 0 : index
    %130 = vector.load %arg17[%c0_142, %c0_143] : memref<1408x1024xbf16, #tpu.memory_space<vmem>>, vector<1408x1024xbf16>
    %cst_144 = arith.constant dense<0.000000e+00> : vector<2x1024xf32>
    %131 = tpu.matmul %127, %130, %cst_144 {dimension_numbers = #tpu.dot_dimension_numbers<[1], [0], [0], [1], [0, 0, 1, 1], [], []>} : vector<2x1408xbf16>, vector<1408x1024xbf16>, vector<2x1024xf32> -> vector<2x1024xf32>
    %c0_145 = arith.constant 0 : index
    %c0_146 = arith.constant 0 : index
    %132 = vector.load %arg11[%c0_145, %c0_146] : memref<1x1024xf32, #tpu.memory_space<vmem>>, vector<1x1024xf32>
    %133 = vector.broadcast %132 : vector<1x1024xf32> to vector<2x1024xf32>
    %134 = arith.addf %131, %133 : vector<2x1024xf32>
    %cst_147 = arith.constant 0.000000e+00 : f32
    %135 = vector.broadcast %cst_147 : f32 to vector<2x1024xf32>
    %136 = arith.cmpf ogt, %134, %135 : vector<2x1024xf32>
    %cst_148 = arith.constant 2.000000e-01 : f32
    %137 = vector.broadcast %cst_148 : f32 to vector<2x1024xf32>
    %138 = arith.mulf %137, %134 : vector<2x1024xf32>
    %139 = arith.select %136, %134, %138 : vector<2x1024xi1>, vector<2x1024xf32>
    %140 = arith.truncf %139 : vector<2x1024xf32> to vector<2x1024xbf16>
    %c0_149 = arith.constant 0 : index
    %c0_150 = arith.constant 0 : index
    %141 = vector.load %arg12[%c0_149, %c0_150] : memref<1024x128xbf16, #tpu.memory_space<vmem>>, vector<1024x128xbf16>
    %cst_151 = arith.constant dense<0.000000e+00> : vector<2x128xf32>
    %142 = tpu.matmul %140, %141, %cst_151 {dimension_numbers = #tpu.dot_dimension_numbers<[1], [0], [0], [1], [0, 0, 1, 1], [], []>} : vector<2x1024xbf16>, vector<1024x128xbf16>, vector<2x128xf32> -> vector<2x128xf32>
    %c0_152 = arith.constant 0 : index
    %c0_153 = arith.constant 0 : index
    %143 = vector.load %arg13[%c0_152, %c0_153] : memref<1x128xf32, #tpu.memory_space<vmem>>, vector<1x128xf32>
    %144 = vector.broadcast %143 : vector<1x128xf32> to vector<2x128xf32>
    %145 = arith.addf %142, %144 : vector<2x128xf32>
    %cst_154 = arith.constant 0.000000e+00 : f32
    %146 = vector.broadcast %cst_154 : f32 to vector<2x128xf32>
    %147 = arith.cmpf ogt, %145, %146 : vector<2x128xf32>
    %cst_155 = arith.constant 2.000000e-01 : f32
    %148 = vector.broadcast %cst_155 : f32 to vector<2x128xf32>
    %149 = arith.mulf %148, %145 : vector<2x128xf32>
    %150 = arith.select %147, %145, %149 : vector<2x128xi1>, vector<2x128xf32>
    %c0_156 = arith.constant 0 : index
    %c0_157 = arith.constant 0 : index
    %151 = vector.load %arg14[%c0_156, %c0_157] : memref<128x1xf32, #tpu.memory_space<vmem>>, vector<128x1xf32>
    %cst_158 = arith.constant dense<0.000000e+00> : vector<2x1xf32>
    %152 = tpu.matmul %150, %151, %cst_158 {dimension_numbers = #tpu.dot_dimension_numbers<[1], [0], [0], [1], [0, 0, 1, 1], [], []>} : vector<2x128xf32>, vector<128x1xf32>, vector<2x1xf32> -> vector<2x1xf32>
    %c0_159 = arith.constant 0 : index
    %c0_160 = arith.constant 0 : index
    %153 = vector.load %arg15[%c0_159, %c0_160] : memref<1x1xf32, #tpu.memory_space<vmem>>, vector<1x1xf32>
    %154 = vector.broadcast %153 : vector<1x1xf32> to vector<2x1xf32>
    %155 = arith.addf %152, %154 : vector<2x1xf32>
    %cst_161 = arith.constant 0.000000e+00 : f32
    %156 = vector.broadcast %cst_161 : f32 to vector<2x1xf32>
    %157 = arith.subf %156, %155 : vector<2x1xf32>
    %158 = math.exp %157 : vector<2x1xf32>
    %cst_162 = arith.constant 1.000000e+00 : f32
    %159 = vector.broadcast %cst_162 : f32 to vector<2x1xf32>
    %160 = arith.addf %159, %158 : vector<2x1xf32>
    %161 = tpu.reciprocal %160 : vector<2x1xf32> -> vector<2x1xf32>
    %c0_163 = arith.constant 0 : index
    %c0_164 = arith.constant 0 : index
    %162 = vector.load %arg16[%c0_163, %c0_164] : memref<2x1xf32, #tpu.memory_space<vmem>>, vector<2x1xf32>
    tpu.vector_store %arg16[%c0_163, %c0_164], %161 {strides = array<i32>} : memref<2x1xf32, #tpu.memory_space<vmem>>, vector<2x1xf32>,
    return
  }
  func.func @transform_0(%arg0: i32) -> (i32, i32) {
    %c0_i32 = arith.constant 0 : i32
    %c0_i32_0 = arith.constant 0 : i32
    %c0_i32_1 = arith.constant 0 : i32
    return %c0_i32, %c0_i32_0 : i32, i32
  }
  func.func @transform_1(%arg0: i32) -> (i32, i32) {
    %c0_i32 = arith.constant 0 : i32
    %c0_i32_0 = arith.constant 0 : i32
    %c0_i32_1 = arith.constant 0 : i32
    return %c0_i32, %c0_i32_0 : i32, i32
  }
  func.func @transform_2(%arg0: i32) -> (i32, i32) {
    %c0_i32 = arith.constant 0 : i32
    %c0_i32_0 = arith.constant 0 : i32
    %c0_i32_1 = arith.constant 0 : i32
    return %c0_i32, %c0_i32_0 : i32, i32
  }
  func.func @transform_3(%arg0: i32) -> (i32, i32) {
    %c0_i32 = arith.constant 0 : i32
    %c0_i32_0 = arith.constant 0 : i32
    %c0_i32_1 = arith.constant 0 : i32
    return %c0_i32, %c0_i32_0 : i32, i32
  }
  func.func @transform_4(%arg0: i32) -> (i32, i32) {
    %c0_i32 = arith.constant 0 : i32
    %c0_i32_0 = arith.constant 0 : i32
    %c0_i32_1 = arith.constant 0 : i32
    return %c0_i32, %c0_i32_0 : i32, i32
  }
  func.func @transform_5(%arg0: i32) -> (i32, i32) {
    %c0_i32 = arith.constant 0 : i32
    %c0_i32_0 = arith.constant 0 : i32
    %c0_i32_1 = arith.constant 0 : i32
    return %c0_i32, %c0_i32_0 : i32, i32
  }
  func.func @transform_6(%arg0: i32) -> (i32, i32) {
    %c0_i32 = arith.constant 0 : i32
    %c0_i32_0 = arith.constant 0 : i32
    %c0_i32_1 = arith.constant 0 : i32
    return %c0_i32, %c0_i32_0 : i32, i32
  }
  func.func @transform_7(%arg0: i32) -> (i32, i32) {
    %c0_i32 = arith.constant 0 : i32
    %c0_i32_0 = arith.constant 0 : i32
    %c0_i32_1 = arith.constant 0 : i32
    return %c0_i32, %c0_i32_0 : i32, i32
  }
  func.func @transform_8(%arg0: i32) -> (i32, i32) {
    %c0_i32 = arith.constant 0 : i32
    %c0_i32_0 = arith.constant 0 : i32
    %c0_i32_1 = arith.constant 0 : i32
    return %c0_i32, %c0_i32_0 : i32, i32
  }
  func.func @transform_10(%arg0: i32) -> (i32, i32) {
    %c0_i32 = arith.constant 0 : i32
    %c0_i32_0 = arith.constant 0 : i32
    %c0_i32_1 = arith.constant 0 : i32
    return %c0_i32, %c0_i32_0 : i32, i32
  }
  func.func @transform_11(%arg0: i32) -> (i32, i32) {
    %c0_i32 = arith.constant 0 : i32
    %c0_i32_0 = arith.constant 0 : i32
    %c0_i32_1 = arith.constant 0 : i32
    return %c0_i32, %c0_i32_0 : i32, i32
  }
  func.func @transform_12(%arg0: i32) -> (i32, i32) {
    %c0_i32 = arith.constant 0 : i32
    %c0_i32_0 = arith.constant 0 : i32
    %c0_i32_1 = arith.constant 0 : i32
    return %c0_i32, %c0_i32_0 : i32, i32
  }
  func.func @transform_13(%arg0: i32) -> (i32, i32) {
    %c0_i32 = arith.constant 0 : i32
    %c0_i32_0 = arith.constant 0 : i32
    %c0_i32_1 = arith.constant 0 : i32
    return %c0_i32, %c0_i32_0 : i32, i32
  }
  func.func @transform_14(%arg0: i32) -> (i32, i32) {
    %c0_i32 = arith.constant 0 : i32
    %c0_i32_0 = arith.constant 0 : i32
    %c0_i32_1 = arith.constant 0 : i32
    return %c0_i32, %c0_i32_0 : i32, i32
  }
  func.func @transform_15(%arg0: i32) -> (i32, i32) {
    %c0_i32 = arith.constant 0 : i32
    %c0_i32_0 = arith.constant 0 : i32
    %c0_i32_1 = arith.constant 0 : i32
    return %c0_i32, %c0_i32_0 : i32, i32
  }
}

</mosaic_0001>

<bundles_post_ra>
// kernel: discriminator_forward.1
= control target key start
LH: loop header
LB: loop body
LE: loop exit
PB: predicated region body
PF: predicated region fallthrough
CT: control target
= control target key end

     0   :  { %s9333_s0 = inlined_call_operand.vmem [shape: f32[44,9], index: 0, kind: input, shape index: {}]   ;;  %s9334_s1 = inlined_call_operand.vmem [shape: f32[44,224], index: 1, kind: input, shape index: {}]   ;;  %s9335_s2 = inlined_call_operand.vmem [shape: f32[44,192], index: 2, kind: input, shape index: {}]   ;;  %s9336_s3 = inlined_call_operand.hbm [shape: f32[9,224], index: 3, kind: input, shape index: {}]   ;;  %s9337_s4 = inlined_call_operand.hbm [shape: f32[1,224], index: 4, kind: input, shape index: {}]   ;;  %s9338_s5 = inlined_call_operand.vmem [shape: f32[224,192], index: 5, kind: input, shape index: {}]   ;;  %s9339_s6 = inlined_call_operand.hbm [shape: f32[1,192], index: 6, kind: input, shape index: {}]   ;;  %s9340_s7 = inlined_call_operand.vmem [shape: f32[192,64], index: 7, kind: input, shape index: {}]   ;;  %s9341_s8 = inlined_call_operand.hbm [shape: f32[1,64], index: 8, kind: input, shape index: {}]   ;;  %s9342_s9 = inlined_call_operand.hbm [shape: bf16[1408,1024], index: 9, kind: input, shape index: {}]   ;;  %s9343_s10 = inlined_call_operand.hbm [shape: f32[1,1024], index: 10, kind: input, shape index: {}]   ;;  %s9344_s11 = inlined_call_operand.hbm [shape: bf16[1024,128], index: 11, kind: input, shape index: {}]   ;;  %s9345_s12 = inlined_call_operand.hbm [shape: f32[1,128], index: 12, kind: input, shape index: {}]   ;;  %s9346_s13 = inlined_call_operand.vmem [shape: f32[128,1], index: 13, kind: input, shape index: {}]   ;;  %s9347_s14 = inlined_call_operand.<no memory space> [shape: f32[1,1], index: 14, kind: input, shape index: {}]   ;;  %s9348_s15 = inlined_call_operand.vmem [shape: f32[2,1], index: 15, kind: output, shape index: {}]  }
   0x1   :  { %v20_v0 = vstv %s9347_s14 }
   0x2   :  { %21 = vst [vmem:[#allocation6] sm:$0x1] %v20_v0 }
   0x3   :  { %22 = vsyncpa [#allocation8], 0 }
   0x4   :  { %23 = vsyncpa [#allocation10], 0 }
   0x5   :  { %24 = vsyncpa [#allocation13], 0 }
   0x6   :  { %25 = vsyncpa [#allocation16], 0  ;;  %s8479_s20 = smov [#allocation9]   ;;  %s8480_s22 = smov [#allocation12]  }
   0x7   :  { %s50_s21 = sshll.u32 %s8479_s20, 4  ;;  %s74_s23 = sshll.u32 %s8480_s22, 4  ;;  %s51_s21 = int_to_ptr.vmem [resolvable:$true] %s50_s21  ;;  %s75_s23 = int_to_ptr.vmem [resolvable:$true] %s74_s23 }
   0x8   :  { %s8317_s24 = scalar_lea.vmem %s51_s21, 32  ;;  %p8322_p1 = scmp.lt.s32.totalorder %s51_s21, %s51_s21 }
   0x9   :  { %p8318_p0 = scmp.ne.s32.totalorder %s51_s21, %s8317_s24  ;;  %p8323_p2 = scmp.lt.s32.totalorder %s8317_s24, %s8317_s24 }
   0xb   :  { %p8324_p3 = por %p8323_p2, %p8322_p1 }
   0xd   :  { %p8325_p4 = pnand %p8324_p3, %p8318_p0 }
   0xf   :  { %8328 = shalt.err (!%p8325_p4)
}
  0x10   :  { %53 = dma.hbm_to_vmem [thread:$0]  %s9337_s4, 32, %s51_s21, [#allocation10]  }
  0x11   :  { %s8337_s26 = scalar_lea.vmem %s75_s23, 16  ;;  %s8341_s27 = scalar_lea.vmem %s75_s23, 32 }
  0x12   :  { %p8338_p5 = scmp.ne.s32.totalorder %s75_s23, %s8337_s26  ;;  %p8342_p6 = scmp.lt.s32.totalorder %s75_s23, %s75_s23 }
  0x13   :  { %p8343_p7 = scmp.lt.s32.totalorder %s8341_s27, %s8337_s26 }
  0x15   :  { %p8344_p8 = por %p8343_p7, %p8342_p6 }
  0x17   :  { %p8345_p9 = pnand %p8344_p8, %p8338_p5 }
  0x19   :  { %8348 = shalt.err (!%p8345_p9)
}
  0x1a   :  { %77 = dma.hbm_to_vmem [thread:$0]  %s9341_s8, 16, %s75_s23, [#allocation13]  }
  0x1b   :  { %s8481_s30 = smov [#allocation15]  }
  0x1c   :  { %s93_s16 = sshll.u32 %s8481_s30, 4  ;;  %s94_s16 = int_to_ptr.vmem [resolvable:$true] %s93_s16 }
  0x1d   :  { %s8357_s17 = scalar_lea.vmem %s94_s16, 8192  ;;  %p8362_p11 = scmp.lt.s32.totalorder %s94_s16, %s94_s16 }
  0x1e   :  { %p8358_p10 = scmp.ne.s32.totalorder %s94_s16, %s8357_s17  ;;  %p8363_p12 = scmp.lt.s32.totalorder %s8357_s17, %s8357_s17 }
  0x20   :  { %p8364_p13 = por %p8363_p12, %p8362_p11 }
  0x22   :  { %p8365_p0 = pnand %p8364_p13, %p8358_p10 }
  0x24   :  { %8368 = shalt.err (!%p8365_p0)
}
  0x25   :  { %s8482_s4 = smov 64   ;;  %s8483_s18 = smov 4  }
  0x26   :  { %99 = dma.hbm_to_vmem [thread:$0]  %s9344_s11, 8192, %s94_s16, [#allocation16], %s8482_s4, %s8482_s4, %s8483_s18  }
  0x27   :  { %s8484_s21 = smov [#allocation7]  }
  0x28   :  { %s37_s8 = sshll.u32 %s8484_s21, 4  ;;  %s38_s8 = int_to_ptr.vmem [resolvable:$true] %s37_s8 }
  0x29   :  { %s8377_s22 = scalar_lea.vmem %s38_s8, 512  ;;  %p8382_p2 = scmp.lt.s32.totalorder %s38_s8, %s38_s8 }
  0x2a   :  { %p8378_p1 = scmp.ne.s32.totalorder %s38_s8, %s8377_s22  ;;  %p8383_p3 = scmp.lt.s32.totalorder %s8377_s22, %s8377_s22 }
  0x2c   :  { %p8384_p4 = por %p8383_p3, %p8382_p2 }
  0x2e   :  { %p8385_p5 = pnand %p8384_p4, %p8378_p1 }
  0x30   :  { %8388 = shalt.err (!%p8385_p5)
}
  0x31   :  { %s8485_s23 = smov 256   ;;  %s8486_s24 = smov 16  }
  0x32   :  { %43 = dma.hbm_to_vmem [thread:$0]  %s9336_s3, 512, %s38_s8, [#allocation8], %s8485_s23, %s8485_s23, %s8486_s24  }
  0x33   :  { %s8487_s26 = smov [#allocation11]   ;;  %s8488_s28 = smov [#allocation14]  }
  0x34   :  { %s62_s27 = sshll.u32 %s8487_s26, 4  ;;  %s84_s11 = sshll.u32 %s8488_s28, 4  ;;  %s63_s27 = int_to_ptr.vmem [resolvable:$true] %s62_s27  ;;  %s85_s11 = int_to_ptr.vmem [resolvable:$true] %s84_s11 }
  0x35   :  { %s8397_s29 = scalar_lea.vmem %s63_s27, 32  ;;  %p8402_p7 = scmp.lt.s32.totalorder %s63_s27, %s63_s27 }
  0x36   :  { %p8398_p6 = scmp.ne.s32.totalorder %s63_s27, %s8397_s29  ;;  %p8403_p8 = scmp.lt.s32.totalorder %s8397_s29, %s8397_s29 }
  0x38   :  { %p8404_p9 = por %p8403_p8, %p8402_p7 }
  0x3a   :  { %p8405_p10 = pnand %p8404_p9, %p8398_p6 }
  0x3c   :  { %8408 = shalt.err (!%p8405_p10)
}
  0x3d   :  { %65 = dma.hbm_to_vmem [thread:$0]  %s9339_s6, 32, %s63_s27, [#allocation10]  }
  0x3e   :  { %s8417_s17 = scalar_lea.vmem %s85_s11, 128  ;;  %p8422_p12 = scmp.lt.s32.totalorder %s85_s11, %s85_s11 }
  0x3f   :  { %p8418_p11 = scmp.ne.s32.totalorder %s85_s11, %s8417_s17  ;;  %p8423_p13 = scmp.lt.s32.totalorder %s8417_s17, %s8417_s17 }
  0x41   :  { %p8424_p0 = por %p8423_p13, %p8422_p12 }
  0x43   :  { %p8425_p1 = pnand %p8424_p0, %p8418_p11 }
  0x45   :  { %8428 = shalt.err (!%p8425_p1)
}
  0x46   :  { %87 = dma.hbm_to_vmem [thread:$0]  %s9343_s10, 128, %s85_s11, [#allocation13]  }
  0x47   :  { %s8489_s19 = smov [#allocation17]  }
  0x48   :  { %s106_s20 = sshll.u32 %s8489_s19, 4  ;;  %s107_s20 = int_to_ptr.vmem [resolvable:$true] %s106_s20 }
  0x49   :  { %s8437_s21 = scalar_lea.vmem %s107_s20, 16  ;;  %s8441_s8 = scalar_lea.vmem %s107_s20, 32 }
  0x4a   :  { %p8438_p2 = scmp.ne.s32.totalorder %s107_s20, %s8437_s21  ;;  %p8442_p3 = scmp.lt.s32.totalorder %s107_s20, %s107_s20 }
  0x4b   :  { %p8443_p4 = scmp.lt.s32.totalorder %s8441_s8, %s8437_s21 }
  0x4d   :  { %p8444_p5 = por %p8443_p4, %p8442_p3 }
  0x4f   :  { %p8445_p6 = pnand %p8444_p5, %p8438_p2 }
  0x51   :  { %8448 = shalt.err (!%p8445_p6)
}
  0x52   :  { %109 = dma.hbm_to_vmem [thread:$0]  %s9345_s12, 16, %s107_s20, [#allocation16]  }
  0x53   :  { %8469 = dma.done.wait [#allocation8], 512  }
  0x54   :  { %8470 = vsyncadd [#allocation8], 4294966784 }
  0x55   :  { %8471 = dma.done.wait [#allocation10], 64  }
  0x56   :  { %8472 = vsyncadd [#allocation10], 4294967232 }
  0x57   :  { %8473 = dma.done.wait [#allocation13], 144  }
  0x58   :  { %8474 = vsyncadd [#allocation13], 4294967152 }
  0x59   :  { %8475 = dma.done.wait [#allocation16], 8208  }
  0x5a   :  { %8476 = vsyncadd [#allocation16], 4294959088  ;;  %v8490_v1 = vmov 0.0   ;;  %vm188_vm0 = vcmask 1040384   ;;  %v156_v2 = vld [vmem:[#allocation7 + $0x18] sm:$0x1] }
  0x5b   :  { %259 = vmatprep.mubr.f32.mxu1 %v8490_v1  ;;  %654 = vmatprep.subr.mxu0 %v8490_v1  ;;  %v155_v3 = vld [vmem:[#allocation7 + $0x10] sm:$0x1]  ;;  %v154_v4 = vld [vmem:[#allocation7 + $0x8] sm:$0xff]  ;;  %v153_v5 = vld [vmem:[#allocation7] sm:$0xff]  ;;  %vm169_vm1 = vcmask 72704   ;;  %vm424_vm4 = vcmask 785408  }
  0x5c   :  { %7266 = vmatprep.subr.msk.mxu1 %vm188_vm0, %v156_v2  ;;  %v147_v6 = vld [vmem:[%s9333_s0] sm:$0xff]  ;;  %v387_v7 = vld [vmem:[%s9338_s5 + $0xf8] sm:$0xff]  ;;  %v386_v8 = vld [vmem:[%s9338_s5 + $0xf0] sm:$0xff] }
  0x5d   :  { %7267 = vmatpush1.msk.msra.mxu1 %vm188_vm0, %v155_v3  ;;  %v385_v9 = vld [vmem:[%s9338_s5 + $0xe8] sm:$0xff]  ;;  %v384_v10 = vld [vmem:[%s9338_s5 + $0xe0] sm:$0xff]  ;;  %v383_v12 = vld [vmem:[%s9338_s5 + $0xd8] sm:$0xff] }
  0x5e   :  { %225 = vmatprep.subr.mxu1 %v154_v4  ;;  %v148_v11 = vld [vmem:[%s9333_s0 + $0x8] sm:$0xff]  ;;  %v382_v13 = vld [vmem:[%s9338_s5 + $0xd0] sm:$0xff]  ;;  %v380_v15 = vld [vmem:[%s9338_s5 + $0xc0] sm:$0xff] }
  0x5f   :  { %226 = vmatpush1.msra.mxu1 %v153_v5  ;;  %v381_v14 = vld [vmem:[%s9338_s5 + $0xc8] sm:$0xff]  ;;  %v149_v16 = vld [vmem:[%s9333_s0 + $0x10] sm:$0xff]  ;;  %v379_v17 = vld [vmem:[%s9338_s5 + $0xb8] sm:$0xff] }
  0x60   :  { %7268 = vmatmul.mubr.msk.f32.vlgmr.msra.gmra.mxu1 %vm169_vm1, %v147_v6  ;;  %443 = vmatprep.subr.mxu1 %v387_v7  ;;  %v378_v18 = vld [vmem:[%s9338_s5 + $0xb0] sm:$0xff]  ;;  %v377_v19 = vld [vmem:[%s9338_s5 + $0xa8] sm:$0xff]  ;;  %v376_v20 = vld [vmem:[%s9338_s5 + $0xa0] sm:$0xff] }
  0x61   :  { %265 = vmatprep.mubr.f32.mxu1 %v8490_v1  ;;  %444 = vmatpush1.msra.mxu1 %v386_v8  ;;  %v150_v21 = vld [vmem:[%s9333_s0 + $0x18] sm:$0xff]  ;;  %v374_v23 = vld [vmem:[%s9338_s5 + $0x90] sm:$0xff]  ;;  %v373_v24 = vld [vmem:[%s9338_s5 + $0x88] sm:$0xff] }
  0x62   :  { %445 = vmatprep.subr.mxu1 %v385_v9  ;;  %v375_v22 = vld [vmem:[%s9338_s5 + $0x98] sm:$0xff]  ;;  %v372_v25 = vld [vmem:[%s9338_s5 + $0x80] sm:$0xff]  ;;  %v370_v28 = vld [vmem:[%s9338_s5 + $0x70] sm:$0xff] }
  0x63   :  { %446 = vmatpush1.msra.mxu1 %v384_v10  ;;  %v151_v26 = vld [vmem:[%s9333_s0 + $0x20] sm:$0xff]  ;;  %v371_v27 = vld [vmem:[%s9338_s5 + $0x78] sm:$0xff]  ;;  %v369_v29 = vld [vmem:[%s9338_s5 + $0x68] sm:$0xff] }
  0x64   :  { %7269 = vmatmul.mubr.msk.f32.gmra.mxu1 %vm169_vm1, %v148_v11  ;;  %447 = vmatprep.subr.mxu1 %v383_v12  ;;  %v368_v30 = vld [vmem:[%s9338_s5 + $0x60] sm:$0xff]  ;;  %v152_v31 = vld [vmem:[%s9333_s0 + $0x28] sm:$0xf]  ;;  %v367_v32 = vld [vmem:[%s9338_s5 + $0x58] sm:$0xff] }
  0x65   :  { %271 = vmatprep.mubr.f32.mxu1 %v8490_v1  ;;  %448 = vmatpush1.msra.mxu1 %v382_v13  ;;  %v366_v33 = vld [vmem:[%s9338_s5 + $0x50] sm:$0xff]  ;;  %v365_v34 = vld [vmem:[%s9338_s5 + $0x48] sm:$0xff]  ;;  %v364_v35 = vld [vmem:[%s9338_s5 + $0x40] sm:$0xff] }
  0x66   :  { %449 = vmatprep.subr.mxu1 %v381_v14  ;;  %v363_v36 = vld [vmem:[%s9338_s5 + $0x38] sm:$0xff]  ;;  %v362_v37 = vld [vmem:[%s9338_s5 + $0x30] sm:$0xff]  ;;  %v361_v38 = vld [vmem:[%s9338_s5 + $0x28] sm:$0xff] }
  0x67   :  { %450 = vmatpush1.msra.mxu1 %v380_v15  ;;  %v360_v39 = vld [vmem:[%s9338_s5 + $0x20] sm:$0xff]  ;;  %v359_v40 = vld [vmem:[%s9338_s5 + $0x18] sm:$0xff]  ;;  %v358_v41 = vld [vmem:[%s9338_s5 + $0x10] sm:$0xff] }
  0x68   :  { %7270 = vmatmul.mubr.msk.f32.gmra.mxu1 %vm169_vm1, %v149_v16  ;;  %451 = vmatprep.subr.mxu1 %v379_v17  ;;  %v357_v42 = vld [vmem:[%s9338_s5 + $0x8] sm:$0xff]  ;;  %v356_v43 = vld [vmem:[%s9338_s5] sm:$0xff]  ;;  %v411_v44 = vld [vmem:[%s9338_s5 + $0x1b8] sm:$0xff] }
  0x69   :  { %277 = vmatprep.mubr.f32.mxu1 %v8490_v1  ;;  %452 = vmatpush1.msra.mxu1 %v378_v18  ;;  %v410_v45 = vld [vmem:[%s9338_s5 + $0x1b0] sm:$0xff]  ;;  %v409_v46 = vld [vmem:[%s9338_s5 + $0x1a8] sm:$0xff]  ;;  %v408_v47 = vld [vmem:[%s9338_s5 + $0x1a0] sm:$0xff] }
  0x6a   :  { %453 = vmatprep.subr.mxu1 %v377_v19  ;;  %v407_v48 = vld [vmem:[%s9338_s5 + $0x198] sm:$0xff]  ;;  %v406_v49 = vld [vmem:[%s9338_s5 + $0x190] sm:$0xff]  ;;  %v405_v50 = vld [vmem:[%s9338_s5 + $0x188] sm:$0xff] }
  0x6b   :  { %454 = vmatpush1.msra.mxu1 %v376_v20  ;;  %v404_v51 = vld [vmem:[%s9338_s5 + $0x180] sm:$0xff]  ;;  %v403_v52 = vld [vmem:[%s9338_s5 + $0x178] sm:$0xff]  ;;  %v402_v53 = vld [vmem:[%s9338_s5 + $0x170] sm:$0xff] }
  0x6c   :  { %7271 = vmatmul.mubr.msk.f32.gmra.mxu1 %vm169_vm1, %v150_v21  ;;  %455 = vmatprep.subr.mxu1 %v375_v22  ;;  %v401_v54 = vld [vmem:[%s9338_s5 + $0x168] sm:$0xff]  ;;  %v400_v55 = vld [vmem:[%s9338_s5 + $0x160] sm:$0xff]  ;;  %v399_v56 = vld [vmem:[%s9338_s5 + $0x158] sm:$0xff] }
  0x6d   :  { %283 = vmatprep.mubr.f32.mxu1 %v8490_v1  ;;  %456 = vmatpush1.msra.mxu1 %v374_v23  ;;  %v398_v57 = vld [vmem:[%s9338_s5 + $0x150] sm:$0xff]  ;;  %v397_v58 = vld [vmem:[%s9338_s5 + $0x148] sm:$0xff]  ;;  %v396_v59 = vld [vmem:[%s9338_s5 + $0x140] sm:$0xff]  ;;  %v159_v23 = vlaneseq }
  0x6e   :  { %457 = vmatprep.subr.mxu1 %v373_v24  ;;  %v395_v60 = vld [vmem:[%s9338_s5 + $0x138] sm:$0xff]  ;;  %v394_v61 = vld [vmem:[%s9338_s5 + $0x130] sm:$0xff]  ;;  %v393_v62 = vld [vmem:[%s9338_s5 + $0x128] sm:$0xff] }
  0x6f   :  { %458 = vmatpush1.msra.mxu1 %v372_v25  ;;  %v392_v63 = vld [vmem:[%s9338_s5 + $0x120] sm:$0xff]  ;;  %v391_v0 = vld [vmem:[%s9338_s5 + $0x118] sm:$0xff]  ;;  %v390_v2 = vld [vmem:[%s9338_s5 + $0x110] sm:$0xff]  ;;  %v8872_v24 = vshrl.u32 %v159_v23, 7 }
  0x70   :  { %7272 = vmatmul.mubr.msk.f32.gmra.mxu1 %vm169_vm1, %v151_v26  ;;  %459 = vmatprep.subr.mxu1 %v371_v27  ;;  %v389_v3 = vld [vmem:[%s9338_s5 + $0x108] sm:$0xff]  ;;  %v388_v4 = vld [vmem:[%s9338_s5 + $0x100] sm:$0xff]  ;;  %v619_v5 = vld [vmem:[%s9340_s7 + $0x78] sm:$0xff] }
  0x71   :  { %289 = vmatprep.mubr.f32.mxu1 %v8490_v1  ;;  %460 = vmatpush1.msra.mxu1 %v370_v28  ;;  %v618_v6 = vld [vmem:[%s9340_s7 + $0x70] sm:$0xff]  ;;  %v617_v7 = vld [vmem:[%s9340_s7 + $0x68] sm:$0xff]  ;;  %v616_v8 = vld [vmem:[%s9340_s7 + $0x60] sm:$0xff]  ;;  %v8875_v25 = vsub.s32 0, %v8872_v24  ;;  %v8878_v27 = vsub.s32 1, %v8872_v24 }
  0x72   :  { %461 = vmatprep.subr.mxu1 %v369_v29  ;;  %655 = vmatpush1.msra.mxu0 %v619_v5  ;;  %v615_v9 = vld [vmem:[%s9340_s7 + $0x58] sm:$0xff]  ;;  %v614_v10 = vld [vmem:[%s9340_s7 + $0x50] sm:$0xff]  ;;  %v613_v11 = vld [vmem:[%s9340_s7 + $0x48] sm:$0xff] }
  0x73   :  { %462 = vmatpush1.msra.mxu1 %v368_v30  ;;  %656 = vmatprep.subr.mxu0 %v8490_v1  ;;  %v612_v12 = vld [vmem:[%s9340_s7 + $0x40] sm:$0xff]  ;;  %v611_v13 = vld [vmem:[%s9340_s7 + $0x38] sm:$0xff]  ;;  %v610_v14 = vld [vmem:[%s9340_s7 + $0x30] sm:$0xff] }
  0x74   :  { %7273 = vmatmul.mubr.msk.f32.gmra.mxu1 %vm169_vm1, %v152_v31  ;;  %463 = vmatprep.subr.mxu1 %v367_v32  ;;  %v609_v15 = vld [vmem:[%s9340_s7 + $0x28] sm:$0xff]  ;;  %v608_v16 = vld [vmem:[%s9340_s7 + $0x20] sm:$0xff]  ;;  %v607_v17 = vld [vmem:[%s9340_s7 + $0x18] sm:$0xff]  ;;  %vm635_vm1 = vcmask 523264  }
  0x75   :  { %464 = vmatpush1.msra.mxu1 %v366_v33  ;;  %657 = vmatpush1.msra.mxu0 %v618_v6  ;;  %v606_v18 = vld [vmem:[%s9340_s7 + $0x10] sm:$0xff]  ;;  %v605_v19 = vld [vmem:[%s9340_s7 + $0x8] sm:$0xff]  ;;  %v604_v20 = vld [vmem:[%s9340_s7] sm:$0xff] }
  0x76   :  { %465 = vmatprep.subr.mxu1 %v365_v34  ;;  %658 = vmatprep.subr.mxu0 %v8490_v1  ;;  %v627_v21 = vld [vmem:[%s9340_s7 + $0xb8] sm:$0xff]  ;;  %v626_v22 = vld [vmem:[%s9340_s7 + $0xb0] sm:$0xff]  ;;  %v157_v26 = vld [vmem:[#allocation9] sm:$0x3] }
  0x77   :  { %466 = vmatpush1.msra.mxu1 %v364_v35  ;;  %659 = vmatpush1.msra.mxu0 %v617_v7  ;;  %v8881_v28 = vrot.slane %v157_v26, %v8875_v25  ;;  %v8884_v29 = vrot.slane %v157_v26, %v8878_v27  ;;  %v338_v7 = vld [vmem:[%s9334_s1 + $0x30] sm:$0xff]  ;;  %v341_v23 = vld [vmem:[%s9334_s1 + $0x48] sm:$0xff] }
  0x78   :  { %467 = vmatprep.subr.mxu1 %v363_v36  ;;  %660 = vmatprep.subr.mxu0 %v8490_v1 }
  0x79   :  { %468 = vmatpush1.msra.mxu1 %v362_v37  ;;  %661 = vmatpush1.msra.mxu0 %v616_v8  ;;  %v332_v37 = vld [vmem:[%s9334_s1] sm:$0xff] }
  0x7a   :  { %469 = vmatprep.subr.mxu1 %v361_v38  ;;  %662 = vmatprep.subr.mxu0 %v8490_v1 }
  0x7b   :  { %470 = vmatpush1.msra.mxu1 %v360_v39  ;;  %663 = vmatpush1.msra.mxu0 %v615_v9  ;;  %v333_v39 = vld [vmem:[%s9334_s1 + $0x8] sm:$0xff] }
  0x7c   :  { %471 = vmatprep.subr.mxu1 %v359_v40  ;;  %664 = vmatprep.subr.mxu0 %v8490_v1 }
  0x7d   :  { %472 = vmatpush1.msra.mxu1 %v358_v41  ;;  %665 = vmatpush1.msra.mxu0 %v614_v10 }
  0x7e   :  { %473 = vmatprep.subr.mxu1 %v357_v42  ;;  %666 = vmatprep.subr.mxu0 %v8490_v1 }
  0x7f   :  { %474 = vmatpush1.msra.mxu1 %v356_v43  ;;  %667 = vmatpush1.msra.mxu0 %v613_v11  ;;  %v339_v11 = vld [vmem:[%s9334_s1 + $0x38] sm:$0xff] }
  0x80   :  { %483 = vmatprep.subr.mxu1 %v411_v44  ;;  %668 = vmatprep.subr.mxu0 %v8490_v1 }
  0x81   :  { %484 = vmatpush2.msra.mxu1 %v410_v45  ;;  %669 = vmatpush1.msra.mxu0 %v612_v12  ;;  %v334_v45 = vld [vmem:[%s9334_s1 + $0x10] sm:$0xff] }
  0x82   :  { %485 = vmatprep.subr.mxu1 %v409_v46  ;;  %670 = vmatprep.subr.mxu0 %v8490_v1 }
  0x83   :  { %486 = vmatpush2.msra.mxu1 %v408_v47  ;;  %671 = vmatpush1.msra.mxu0 %v611_v13 }
  0x84   :  { %487 = vmatprep.subr.mxu1 %v407_v48  ;;  %672 = vmatprep.subr.mxu0 %v8490_v1 }
  0x85   :  { %488 = vmatpush2.msra.mxu1 %v406_v49  ;;  %673 = vmatpush1.msra.mxu0 %v610_v14 }
  0x86   :  { %489 = vmatprep.subr.mxu1 %v405_v50  ;;  %674 = vmatprep.subr.mxu0 %v8490_v1  ;;  %v335_v50 = vld [vmem:[%s9334_s1 + $0x18] sm:$0xff] }
  0x87   :  { %490 = vmatpush2.msra.mxu1 %v404_v51  ;;  %675 = vmatpush1.msra.mxu0 %v609_v15 }
  0x88   :  { %491 = vmatprep.subr.mxu1 %v403_v52  ;;  %676 = vmatprep.subr.mxu0 %v8490_v1 }
  0x89   :  { %492 = vmatpush2.msra.mxu1 %v402_v53  ;;  %677 = vmatpush1.msra.mxu0 %v608_v16 }
  0x8a   :  { %493 = vmatprep.subr.mxu1 %v401_v54  ;;  %678 = vmatprep.subr.mxu0 %v8490_v1 }
  0x8b   :  { %494 = vmatpush2.msra.mxu1 %v400_v55  ;;  %679 = vmatpush1.msra.mxu0 %v607_v17 }
  0x8c   :  { %495 = vmatprep.subr.mxu1 %v399_v56  ;;  %680 = vmatprep.subr.mxu0 %v8490_v1 }
  0x8d   :  { %496 = vmatpush2.msra.mxu1 %v398_v57  ;;  %681 = vmatpush1.msra.mxu0 %v606_v18 }
  0x8e   :  { %497 = vmatprep.subr.mxu1 %v397_v58  ;;  %682 = vmatprep.subr.mxu0 %v8490_v1  ;;  %v336_v58 = vld [vmem:[%s9334_s1 + $0x20] sm:$0xff] }
  0x8f   :  { %498 = vmatpush2.msra.mxu1 %v396_v59  ;;  %683 = vmatpush1.msra.mxu0 %v605_v19  ;;  %v340_v19 = vld [vmem:[%s9334_s1 + $0x40] sm:$0xff] }
  0x90   :  { %499 = vmatprep.subr.mxu1 %v395_v60  ;;  %684 = vmatprep.subr.mxu0 %v8490_v1 }
  0x91   :  { %500 = vmatpush2.msra.mxu1 %v394_v61  ;;  %685 = vmatpush1.msra.mxu0 %v604_v20 }
  0x92   :  { %501 = vmatprep.subr.mxu1 %v393_v62  ;;  %702 = vmatprep.subr.mxu0 %v8490_v1  ;;  %v337_v62 = vld [vmem:[%s9334_s1 + $0x28] sm:$0xff] }
  0x93   :  { %502 = vmatpush2.msra.mxu1 %v392_v63  ;;  %703 = vmatpush2.msra.mxu0 %v627_v21 }
  0x94   :  { %503 = vmatprep.subr.mxu1 %v391_v0  ;;  %704 = vmatprep.subr.mxu0 %v8490_v1 }
  0x95   :  { %504 = vmatpush2.msra.mxu1 %v390_v2  ;;  %705 = vmatpush2.msra.mxu0 %v626_v22 }
  0x96   :  { %505 = vmatprep.subr.mxu1 %v389_v3  ;;  %706 = vmatprep.subr.mxu0 %v8490_v1 }
  0x97   :  { %506 = vmatpush2.msra.mxu1 %v388_v4 }
 0x120   :  { %v261_v30 = vpop.f32.mrf.mxu1 }
 0x121   :  { %v262_v31 = vadd.f32 %v261_v30, %v8881_v28 }
 0x122   :  { %v263_v32 = vpop.f32.mrf.mxu1 }
 0x123   :  { %vm296_vm2 = vcmp.gt.f32.partialorder %v262_v31, 0.0  ;;  %v308_v33 = vmul.f32 0.2, %v262_v31  ;;  %v264_v34 = vadd.f32 %v263_v32, %v8884_v29 }
 0x124   :  { %v267_v35 = vpop.f32.mrf.mxu1 }
 0x125   :  { %v320_v36 = vsel %vm296_vm2, %v262_v31, %v308_v33  ;;  %vm297_vm3 = vcmp.gt.f32.partialorder %v264_v34, 0.0  ;;  %v309_v38 = vmul.f32 0.2, %v264_v34  ;;  %v268_v40 = vadd.f32 %v267_v35, %v8881_v28 }
 0x126   :  { %v269_v41 = vpop.f32.mrf.mxu1  ;;  %v344_v46 = vmul.f32 %v332_v37, %v320_v36  ;;  %v342_v37 = vld [vmem:[%s9334_s1 + $0x50] sm:$0xf] }
 0x127   :  { %v321_v42 = vsel %vm297_vm3, %v264_v34, %v309_v38  ;;  %vm298_vm5 = vcmp.gt.f32.partialorder %v268_v40, 0.0  ;;  %v310_v43 = vmul.f32 0.2, %v268_v40  ;;  %v270_v44 = vadd.f32 %v269_v41, %v8884_v29 }
 0x128   :  { %v345_v47 = vmul.f32 %v333_v39, %v321_v42  ;;  %v273_v48 = vpop.f32.mrf.mxu1 }
 0x129   :  { %vm299_vm6 = vcmp.gt.f32.partialorder %v270_v44, 0.0  ;;  %v311_v49 = vmul.f32 0.2, %v270_v44  ;;  %v274_v51 = vadd.f32 %v273_v48, %v8881_v28  ;;  %v322_v52 = vsel %vm298_vm5, %v268_v40, %v310_v43  ;;  %v624_v43 = vld [vmem:[%s9340_s7 + $0xa0] sm:$0xff]  ;;  %v412_v48 = vld [vmem:[#allocation11] sm:$0x3] }
 0x12a   :  { %v275_v53 = vpop.f32.mrf.mxu1  ;;  %7274 = vmatprep.mubr.msk.f32.mxu1 %vm424_vm4, %v345_v47  ;;  %v346_v54 = vmul.f32 %v334_v45, %v322_v52  ;;  %v622_v45 = vld [vmem:[%s9340_s7 + $0x90] sm:$0xff]  ;;  %v620_v47 = vld [vmem:[%s9340_s7 + $0x80] sm:$0xff] }
 0x12b   :  { %v323_v55 = vsel %vm299_vm6, %v270_v44, %v311_v49  ;;  %vm300_vm7 = vcmp.gt.f32.partialorder %v274_v51, 0.0  ;;  %v312_v56 = vmul.f32 0.2, %v274_v51  ;;  %v276_v57 = vadd.f32 %v275_v53, %v8884_v29  ;;  %508 = vmatmul.mubr.f32.vlgmr.msra.gmra.mxu1 %v344_v46  ;;  %v623_v44 = vld [vmem:[%s9340_s7 + $0x98] sm:$0xff]  ;;  %v621_v46 = vld [vmem:[%s9340_s7 + $0x88] sm:$0xff] }
 0x12c   :  { %v347_v59 = vmul.f32 %v335_v50, %v323_v55  ;;  %v279_v60 = vpop.f32.mrf.mxu1  ;;  %v8964_v49 = vrot.slane %v412_v48, %v8875_v25  ;;  %v8967_v50 = vrot.slane %v412_v48, %v8878_v27 }
 0x12d   :  { %vm301_vm8 = vcmp.gt.f32.partialorder %v276_v57, 0.0  ;;  %v313_v61 = vmul.f32 0.2, %v276_v57  ;;  %v280_v63 = vadd.f32 %v279_v60, %v8881_v28  ;;  %v324_v0 = vsel %vm300_vm7, %v274_v51, %v312_v56 }
 0x12e   :  { %v281_v2 = vpop.f32.mrf.mxu1  ;;  %7275 = vmatprep.mubr.msk.f32.mxu1 %vm424_vm4, %v347_v59  ;;  %v348_v3 = vmul.f32 %v336_v58, %v324_v0  ;;  %v581_v59 = vld [vmem:[%s9335_s2 + $0x8] sm:$0xff] }
 0x12f   :  { %v325_v4 = vsel %vm301_vm8, %v276_v57, %v313_v61  ;;  %vm302_vm9 = vcmp.gt.f32.partialorder %v280_v63, 0.0  ;;  %v314_v5 = vmul.f32 0.2, %v280_v63  ;;  %v282_v6 = vadd.f32 %v281_v2, %v8884_v29  ;;  %514 = vmatmul.mubr.f32.gmra.mxu1 %v346_v54  ;;  %v580_v61 = vld [vmem:[%s9335_s2] sm:$0xff] }
 0x130   :  { %v349_v8 = vmul.f32 %v337_v62, %v325_v4  ;;  %v285_v9 = vpop.f32.mrf.mxu1 }
 0x131   :  { %vm303_vm10 = vcmp.gt.f32.partialorder %v282_v6, 0.0  ;;  %v315_v10 = vmul.f32 0.2, %v282_v6  ;;  %v286_v12 = vadd.f32 %v285_v9, %v8881_v28  ;;  %v326_v13 = vsel %vm302_vm9, %v280_v63, %v314_v5 }
 0x132   :  { %v287_v14 = vpop.f32.mrf.mxu1  ;;  %7276 = vmatprep.mubr.msk.f32.mxu1 %vm424_vm4, %v349_v8  ;;  %v350_v15 = vmul.f32 %v338_v7, %v326_v13  ;;  %v583_v7 = vld [vmem:[%s9335_s2 + $0x18] sm:$0xff] }
 0x133   :  { %v327_v16 = vsel %vm303_vm10, %v282_v6, %v315_v10  ;;  %vm304_vm11 = vcmp.gt.f32.partialorder %v286_v12, 0.0  ;;  %v316_v17 = vmul.f32 0.2, %v286_v12  ;;  %v288_v18 = vadd.f32 %v287_v14, %v8884_v29  ;;  %520 = vmatmul.mubr.f32.gmra.mxu1 %v348_v3  ;;  %v582_v10 = vld [vmem:[%s9335_s2 + $0x10] sm:$0xff] }
 0x134   :  { %v351_v20 = vmul.f32 %v339_v11, %v327_v16  ;;  %v291_v21 = vpop.f32.mrf.mxu1 }
 0x135   :  { %vm305_vm12 = vcmp.gt.f32.partialorder %v288_v18, 0.0  ;;  %v317_v22 = vmul.f32 0.2, %v288_v18  ;;  %v328_v26 = vsel %vm304_vm11, %v286_v12, %v316_v17  ;;  %v292_v30 = vadd.f32 %v291_v21, %v8881_v28  ;;  %v343_v28 = vld [vmem:[%s9334_s1 + $0x58] sm:$0xf] }
 0x136   :  { %7277 = vmatprep.mubr.msk.f32.mxu1 %vm424_vm4, %v351_v20  ;;  %v352_v31 = vmul.f32 %v340_v19, %v328_v26  ;;  %v293_v32 = vpop.f32.mrf.mxu1  ;;  %v585_v19 = vld [vmem:[%s9335_s2 + $0x28] sm:$0xff] }
 0x137   :  { %v329_v33 = vsel %vm305_vm12, %v288_v18, %v317_v22  ;;  %526 = vmatmul.mubr.f32.gmra.mxu1 %v350_v15  ;;  %vm306_vm13 = vcmp.gt.f32.partialorder %v292_v30, 0.0  ;;  %v318_v34 = vmul.f32 0.2, %v292_v30  ;;  %v294_v35 = vadd.f32 %v293_v32, %v8884_v29  ;;  %v625_v29 = vld [vmem:[%s9340_s7 + $0xa8] sm:$0xff]  ;;  %v584_v22 = vld [vmem:[%s9335_s2 + $0x20] sm:$0xff] }
 0x138   :  { %v353_v36 = vmul.f32 %v341_v23, %v329_v33  ;;  %707 = vmatpush2.msra.mxu0 %v625_v29  ;;  %v588_v29 = vld [vmem:[%s9335_s2 + $0x40] sm:$0xff] }
 0x139   :  { %vm307_vm14 = vcmp.gt.f32.partialorder %v294_v35, 0.0  ;;  %v319_v38 = vmul.f32 0.2, %v294_v35  ;;  %v330_v39 = vsel %vm306_vm13, %v292_v30, %v318_v34  ;;  %708 = vmatprep.subr.mxu0 %v8490_v1 }
 0x13a   :  { %7278 = vmatprep.mubr.msk.f32.mxu1 %vm424_vm4, %v353_v36  ;;  %v354_v41 = vmul.f32 %v342_v37, %v330_v39  ;;  %709 = vmatpush2.msra.mxu0 %v624_v43  ;;  %v587_v36 = vld [vmem:[%s9335_s2 + $0x38] sm:$0xff] }
 0x13b   :  { %532 = vmatmul.mubr.f32.gmra.mxu1 %v352_v31  ;;  %v331_v40 = vsel %vm307_vm14, %v294_v35, %v319_v38  ;;  %710 = vmatprep.subr.mxu0 %v8490_v1 }
 0x13c   :  { %v355_v42 = vmul.f32 %v343_v28, %v331_v40  ;;  %711 = vmatpush2.msra.mxu0 %v623_v44  ;;  %v586_v28 = vld [vmem:[%s9335_s2 + $0x30] sm:$0xff] }
 0x13d   :  { %712 = vmatprep.subr.mxu0 %v8490_v1 }
 0x13e   :  { %7279 = vmatprep.mubr.msk.f32.mxu1 %vm424_vm4, %v355_v42  ;;  %713 = vmatpush2.msra.mxu0 %v622_v45 }
 0x13f   :  { %538 = vmatmul.mubr.f32.gmra.mxu1 %v354_v41  ;;  %714 = vmatprep.subr.mxu0 %v8490_v1 }
 0x140   :  { %715 = vmatpush2.msra.mxu0 %v621_v46 }
 0x141   :  { %716 = vmatprep.subr.mxu0 %v8490_v1 }
 0x142   :  { %717 = vmatpush2.msra.mxu0 %v620_v47  ;;  %v589_v47 = vld [vmem:[%s9335_s2 + $0x48] sm:$0xff] }
 0x1eb   :  { %v509_v51 = vpop.f32.mrf.mxu1 }
 0x1ec   :  { %v510_v52 = vadd.f32 %v509_v51, %v8964_v49 }
 0x1ed   :  { %v511_v53 = vpop.f32.mrf.mxu1 }
 0x1ee   :  { %vm544_vm15 = vcmp.gt.f32.partialorder %v510_v52, 0.0  ;;  %v556_v54 = vmul.f32 0.2, %v510_v52  ;;  %v512_v55 = vadd.f32 %v511_v53, %v8967_v50 }
 0x1ef   :  { %v515_v56 = vpop.f32.mrf.mxu1 }
 0x1f0   :  { %v557_v57 = vmul.f32 0.2, %v512_v55  ;;  %v516_v58 = vadd.f32 %v515_v56, %v8964_v49  ;;  %vm545_vm0 = vcmp.gt.f32.partialorder %v512_v55, 0.0  ;;  %v568_v60 = vsel %vm544_vm15, %v510_v52, %v556_v54 }
 0x1f1   :  { %v517_v62 = vpop.f32.mrf.mxu1  ;;  %v592_v5 = vmul.f32 %v580_v61, %v568_v60  ;;  %vm775_vm15 = vcmask 516096  }
 0x1f2   :  { %vm546_vm2 = vcmp.gt.f32.partialorder %v516_v58, 0.0  ;;  %v558_v63 = vmul.f32 0.2, %v516_v58  ;;  %v518_v0 = vadd.f32 %v517_v62, %v8967_v50  ;;  %v569_v2 = vsel %vm545_vm0, %v512_v55, %v557_v57 }
 0x1f3   :  { %v521_v3 = vpop.f32.mrf.mxu1  ;;  %v593_v4 = vmul.f32 %v581_v59, %v569_v2 }
 0x1f4   :  { %vm547_vm3 = vcmp.gt.f32.partialorder %v518_v0, 0.0  ;;  %v559_v6 = vmul.f32 0.2, %v518_v0  ;;  %v522_v8 = vadd.f32 %v521_v3, %v8964_v49  ;;  %v570_v9 = vsel %vm546_vm2, %v516_v58, %v558_v63  ;;  %v590_v58 = vld [vmem:[%s9335_s2 + $0x50] sm:$0xf] }
 0x1f5   :  { %v523_v11 = vpop.f32.mrf.mxu1  ;;  %7281 = vmatprep.mubr.msk.f32.mxu0 %vm635_vm1, %v593_v4  ;;  %v594_v17 = vmul.f32 %v582_v10, %v570_v9 }
 0x1f6   :  { %v571_v12 = vsel %vm547_vm3, %v518_v0, %v559_v6  ;;  %vm548_vm4 = vcmp.gt.f32.partialorder %v522_v8, 0.0  ;;  %v560_v13 = vmul.f32 0.2, %v522_v8  ;;  %v524_v14 = vadd.f32 %v523_v11, %v8967_v50  ;;  %719 = vmatmul.mubr.f32.vlgmr.msra.gmra.mxu0 %v592_v5 }
 0x1f7   :  { %v595_v15 = vmul.f32 %v583_v7, %v571_v12  ;;  %v527_v16 = vpop.f32.mrf.mxu1 }
 0x1f8   :  { %vm549_vm5 = vcmp.gt.f32.partialorder %v524_v14, 0.0  ;;  %v561_v18 = vmul.f32 0.2, %v524_v14  ;;  %v528_v20 = vadd.f32 %v527_v16, %v8964_v49  ;;  %v572_v21 = vsel %vm548_vm4, %v522_v8, %v560_v13 }
 0x1f9   :  { %v529_v23 = vpop.f32.mrf.mxu1  ;;  %7282 = vmatprep.mubr.msk.f32.mxu0 %vm635_vm1, %v595_v15  ;;  %v596_v34 = vmul.f32 %v584_v22, %v572_v21  ;;  %vm772_vm4 = vcmask 519168  }
 0x1fa   :  { %v573_v26 = vsel %vm549_vm5, %v524_v14, %v561_v18  ;;  %vm550_vm6 = vcmp.gt.f32.partialorder %v528_v20, 0.0  ;;  %v562_v30 = vmul.f32 0.2, %v528_v20  ;;  %v530_v31 = vadd.f32 %v529_v23, %v8967_v50  ;;  %724 = vmatmul.mubr.f32.gmra.mxu0 %v594_v17 }
 0x1fb   :  { %v597_v32 = vmul.f32 %v585_v19, %v573_v26  ;;  %v533_v33 = vpop.f32.mrf.mxu1 }
 0x1fc   :  { %vm551_vm7 = vcmp.gt.f32.partialorder %v530_v31, 0.0  ;;  %v563_v35 = vmul.f32 0.2, %v530_v31  ;;  %v534_v37 = vadd.f32 %v533_v33, %v8964_v49  ;;  %v574_v38 = vsel %vm550_vm6, %v528_v20, %v562_v30 }
 0x1fd   :  { %v535_v39 = vpop.f32.mrf.mxu1  ;;  %7283 = vmatprep.mubr.msk.f32.mxu0 %vm635_vm1, %v597_v32  ;;  %v598_v44 = vmul.f32 %v586_v28, %v574_v38 }
 0x1fe   :  { %v575_v40 = vsel %vm551_vm7, %v530_v31, %v563_v35  ;;  %vm552_vm8 = vcmp.gt.f32.partialorder %v534_v37, 0.0  ;;  %v564_v41 = vmul.f32 0.2, %v534_v37  ;;  %v536_v42 = vadd.f32 %v535_v39, %v8967_v50  ;;  %729 = vmatmul.mubr.f32.gmra.mxu0 %v596_v34 }
 0x1ff   :  { %v599_v43 = vmul.f32 %v587_v36, %v575_v40  ;;  %v539_v45 = vpop.f32.mrf.mxu1 }
 0x200   :  { %vm553_vm9 = vcmp.gt.f32.partialorder %v536_v42, 0.0  ;;  %v565_v46 = vmul.f32 0.2, %v536_v42  ;;  %v576_v48 = vsel %vm552_vm8, %v534_v37, %v564_v41  ;;  %v540_v51 = vadd.f32 %v539_v45, %v8964_v49  ;;  %v591_v49 = vld [vmem:[%s9335_s2 + $0x58] sm:$0xf]  ;;  %s8491_s2 = smov [#allocation2]  }
 0x201   :  { %7284 = vmatprep.mubr.msk.f32.mxu0 %vm635_vm1, %v599_v43  ;;  %v600_v52 = vmul.f32 %v588_v29, %v576_v48  ;;  %v541_v53 = vpop.f32.mrf.mxu1  ;;  %s143_s28 = sshll.u32 %s8491_s2, 4  ;;  %s144_s28 = int_to_ptr.vmem [resolvable:$true] %s143_s28 }
 0x202   :  { %v577_v54 = vsel %vm553_vm9, %v536_v42, %v565_v46  ;;  %734 = vmatmul.mubr.f32.gmra.mxu0 %v598_v44  ;;  %vm554_vm10 = vcmp.gt.f32.partialorder %v540_v51, 0.0  ;;  %v566_v55 = vmul.f32 0.2, %v540_v51  ;;  %v542_v56 = vadd.f32 %v541_v53, %v8967_v50  ;;  %v7280_v50 = vld [vmem:[#allocation12] ss:$0 sm:$0xff]  ;;  %s8457_s11 = scalar_lea.vmem %s144_s28, 90112  ;;  %p8462_p8 = scmp.lt.s32.totalorder %s144_s28, %s144_s28 }
 0x203   :  { %v601_v57 = vmul.f32 %v589_v47, %v577_v54  ;;  %p8458_p7 = scmp.ne.s32.totalorder %s144_s28, %s8457_s11  ;;  %p8463_p9 = scmp.lt.s32.totalorder %s8457_s11, %s8457_s11 }
 0x204   :  { %vm555_vm11 = vcmp.gt.f32.partialorder %v542_v56, 0.0  ;;  %v567_v59 = vmul.f32 0.2, %v542_v56  ;;  %v578_v60 = vsel %vm554_vm10, %v540_v51, %v566_v55 }
 0x205   :  { %7285 = vmatprep.mubr.msk.f32.mxu0 %vm635_vm1, %v601_v57  ;;  %v602_v62 = vmul.f32 %v590_v58, %v578_v60  ;;  %p8464_p10 = por %p8463_p9, %p8462_p8 }
 0x206   :  { %739 = vmatmul.mubr.f32.gmra.mxu0 %v600_v52  ;;  %v579_v61 = vsel %vm555_vm11, %v542_v56, %v567_v59 }
 0x207   :  { %v603_v63 = vmul.f32 %v591_v49, %v579_v61  ;;  %p8465_p11 = pnand %p8464_p10, %p8458_p7 }
 0x209   :  { %7286 = vmatprep.mubr.msk.f32.mxu0 %vm635_vm1, %v603_v63 }
 0x20a   :  { %744 = vmatmul.mubr.f32.gmra.mxu0 %v602_v62 }
 0x2b6   :  { %v720_v0 = vpop.f32.mrf.mxu0 }
 0x2b7   :  { %v721_v2 = vadd.f32 %v7280_v50, %v720_v0 }
 0x2b8   :  { %v722_v3 = vpop.f32.mrf.mxu0 }
 0x2b9   :  { %vm749_vm12 = vcmp.gt.f32.partialorder %v721_v2, 0.0  ;;  %v755_v4 = vmul.f32 0.2, %v721_v2 }
 0x2ba   :  { %v725_v5 = vpop.f32.mrf.mxu0 }
 0x2bb   :  { %v761_v6 = vsel %vm749_vm12, %v721_v2, %v755_v4  ;;  %v726_v7 = vadd.f32 %v7280_v50, %v725_v5 }
 0x2bc   :  { %767 = vst.msk [vmem:[#allocation4] sm:$0xff] %vm635_vm1, %v761_v6  ;;  %v727_v8 = vpop.f32.mrf.mxu0 }
 0x2bd   :  { %vm750_vm13 = vcmp.gt.f32.partialorder %v726_v7, 0.0  ;;  %v756_v9 = vmul.f32 0.2, %v726_v7 }
 0x2be   :  { %v730_v10 = vpop.f32.mrf.mxu0 }
 0x2bf   :  { %v762_v11 = vsel %vm750_vm13, %v726_v7, %v756_v9  ;;  %v731_v12 = vadd.f32 %v7280_v50, %v730_v10 }
 0x2c0   :  { %768 = vst.msk [vmem:[#allocation4 + $0x8] sm:$0xff] %vm635_vm1, %v762_v11  ;;  %v732_v13 = vpop.f32.mrf.mxu0 }
 0x2c1   :  { %vm751_vm14 = vcmp.gt.f32.partialorder %v731_v12, 0.0  ;;  %v757_v14 = vmul.f32 0.2, %v731_v12 }
 0x2c2   :  { %v735_v15 = vpop.f32.mrf.mxu0 }
 0x2c3   :  { %v763_v16 = vsel %vm751_vm14, %v731_v12, %v757_v14  ;;  %v736_v17 = vadd.f32 %v7280_v50, %v735_v15  ;;  %v7289_v18 = vld.sshfl [vmem:[#allocation4 + $0x5] sm:$0x1 pattern:$0x76325410]  ;;  %v806_v19 = vld [vmem:[#allocation4 + $0x4] sm:$0x1] }
 0x2c4   :  { %769 = vst.msk [vmem:[#allocation4 + $0x10] sm:$0xff] %vm635_vm1, %v763_v16  ;;  %v737_v20 = vpop.f32.mrf.mxu0  ;;  %817 = vrot.lane.b32.xlu1 %v7289_v18, %s8482_s4  ;;  %v7287_v21 = vld.sshfl [vmem:[#allocation4 + $0x1] sm:$0x1 pattern:$0x76325410] }
 0x2c5   :  { %807 = vst.msk [vmem:[#allocation5 + $0x4] sm:$0x1] %vm775_vm15, %v806_v19  ;;  %v774_v22 = vld [vmem:[#allocation4] sm:$0x1]  ;;  %vm752_vm0 = vcmp.gt.f32.partialorder %v736_v17, 0.0  ;;  %786 = vrot.lane.b32.xlu0 %v7287_v21, %s8482_s4 }
 0x2c6   :  { %v758_v23 = vmul.f32 0.2, %v736_v17  ;;  %776 = vst.msk [vmem:[#allocation5] sm:$0x1] %vm775_vm15, %v774_v22  ;;  %v821_v26 = vld [vmem:[#allocation4 + $0x6] sm:$0x1]  ;;  %v740_v30 = vpop.f32.mrf.mxu0 }
 0x2c7   :  { %822 = vst.msk [vmem:[#allocation5 + $0x6] sm:$0x1] %vm775_vm15, %v821_v26  ;;  %v791_v31 = vld [vmem:[#allocation4 + $0x2] sm:$0x1]  ;;  %v741_v33 = vadd.f32 %v7280_v50, %v740_v30  ;;  %v851_v35 = vld [vmem:[#allocation4 + $0xa] sm:$0x1] }
 0x2c8   :  { %v764_v32 = vsel %vm752_vm0, %v736_v17, %v758_v23  ;;  %v7290_v34 = vld.sshfl [vmem:[#allocation4 + $0x7] sm:$0x1 pattern:$0x76325410]  ;;  %792 = vst.msk [vmem:[#allocation5 + $0x2] sm:$0x1] %vm775_vm15, %v791_v31  ;;  %v742_v36 = vpop.f32.mrf.mxu0 }
 0x2c9   :  { %770 = vst.msk [vmem:[#allocation4 + $0x18] sm:$0xff] %vm635_vm1, %v764_v32  ;;  %832 = vrot.lane.b32.xlu1 %v7290_v34, %s8482_s4  ;;  %v7288_v37 = vld.sshfl [vmem:[#allocation4 + $0x3] sm:$0x1 pattern:$0x76325410]  ;;  %vm753_vm2 = vcmp.gt.f32.partialorder %v741_v33, 0.0 }
 0x2ca   :  { %852 = vst.msk [vmem:[#allocation5 + $0xa] sm:$0x1] %vm775_vm15, %v851_v35  ;;  %v836_v38 = vld [vmem:[#allocation4 + $0x8] sm:$0x1]  ;;  %v759_v28 = vmul.f32 0.2, %v741_v33  ;;  %802 = vrot.lane.b32.xlu0 %v7288_v37, %s8482_s4  ;;  %v745_v40 = vpop.f32.mrf.mxu0 }
 0x2cb   :  { %837 = vst.msk [vmem:[#allocation5 + $0x8] sm:$0x1] %vm775_vm15, %v836_v38  ;;  %v881_v39 = vld [vmem:[#allocation4 + $0xe] sm:$0x1]  ;;  %v866_v41 = vld [vmem:[#allocation4 + $0xc] sm:$0x1]  ;;  %v746_v43 = vadd.f32 %v7280_v50, %v745_v40 }
 0x2cc   :  { %882 = vst.msk [vmem:[#allocation5 + $0xe] sm:$0x1] %vm775_vm15, %v881_v39  ;;  %v765_v42 = vsel %vm753_vm2, %v741_v33, %v759_v28  ;;  %v7292_v29 = vld.sshfl [vmem:[#allocation4 + $0xb] sm:$0x1 pattern:$0x76325410]  ;;  %v747_v46 = vpop.f32.mrf.mxu0 }
 0x2cd   :  { %867 = vst.msk [vmem:[#allocation5 + $0xc] sm:$0x1] %vm775_vm15, %v866_v41  ;;  %v911_v44 = vld [vmem:[#allocation4 + $0x12] sm:$0x1]  ;;  %862 = vrot.lane.b32.xlu1 %v7292_v29, %s8482_s4  ;;  %v941_v47 = vld [vmem:[#allocation4 + $0x16] sm:$0x1] }
 0x2ce   :  { %771 = vst.msk [vmem:[#allocation4 + $0x20] sm:$0xff] %vm635_vm1, %v765_v42  ;;  %v7291_v45 = vld.sshfl [vmem:[#allocation4 + $0x9] sm:$0x1 pattern:$0x76325410]  ;;  %vm754_vm3 = vcmp.gt.f32.partialorder %v746_v43, 0.0 }
 0x2cf   :  { %912 = vst.msk [vmem:[#allocation5 + $0x12] sm:$0x1] %vm775_vm15, %v911_v44  ;;  %847 = vrot.lane.b32.xlu0 %v7291_v45, %s8482_s4  ;;  %v760_v48 = vmul.f32 0.2, %v746_v43  ;;  %942 = vst.msk [vmem:[#allocation5 + $0x1] sm:$0x1] %vm775_vm15, %v941_v47 }
 0x2d0   :  { %v896_v51 = vld [vmem:[#allocation4 + $0x10] sm:$0x1]  ;;  %v926_v52 = vld [vmem:[#allocation4 + $0x14] sm:$0x1]  ;;  %v956_v55 = vld [vmem:[#allocation4 + $0x18] sm:$0x1] }
 0x2d1   :  { %897 = vst.msk [vmem:[#allocation5 + $0x10] sm:$0x1] %vm775_vm15, %v896_v51  ;;  %v7294_v53 = vld.sshfl [vmem:[#allocation4 + $0xf] sm:$0x1 pattern:$0x76325410]  ;;  %v766_v54 = vsel %vm754_vm3, %v746_v43, %v760_v48 }
 0x2d2   :  { %927 = vst.msk [vmem:[#allocation5 + $0x14] sm:$0x1] %vm775_vm15, %v926_v52  ;;  %892 = vrot.lane.b32.xlu1 %v7294_v53, %s8482_s4  ;;  %v7293_v56 = vld.sshfl [vmem:[#allocation4 + $0xd] sm:$0x1 pattern:$0x76325410] }
 0x2d3   :  { %773 = vst.msk [vmem:[#allocation4 + $0x28] sm:$0xf] %vm772_vm4, %v766_v54  ;;  %v986_v57 = vld [vmem:[#allocation4 + $0x1c] sm:$0x1]  ;;  %877 = vrot.lane.b32.xlu0 %v7293_v56, %s8482_s4  ;;  %v971_v58 = vld [vmem:[#allocation4 + $0x1a] sm:$0x1] }
 0x2d4   :  { %957 = vst.msk [vmem:[#allocation5 + $0x3] sm:$0x1] %vm775_vm15, %v956_v55  ;;  %987 = vst.msk [vmem:[#allocation5 + $0x7] sm:$0x1] %vm775_vm15, %v986_v57  ;;  %v1001_v59 = vld [vmem:[#allocation4 + $0x1e] sm:$0x1] }
 0x2d5   :  { %972 = vst.msk [vmem:[#allocation5 + $0x5] sm:$0x1] %vm775_vm15, %v971_v58  ;;  %v7296_v49 = vld.sshfl [vmem:[#allocation4 + $0x13] sm:$0x1 pattern:$0x76325410] }
 0x2d6   :  { %v1016_v60 = vld [vmem:[#allocation4 + $0x20] sm:$0x1]  ;;  %1002 = vst.msk [vmem:[#allocation5 + $0x9] sm:$0x1] %vm775_vm15, %v1001_v59  ;;  %922 = vrot.lane.b32.xlu1 %v7296_v49, %s8482_s4  ;;  %v1046_v62 = vld [vmem:[#allocation4 + $0x24] sm:$0x1] }
 0x2d7   :  { %v7298_v61 = vld.sshfl [vmem:[#allocation4 + $0x17] sm:$0x1 pattern:$0x76325410]  ;;  %1017 = vst.msk [vmem:[#allocation5 + $0xb] sm:$0x1] %vm775_vm15, %v1016_v60 }
 0x2d8   :  { %952 = vrot.lane.b32.xlu0 %v7298_v61, %s8482_s4  ;;  %1047 = vst.msk [vmem:[#allocation5 + $0xf] sm:$0x1] %vm775_vm15, %v1046_v62  ;;  %v1061_v63 = vld [vmem:[#allocation4 + $0x26] sm:$0x1]  ;;  %v1031_v50 = vld [vmem:[#allocation4 + $0x22] sm:$0x1] }
 0x2d9   :  { %1062 = vst.msk [vmem:[#allocation5 + $0x11] sm:$0x1] %vm775_vm15, %v1061_v63  ;;  %v7299_v0 = vld.sshfl [vmem:[#allocation4 + $0x19] sm:$0x1 pattern:$0x76325410] }
 0x2da   :  { %1032 = vst.msk [vmem:[#allocation5 + $0xd] sm:$0x1] %vm775_vm15, %v1031_v50  ;;  %v1091_v2 = vld [vmem:[#allocation4 + $0x2a] sm:$0x1]  ;;  %967 = vrot.lane.b32.xlu1 %v7299_v0, %s8482_s4  ;;  %v1076_v4 = vld [vmem:[#allocation4 + $0x28] sm:$0x1] }
 0x2db   :  { %v7295_v3 = vld.sshfl [vmem:[#allocation4 + $0x11] sm:$0x1 pattern:$0x76325410]  ;;  %1092 = vst.msk [vmem:[#allocation5 + $0x15] sm:$0x1] %vm775_vm15, %v1091_v2 }
 0x2dc   :  { %907 = vrot.lane.b32.xlu0 %v7295_v3, %s8482_s4  ;;  %1077 = vst.msk [vmem:[#allocation5 + $0x13] sm:$0x1] %vm775_vm15, %v1076_v4  ;;  %v7301_v5 = vld.sshfl [vmem:[#allocation4 + $0x1d] sm:$0x1 pattern:$0x76325410] }
 0x2dd   :  { %v7297_v6 = vld.sshfl [vmem:[#allocation4 + $0x15] sm:$0x1 pattern:$0x76325410] }
 0x2de   :  { %997 = vrot.lane.b32.xlu1 %v7301_v5, %s8482_s4  ;;  %v7303_v7 = vld.sshfl [vmem:[#allocation4 + $0x21] sm:$0x1 pattern:$0x76325410] }
 0x2df   :  { %v7300_v8 = vld.sshfl [vmem:[#allocation4 + $0x1b] sm:$0x1 pattern:$0x76325410] }
 0x2e0   :  { %937 = vrot.lane.b32.xlu0 %v7297_v6, %s8482_s4  ;;  %v7305_v9 = vld.sshfl [vmem:[#allocation4 + $0x25] sm:$0x1 pattern:$0x76325410] }
 0x2e1   :  { %v7302_v10 = vld.sshfl [vmem:[#allocation4 + $0x1f] sm:$0x1 pattern:$0x76325410] }
 0x2e2   :  { %1027 = vrot.lane.b32.xlu1 %v7303_v7, %s8482_s4  ;;  %v7306_v11 = vld.sshfl [vmem:[#allocation4 + $0x27] sm:$0x1 pattern:$0x76325410] }
 0x2e3   :  { %v7304_v12 = vld.sshfl [vmem:[#allocation4 + $0x23] sm:$0x1 pattern:$0x76325410] }
 0x2e4   :  { %982 = vrot.lane.b32.xlu0 %v7300_v8, %s8482_s4  ;;  %v7308_v13 = vld.sshfl [vmem:[#allocation4 + $0x2b] sm:$0x1 pattern:$0x76325410] }
 0x2e5   :  { %v7307_v14 = vld.sshfl [vmem:[#allocation4 + $0x29] sm:$0x1 pattern:$0x76325410] }
 0x2e6   :  { %1057 = vrot.lane.b32.xlu1 %v7305_v9, %s8482_s4 }
 0x2e8   :  { %1012 = vrot.lane.b32.xlu0 %v7302_v10, %s8482_s4 }
 0x2ea   :  { %1072 = vrot.lane.b32.xlu1 %v7306_v11, %s8482_s4 }
 0x2ec   :  { %1042 = vrot.lane.b32.xlu0 %v7304_v12, %s8482_s4 }
 0x2ee   :  { %1102 = vrot.lane.b32.xlu1 %v7308_v13, %s8482_s4 }
 0x2f0   :  { %1087 = vrot.lane.b32.xlu0 %v7307_v14, %s8482_s4 }
 0x2f1   :  { %8468 = shalt.err (!%p8465_p11)  }
 0x2f2   :  { %146 = dma.hbm_to_vmem [thread:$0]  %s9342_s9, 90112, %s144_s28, [#allocation3]  ;;  %vm789_vm1 = vcmask 1040896   ;;  %v8492_v34 = vmov 1983009808  }
 0x2f3   :  { %v1114_v35 = vunpack.c.l.s4 %v8492_v34 }
 0x2f5   :  { %v1115_v38 = vunpack.c.0.s8 %v1114_v35 }
 0x2f7   :  { %v1118_v40 = vsub.s32 %v1115_v38, %v8872_v24 }
 0x336   :  { %v818_v15 = vpop.permute.xlu1 %817 }
 0x337   :  { %820 = vst.msk [vmem:[#allocation5 + $0x4] sm:$0x1] %vm789_vm1, %v818_v15  ;;  %v787_v16 = vpop.permute.xlu0 %786 }
 0x338   :  { %790 = vst.msk [vmem:[#allocation5] sm:$0x1] %vm789_vm1, %v787_v16 }
 0x33b   :  { %v833_v17 = vpop.permute.xlu1 %832 }
 0x33c   :  { %835 = vst.msk [vmem:[#allocation5 + $0x6] sm:$0x1] %vm789_vm1, %v833_v17  ;;  %v803_v18 = vpop.permute.xlu0 %802 }
 0x33d   :  { %805 = vst.msk [vmem:[#allocation5 + $0x2] sm:$0x1] %vm789_vm1, %v803_v18 }
 0x33f   :  { %v863_v19 = vpop.permute.xlu1 %862 }
 0x340   :  { %865 = vst.msk [vmem:[#allocation5 + $0xa] sm:$0x1] %vm789_vm1, %v863_v19 }
 0x341   :  { %v848_v20 = vpop.permute.xlu0 %847 }
 0x342   :  { %850 = vst.msk [vmem:[#allocation5 + $0x8] sm:$0x1] %vm789_vm1, %v848_v20 }
 0x344   :  { %v893_v21 = vpop.permute.xlu1 %892 }
 0x345   :  { %895 = vst.msk [vmem:[#allocation5 + $0xe] sm:$0x1] %vm789_vm1, %v893_v21  ;;  %v878_v22 = vpop.permute.xlu0 %877 }
 0x346   :  { %880 = vst.msk [vmem:[#allocation5 + $0xc] sm:$0x1] %vm789_vm1, %v878_v22 }
 0x348   :  { %v923_v23 = vpop.permute.xlu1 %922 }
 0x349   :  { %925 = vst.msk [vmem:[#allocation5 + $0x12] sm:$0x1] %vm789_vm1, %v923_v23 }
 0x34a   :  { %v953_v26 = vpop.permute.xlu0 %952 }
 0x34b   :  { %955 = vst.msk [vmem:[#allocation5 + $0x1] sm:$0x1] %vm789_vm1, %v953_v26 }
 0x34c   :  { %v968_v30 = vpop.permute.xlu1 %967 }
 0x34d   :  { %970 = vst.msk [vmem:[#allocation5 + $0x3] sm:$0x1] %vm789_vm1, %v968_v30 }
 0x34e   :  { %v908_v31 = vpop.permute.xlu0 %907 }
 0x34f   :  { %910 = vst.msk [vmem:[#allocation5 + $0x10] sm:$0x1] %vm789_vm1, %v908_v31 }
 0x350   :  { %v998_v32 = vpop.permute.xlu1 %997 }
 0x351   :  { %1000 = vst.msk [vmem:[#allocation5 + $0x7] sm:$0x1] %vm789_vm1, %v998_v32 }
 0x352   :  { %v938_v33 = vpop.permute.xlu0 %937 }
 0x353   :  { %940 = vst.msk [vmem:[#allocation5 + $0x14] sm:$0x1] %vm789_vm1, %v938_v33 }
 0x354   :  { %v1028_v36 = vpop.permute.xlu1 %1027 }
 0x355   :  { %1030 = vst.msk [vmem:[#allocation5 + $0xb] sm:$0x1] %vm789_vm1, %v1028_v36 }
 0x356   :  { %v983_v37 = vpop.permute.xlu0 %982 }
 0x357   :  { %985 = vst.msk [vmem:[#allocation5 + $0x5] sm:$0x1] %vm789_vm1, %v983_v37 }
 0x358   :  { %v1058_v28 = vpop.permute.xlu1 %1057 }
 0x359   :  { %1060 = vst.msk [vmem:[#allocation5 + $0xf] sm:$0x1] %vm789_vm1, %v1058_v28 }
 0x35a   :  { %v1013_v39 = vpop.permute.xlu0 %1012 }
 0x35b   :  { %1015 = vst.msk [vmem:[#allocation5 + $0x9] sm:$0x1] %vm789_vm1, %v1013_v39 }
 0x35c   :  { %v1073_v41 = vpop.permute.xlu1 %1072 }
 0x35d   :  { %1075 = vst.msk [vmem:[#allocation5 + $0x11] sm:$0x1] %vm789_vm1, %v1073_v41 }
 0x35e   :  { %v1106_v42 = vld [vmem:[#allocation5] sm:$0xff]  ;;  %v1043_v29 = vpop.permute.xlu0 %1042 }
 0x35f   :  { %v1112_v43 = vcombine.high %v1106_v42, %v1106_v42  ;;  %v1119_v44 = vrot.slane %v1106_v42, %v1118_v40  ;;  %1045 = vst.msk [vmem:[#allocation5 + $0xd] sm:$0x1] %vm789_vm1, %v1043_v29 }
 0x360   :  { %v1103_v48 = vpop.permute.xlu1 %1102 }
 0x361   :  { %v1126_v45 = vrot.slane %v1112_v43, %v1118_v40  ;;  %v1127_v46 = vcombine.high %v1119_v44, %v1119_v44  ;;  %v9096_v47 = vpack.c.bf16 %v1119_v44, %v1119_v44  ;;  %1105 = vst.msk [vmem:[#allocation5 + $0x15] sm:$0x1] %vm789_vm1, %v1103_v48 }
 0x362   :  { %v1088_v51 = vpop.permute.xlu0 %1087 }
 0x363   :  { %v1128_v52 = vcombine.high %v1126_v45, %v1126_v45  ;;  %v9099_v53 = vpack.c.bf16 %v1127_v46, %v1127_v46  ;;  %v9101_v54 = vpack.c.bf16 %v1126_v45, %v1126_v45  ;;  %1090 = vst.msk [vmem:[#allocation5 + $0x13] sm:$0x1] %vm789_vm1, %v1088_v51 }
 0x365   :  { %v9104_v55 = vpack.c.bf16 %v1128_v52, %v1128_v52 }
 0x366   :  { %v1107_v56 = vld [vmem:[#allocation5 + $0x8] sm:$0xff] }
 0x367   :  { %v1129_v57 = vcombine.high %v1107_v56, %v1107_v56  ;;  %v1136_v58 = vrot.slane %v1107_v56, %v1118_v40 }
 0x369   :  { %v1143_v59 = vrot.slane %v1129_v57, %v1118_v40  ;;  %v1144_v49 = vcombine.high %v1136_v58, %v1136_v58  ;;  %v9106_v60 = vpack.c.bf16 %v1136_v58, %v1136_v58 }
 0x36a   :  { %v1108_v61 = vld [vmem:[#allocation5 + $0x10] sm:$0x3f] }
 0x36b   :  { %v1145_v62 = vcombine.high %v1143_v59, %v1143_v59  ;;  %v9108_v63 = vpack.c.bf16 %v1144_v49, %v1144_v49  ;;  %v9110_v50 = vpack.c.bf16 %v1143_v59, %v1143_v59  ;;  %v1146_v0 = vcombine.high %v1108_v61, %v1108_v61 }
 0x36c   :  { %v1153_v2 = vrot.slane %v1108_v61, %v1118_v40 }
 0x36d   :  { %v9112_v3 = vpack.c.bf16 %v1145_v62, %v1145_v62  ;;  %v1160_v4 = vrot.slane %v1146_v0, %v1118_v40 }
 0x36e   :  { %v1161_v5 = vcombine.high %v1153_v2, %v1153_v2  ;;  %v9114_v6 = vpack.c.bf16 %v1153_v2, %v1153_v2 }
 0x36f   :  { %v9116_v7 = vpack.c.bf16 %v1160_v4, %v1160_v4 }
 0x370   :  { %v9118_v8 = vpack.c.bf16 %v1161_v5, %v1161_v5 }
 0x371   :  { %8477 = dma.done.wait [#allocation3], 90112 }
 0x372   :  { %8478 = vsyncadd [#allocation3], 4294877184  ;;  %5486 = vmatprep.mubr.bf16.mxu0 %v9099_v53  ;;  %5527 = vmatprep.mubr.bf16.mxu1 %v9104_v55  ;;  %v1244_v9 = vld [vmem:[#allocation2 + $0x1c0] sm:$0xff]  ;;  %vm8494_vm13 = vmmov 0   ;;  %vm7250_vm15 = vcmask 1024  }
 0x373   :  { %v1248_v10 = vld [vmem:[#allocation2 + $0x1e0] sm:$0xff] }
 0x374   :  { %v1372_v11 = vld [vmem:[#allocation2 + $0x5c0] sm:$0xff]  ;;  %v7366_v12 = vcombine.high %v1244_v9, %v1248_v10  ;;  %v7365_v14 = vcombine.low %v1244_v9, %v1248_v10 }
 0x375   :  { %v1376_v13 = vld [vmem:[#allocation2 + $0x5e0] sm:$0xff] }
 0x376   :  { %v1236_v15 = vld [vmem:[#allocation2 + $0x180] sm:$0xff]  ;;  %v7494_v17 = vcombine.high %v1372_v11, %v1376_v13  ;;  %v7493_v18 = vcombine.low %v1372_v11, %v1376_v13  ;;  %5454 = vmatprep.subr.bf16.mxu0 %v7366_v12 }
 0x377   :  { %v1240_v16 = vld [vmem:[#allocation2 + $0x1a0] sm:$0xff]  ;;  %5455 = vmatpush1.bf16.msra.mxu0 %v7365_v14 }
 0x378   :  { %v7358_v19 = vcombine.high %v1236_v15, %v1240_v16  ;;  %v1364_v20 = vld [vmem:[#allocation2 + $0x580] sm:$0xff]  ;;  %5495 = vmatprep.subr.bf16.mxu1 %v7494_v17  ;;  %v7357_v32 = vcombine.low %v1236_v15, %v1240_v16 }
 0x379   :  { %v1368_v21 = vld [vmem:[#allocation2 + $0x5a0] sm:$0xff]  ;;  %5496 = vmatpush1.bf16.msra.mxu1 %v7493_v18 }
 0x37a   :  { %v1228_v22 = vld [vmem:[#allocation2 + $0x140] sm:$0xff]  ;;  %v7486_v23 = vcombine.high %v1364_v20, %v1368_v21  ;;  %5456 = vmatprep.subr.bf16.mxu0 %v7358_v19  ;;  %v7485_v33 = vcombine.low %v1364_v20, %v1368_v21 }
 0x37b   :  { %v1232_v26 = vld [vmem:[#allocation2 + $0x160] sm:$0xff]  ;;  %5457 = vmatpush1.bf16.msra.mxu0 %v7357_v32 }
 0x37c   :  { %v1356_v30 = vld [vmem:[#allocation2 + $0x540] sm:$0xff]  ;;  %v7350_v34 = vcombine.high %v1228_v22, %v1232_v26  ;;  %5497 = vmatprep.subr.bf16.mxu1 %v7486_v23  ;;  %v7349_v39 = vcombine.low %v1228_v22, %v1232_v26 }
 0x37d   :  { %v1360_v31 = vld [vmem:[#allocation2 + $0x560] sm:$0xff]  ;;  %5498 = vmatpush1.bf16.msra.mxu1 %v7485_v33 }
 0x37e   :  { %v7478_v35 = vcombine.high %v1356_v30, %v1360_v31  ;;  %v1220_v36 = vld [vmem:[#allocation2 + $0x100] sm:$0xff]  ;;  %5458 = vmatprep.subr.bf16.mxu0 %v7350_v34  ;;  %v7477_v40 = vcombine.low %v1356_v30, %v1360_v31 }
 0x37f   :  { %v1224_v37 = vld [vmem:[#allocation2 + $0x120] sm:$0xff]  ;;  %5459 = vmatpush1.bf16.msra.mxu0 %v7349_v39 }
 0x380   :  { %v1348_v38 = vld [vmem:[#allocation2 + $0x500] sm:$0xff]  ;;  %v7342_v41 = vcombine.high %v1220_v36, %v1224_v37  ;;  %5499 = vmatprep.subr.bf16.mxu1 %v7478_v35  ;;  %v7341_v46 = vcombine.low %v1220_v36, %v1224_v37 }
 0x381   :  { %v1352_v28 = vld [vmem:[#allocation2 + $0x520] sm:$0xff]  ;;  %5500 = vmatpush1.bf16.msra.mxu1 %v7477_v40 }
 0x382   :  { %v7470_v42 = vcombine.high %v1348_v38, %v1352_v28  ;;  %v1212_v29 = vld [vmem:[#allocation2 + $0xc0] sm:$0xff]  ;;  %5460 = vmatprep.subr.bf16.mxu0 %v7342_v41  ;;  %v7469_v48 = vcombine.low %v1348_v38, %v1352_v28 }
 0x383   :  { %v1216_v43 = vld [vmem:[#allocation2 + $0xe0] sm:$0xff]  ;;  %5461 = vmatpush1.bf16.msra.mxu0 %v7341_v46 }
 0x384   :  { %v1340_v44 = vld [vmem:[#allocation2 + $0x4c0] sm:$0xff]  ;;  %v7334_v51 = vcombine.high %v1212_v29, %v1216_v43  ;;  %5501 = vmatprep.subr.bf16.mxu1 %v7470_v42  ;;  %v7333_v49 = vcombine.low %v1212_v29, %v1216_v43 }
 0x385   :  { %v1344_v45 = vld [vmem:[#allocation2 + $0x4e0] sm:$0xff]  ;;  %5502 = vmatpush1.bf16.msra.mxu1 %v7469_v48 }
 0x386   :  { %v7462_v52 = vcombine.high %v1340_v44, %v1344_v45  ;;  %v1204_v56 = vld [vmem:[#allocation2 + $0x80] sm:$0xff]  ;;  %5462 = vmatprep.subr.bf16.mxu0 %v7334_v51  ;;  %v7461_v61 = vcombine.low %v1340_v44, %v1344_v45 }
 0x387   :  { %v1208_v57 = vld [vmem:[#allocation2 + $0xa0] sm:$0xff]  ;;  %5463 = vmatpush1.bf16.msra.mxu0 %v7333_v49 }
 0x388   :  { %v1332_v58 = vld [vmem:[#allocation2 + $0x480] sm:$0xff]  ;;  %v7326_v62 = vcombine.high %v1204_v56, %v1208_v57  ;;  %5503 = vmatprep.subr.bf16.mxu1 %v7462_v52  ;;  %v7325_v10 = vcombine.low %v1204_v56, %v1208_v57 }
 0x389   :  { %v1336_v59 = vld [vmem:[#allocation2 + $0x4a0] sm:$0xff]  ;;  %5504 = vmatpush1.bf16.msra.mxu1 %v7461_v61 }
 0x38a   :  { %v7454_v0 = vcombine.high %v1332_v58, %v1336_v59  ;;  %v1196_v2 = vld [vmem:[#allocation2 + $0x40] sm:$0xff]  ;;  %5464 = vmatprep.subr.bf16.mxu0 %v7326_v62  ;;  %v7453_v11 = vcombine.low %v1332_v58, %v1336_v59 }
 0x38b   :  { %v1200_v4 = vld [vmem:[#allocation2 + $0x60] sm:$0xff]  ;;  %5465 = vmatpush1.bf16.msra.mxu0 %v7325_v10 }
 0x38c   :  { %v1324_v5 = vld [vmem:[#allocation2 + $0x440] sm:$0xff]  ;;  %v7318_v12 = vcombine.high %v1196_v2, %v1200_v4  ;;  %5505 = vmatprep.subr.bf16.mxu1 %v7454_v0  ;;  %v7317_v18 = vcombine.low %v1196_v2, %v1200_v4 }
 0x38d   :  { %v1328_v9 = vld [vmem:[#allocation2 + $0x460] sm:$0xff]  ;;  %5506 = vmatpush1.bf16.msra.mxu1 %v7453_v11 }
 0x38e   :  { %v7446_v13 = vcombine.high %v1324_v5, %v1328_v9  ;;  %v1188_v14 = vld [vmem:[#allocation2] sm:$0xff]  ;;  %5466 = vmatprep.subr.bf16.mxu0 %v7318_v12  ;;  %v7445_v19 = vcombine.low %v1324_v5, %v1328_v9 }
 0x38f   :  { %v1192_v15 = vld [vmem:[#allocation2 + $0x20] sm:$0xff]  ;;  %5467 = vmatpush1.bf16.msra.mxu0 %v7317_v18 }
 0x390   :  { %v1316_v16 = vld [vmem:[#allocation2 + $0x400] sm:$0xff]  ;;  %v7310_v20 = vcombine.high %v1188_v14, %v1192_v15  ;;  %5507 = vmatprep.subr.bf16.mxu1 %v7446_v13  ;;  %v7309_v31 = vcombine.low %v1188_v14, %v1192_v15 }
 0x391   :  { %v1320_v17 = vld [vmem:[#allocation2 + $0x420] sm:$0xff]  ;;  %5508 = vmatpush1.bf16.msra.mxu1 %v7445_v19 }
 0x392   :  { %v7438_v21 = vcombine.high %v1316_v16, %v1320_v17  ;;  %v1308_v22 = vld [vmem:[#allocation2 + $0x3c0] sm:$0xff]  ;;  %5468 = vmatprep.subr.bf16.mxu0 %v7310_v20  ;;  %v7437_v32 = vcombine.low %v1316_v16, %v1320_v17 }
 0x393   :  { %v1312_v23 = vld [vmem:[#allocation2 + $0x3e0] sm:$0xff]  ;;  %5469 = vmatpush1.bf16.msra.mxu0 %v7309_v31 }
 0x394   :  { %v1436_v26 = vld [vmem:[#allocation2 + $0x7c0] sm:$0xff]  ;;  %v7430_v33 = vcombine.high %v1308_v22, %v1312_v23  ;;  %5509 = vmatprep.subr.bf16.mxu1 %v7438_v21  ;;  %v7429_v28 = vcombine.low %v1308_v22, %v1312_v23 }
 0x395   :  { %v1440_v30 = vld [vmem:[#allocation2 + $0x7e0] sm:$0xff]  ;;  %5510 = vmatpush1.bf16.msra.mxu1 %v7437_v32 }
 0x396   :  { %v7558_v34 = vcombine.high %v1436_v26, %v1440_v30  ;;  %v1300_v35 = vld [vmem:[#allocation2 + $0x380] sm:$0xff]  ;;  %5470 = vmatprep.subr.bf16.mxu0 %v7430_v33  ;;  %v7557_v39 = vcombine.low %v1436_v26, %v1440_v30 }
 0x397   :  { %v1304_v36 = vld [vmem:[#allocation2 + $0x3a0] sm:$0xff]  ;;  %5471 = vmatpush2.bf16.msra.mxu0 %v7429_v28 }
 0x398   :  { %v1428_v37 = vld [vmem:[#allocation2 + $0x780] sm:$0xff]  ;;  %v7422_v40 = vcombine.high %v1300_v35, %v1304_v36  ;;  %5511 = vmatprep.subr.bf16.mxu1 %v7558_v34  ;;  %v7421_v45 = vcombine.low %v1300_v35, %v1304_v36 }
 0x399   :  { %v1432_v38 = vld [vmem:[#allocation2 + $0x7a0] sm:$0xff]  ;;  %5512 = vmatpush2.bf16.msra.mxu1 %v7557_v39 }
 0x39a   :  { %v7550_v41 = vcombine.high %v1428_v37, %v1432_v38  ;;  %v1292_v42 = vld [vmem:[#allocation2 + $0x340] sm:$0xff]  ;;  %5472 = vmatprep.subr.bf16.mxu0 %v7422_v40  ;;  %v7549_v46 = vcombine.low %v1428_v37, %v1432_v38 }
 0x39b   :  { %v1296_v29 = vld [vmem:[#allocation2 + $0x360] sm:$0xff]  ;;  %5473 = vmatpush2.bf16.msra.mxu0 %v7421_v45 }
 0x39c   :  { %v1420_v43 = vld [vmem:[#allocation2 + $0x740] sm:$0xff]  ;;  %v7414_v48 = vcombine.high %v1292_v42, %v1296_v29  ;;  %5513 = vmatprep.subr.bf16.mxu1 %v7550_v41  ;;  %v7413_v59 = vcombine.low %v1292_v42, %v1296_v29 }
 0x39d   :  { %v1424_v44 = vld [vmem:[#allocation2 + $0x760] sm:$0xff]  ;;  %5514 = vmatpush2.bf16.msra.mxu1 %v7549_v46 }
 0x39e   :  { %v7542_v51 = vcombine.high %v1420_v43, %v1424_v44  ;;  %v1284_v52 = vld [vmem:[#allocation2 + $0x300] sm:$0xff]  ;;  %5474 = vmatprep.subr.bf16.mxu0 %v7414_v48  ;;  %v7541_v49 = vcombine.low %v1420_v43, %v1424_v44 }
 0x39f   :  { %v1288_v56 = vld [vmem:[#allocation2 + $0x320] sm:$0xff]  ;;  %5475 = vmatpush2.bf16.msra.mxu0 %v7413_v59 }
 0x3a0   :  { %v1412_v57 = vld [vmem:[#allocation2 + $0x700] sm:$0xff]  ;;  %v7406_v61 = vcombine.high %v1284_v52, %v1288_v56  ;;  %5515 = vmatprep.subr.bf16.mxu1 %v7542_v51  ;;  %v7405_v9 = vcombine.low %v1284_v52, %v1288_v56 }
 0x3a1   :  { %v1416_v58 = vld [vmem:[#allocation2 + $0x720] sm:$0xff]  ;;  %5516 = vmatpush2.bf16.msra.mxu1 %v7541_v49 }
 0x3a2   :  { %v7534_v62 = vcombine.high %v1412_v57, %v1416_v58  ;;  %v1276_v0 = vld [vmem:[#allocation2 + $0x2c0] sm:$0xff]  ;;  %5476 = vmatprep.subr.bf16.mxu0 %v7406_v61  ;;  %v7533_v10 = vcombine.low %v1412_v57, %v1416_v58 }
 0x3a3   :  { %v1280_v2 = vld [vmem:[#allocation2 + $0x2e0] sm:$0xff]  ;;  %5477 = vmatpush2.bf16.msra.mxu0 %v7405_v9 }
 0x3a4   :  { %v1404_v4 = vld [vmem:[#allocation2 + $0x6c0] sm:$0xff]  ;;  %v7398_v11 = vcombine.high %v1276_v0, %v1280_v2  ;;  %5517 = vmatprep.subr.bf16.mxu1 %v7534_v62  ;;  %v7397_v17 = vcombine.low %v1276_v0, %v1280_v2 }
 0x3a5   :  { %v1408_v5 = vld [vmem:[#allocation2 + $0x6e0] sm:$0xff]  ;;  %5518 = vmatpush2.bf16.msra.mxu1 %v7533_v10 }
 0x3a6   :  { %v7526_v12 = vcombine.high %v1404_v4, %v1408_v5  ;;  %v1268_v13 = vld [vmem:[#allocation2 + $0x280] sm:$0xff]  ;;  %5478 = vmatprep.subr.bf16.mxu0 %v7398_v11  ;;  %v7525_v18 = vcombine.low %v1404_v4, %v1408_v5 }
 0x3a7   :  { %v1272_v14 = vld [vmem:[#allocation2 + $0x2a0] sm:$0xff]  ;;  %5479 = vmatpush2.bf16.msra.mxu0 %v7397_v17 }
 0x3a8   :  { %v1396_v15 = vld [vmem:[#allocation2 + $0x680] sm:$0xff]  ;;  %v7390_v19 = vcombine.high %v1268_v13, %v1272_v14  ;;  %5519 = vmatprep.subr.bf16.mxu1 %v7526_v12  ;;  %v7389_v30 = vcombine.low %v1268_v13, %v1272_v14 }
 0x3a9   :  { %v1400_v16 = vld [vmem:[#allocation2 + $0x6a0] sm:$0xff]  ;;  %5520 = vmatpush2.bf16.msra.mxu1 %v7525_v18 }
 0x3aa   :  { %v7518_v20 = vcombine.high %v1396_v15, %v1400_v16  ;;  %v1260_v21 = vld [vmem:[#allocation2 + $0x240] sm:$0xff]  ;;  %5480 = vmatprep.subr.bf16.mxu0 %v7390_v19  ;;  %v7517_v31 = vcombine.low %v1396_v15, %v1400_v16 }
 0x3ab   :  { %v1264_v22 = vld [vmem:[#allocation2 + $0x260] sm:$0xff]  ;;  %5481 = vmatpush2.bf16.msra.mxu0 %v7389_v30 }
 0x3ac   :  { %v1388_v23 = vld [vmem:[#allocation2 + $0x640] sm:$0xff]  ;;  %v7382_v32 = vcombine.high %v1260_v21, %v1264_v22  ;;  %5521 = vmatprep.subr.bf16.mxu1 %v7518_v20  ;;  %v7381_v38 = vcombine.low %v1260_v21, %v1264_v22 }
 0x3ad   :  { %v1392_v26 = vld [vmem:[#allocation2 + $0x660] sm:$0xff]  ;;  %5522 = vmatpush2.bf16.msra.mxu1 %v7517_v31 }
 0x3ae   :  { %v7510_v33 = vcombine.high %v1388_v23, %v1392_v26  ;;  %v1252_v34 = vld [vmem:[#allocation2 + $0x200] sm:$0xff]  ;;  %5482 = vmatprep.subr.bf16.mxu0 %v7382_v32  ;;  %v7509_v28 = vcombine.low %v1388_v23, %v1392_v26 }
 0x3af   :  { %v1256_v35 = vld [vmem:[#allocation2 + $0x220] sm:$0xff]  ;;  %5483 = vmatpush2.bf16.msra.mxu0 %v7381_v38 }
 0x3b0   :  { %v1380_v36 = vld [vmem:[#allocation2 + $0x600] sm:$0xff]  ;;  %v7374_v39 = vcombine.high %v1252_v34, %v1256_v35  ;;  %5523 = vmatprep.subr.bf16.mxu1 %v7510_v33  ;;  %v7373_v44 = vcombine.low %v1252_v34, %v1256_v35 }
 0x3b1   :  { %v1384_v37 = vld [vmem:[#allocation2 + $0x620] sm:$0xff]  ;;  %5524 = vmatpush2.bf16.msra.mxu1 %v7509_v28 }
 0x3b2   :  { %v7502_v40 = vcombine.high %v1380_v36, %v1384_v37  ;;  %v1500_v41 = vld [vmem:[#allocation2 + $0x9c0] sm:$0xff]  ;;  %5484 = vmatprep.subr.bf16.mxu0 %v7374_v39  ;;  %v7501_v45 = vcombine.low %v1380_v36, %v1384_v37 }
 0x3b3   :  { %v1504_v42 = vld [vmem:[#allocation2 + $0x9e0] sm:$0xff]  ;;  %5485 = vmatpush2.bf16.msra.mxu0 %v7373_v44 }
 0x3b4   :  { %v1628_v29 = vld [vmem:[#allocation2 + $0xdc0] sm:$0xff]  ;;  %v7622_v46 = vcombine.high %v1500_v41, %v1504_v42  ;;  %5525 = vmatprep.subr.bf16.mxu1 %v7502_v40  ;;  %v7621_v58 = vcombine.low %v1500_v41, %v1504_v42 }
 0x3b5   :  { %v1632_v43 = vld [vmem:[#allocation2 + $0xde0] sm:$0xff]  ;;  %5526 = vmatpush2.bf16.msra.mxu1 %v7501_v45 }
 0x3b6   :  { %v7750_v48 = vcombine.high %v1628_v29, %v1632_v43  ;;  %v1492_v51 = vld [vmem:[#allocation2 + $0x980] sm:$0xff]  ;;  %5536 = vmatprep.subr.bf16.mxu0 %v7622_v46  ;;  %v7749_v59 = vcombine.low %v1628_v29, %v1632_v43  ;;  %5487 = vmatmul.mubr.bf16.vlgmr.msra.gmra.mxu0 %v9096_v47 }
 0x3b7   :  { %v1496_v52 = vld [vmem:[#allocation2 + $0x9a0] sm:$0xff]  ;;  %5537 = vmatpush1.bf16.msra.mxu0 %v7621_v58  ;;  %5568 = vmatprep.mubr.bf16.mxu0 %v9108_v63 }
 0x3b8   :  { %v1620_v56 = vld [vmem:[#allocation2 + $0xd80] sm:$0xff]  ;;  %v7614_v49 = vcombine.high %v1492_v51, %v1496_v52  ;;  %5577 = vmatprep.subr.bf16.mxu1 %v7750_v48  ;;  %5528 = vmatmul.mubr.bf16.vlgmr.msra.gmra.mxu1 %v9101_v54  ;;  %v7613_v5 = vcombine.low %v1492_v51, %v1496_v52 }
 0x3b9   :  { %v1624_v57 = vld [vmem:[#allocation2 + $0xda0] sm:$0xff]  ;;  %5578 = vmatpush1.bf16.msra.mxu1 %v7749_v59  ;;  %5609 = vmatprep.mubr.bf16.mxu1 %v9112_v3 }
 0x3ba   :  { %v1484_v61 = vld [vmem:[#allocation2 + $0x940] sm:$0xff]  ;;  %v7742_v2 = vcombine.high %v1620_v56, %v1624_v57  ;;  %5538 = vmatprep.subr.bf16.mxu0 %v7614_v49  ;;  %v7741_v9 = vcombine.low %v1620_v56, %v1624_v57 }
 0x3bb   :  { %v1488_v62 = vld [vmem:[#allocation2 + $0x960] sm:$0xff]  ;;  %5539 = vmatpush1.bf16.msra.mxu0 %v7613_v5 }
 0x3bc   :  { %v1612_v0 = vld [vmem:[#allocation2 + $0xd40] sm:$0xff]  ;;  %v7606_v10 = vcombine.high %v1484_v61, %v1488_v62  ;;  %5579 = vmatprep.subr.bf16.mxu1 %v7742_v2  ;;  %v7605_v16 = vcombine.low %v1484_v61, %v1488_v62 }
 0x3bd   :  { %v1616_v4 = vld [vmem:[#allocation2 + $0xd60] sm:$0xff]  ;;  %5580 = vmatpush1.bf16.msra.mxu1 %v7741_v9 }
 0x3be   :  { %v1476_v11 = vld [vmem:[#allocation2 + $0x900] sm:$0xff]  ;;  %v7734_v14 = vcombine.high %v1612_v0, %v1616_v4  ;;  %5540 = vmatprep.subr.bf16.mxu0 %v7606_v10  ;;  %v7733_v17 = vcombine.low %v1612_v0, %v1616_v4 }
 0x3bf   :  { %v1480_v12 = vld [vmem:[#allocation2 + $0x920] sm:$0xff]  ;;  %5541 = vmatpush1.bf16.msra.mxu0 %v7605_v16 }
 0x3c0   :  { %v1604_v13 = vld [vmem:[#allocation2 + $0xd00] sm:$0xff]  ;;  %v7598_v18 = vcombine.high %v1476_v11, %v1480_v12  ;;  %5581 = vmatprep.subr.bf16.mxu1 %v7734_v14  ;;  %v7597_v26 = vcombine.low %v1476_v11, %v1480_v12 }
 0x3c1   :  { %v1608_v15 = vld [vmem:[#allocation2 + $0xd20] sm:$0xff]  ;;  %5582 = vmatpush1.bf16.msra.mxu1 %v7733_v17 }
 0x3c2   :  { %v1468_v19 = vld [vmem:[#allocation2 + $0x8c0] sm:$0xff]  ;;  %v7726_v22 = vcombine.high %v1604_v13, %v1608_v15  ;;  %5542 = vmatprep.subr.bf16.mxu0 %v7598_v18  ;;  %v7725_v30 = vcombine.low %v1604_v13, %v1608_v15 }
 0x3c3   :  { %v1472_v20 = vld [vmem:[#allocation2 + $0x8e0] sm:$0xff]  ;;  %5543 = vmatpush1.bf16.msra.mxu0 %v7597_v26 }
 0x3c4   :  { %v1596_v21 = vld [vmem:[#allocation2 + $0xcc0] sm:$0xff]  ;;  %v7590_v31 = vcombine.high %v1468_v19, %v1472_v20  ;;  %5583 = vmatprep.subr.bf16.mxu1 %v7726_v22  ;;  %v7589_v37 = vcombine.low %v1468_v19, %v1472_v20 }
 0x3c5   :  { %v1600_v23 = vld [vmem:[#allocation2 + $0xce0] sm:$0xff]  ;;  %5584 = vmatpush1.bf16.msra.mxu1 %v7725_v30 }
 0x3c6   :  { %v1460_v32 = vld [vmem:[#allocation2 + $0x880] sm:$0xff]  ;;  %v7718_v35 = vcombine.high %v1596_v21, %v1600_v23  ;;  %5544 = vmatprep.subr.bf16.mxu0 %v7590_v31  ;;  %v7717_v38 = vcombine.low %v1596_v21, %v1600_v23 }
 0x3c7   :  { %v1464_v33 = vld [vmem:[#allocation2 + $0x8a0] sm:$0xff]  ;;  %5545 = vmatpush1.bf16.msra.mxu0 %v7589_v37 }
 0x3c8   :  { %v1588_v34 = vld [vmem:[#allocation2 + $0xc80] sm:$0xff]  ;;  %v7582_v28 = vcombine.high %v1460_v32, %v1464_v33  ;;  %5585 = vmatprep.subr.bf16.mxu1 %v7718_v35  ;;  %v7581_v43 = vcombine.low %v1460_v32, %v1464_v33 }
 0x3c9   :  { %v1592_v36 = vld [vmem:[#allocation2 + $0xca0] sm:$0xff]  ;;  %5586 = vmatpush1.bf16.msra.mxu1 %v7717_v38 }
 0x3ca   :  { %v1452_v39 = vld [vmem:[#allocation2 + $0x840] sm:$0xff]  ;;  %v7710_v42 = vcombine.high %v1588_v34, %v1592_v36  ;;  %5546 = vmatprep.subr.bf16.mxu0 %v7582_v28  ;;  %v7709_v44 = vcombine.low %v1588_v34, %v1592_v36 }
 0x3cb   :  { %v1456_v40 = vld [vmem:[#allocation2 + $0x860] sm:$0xff]  ;;  %5547 = vmatpush1.bf16.msra.mxu0 %v7581_v43 }
 0x3cc   :  { %v1580_v41 = vld [vmem:[#allocation2 + $0xc40] sm:$0xff]  ;;  %v7574_v45 = vcombine.high %v1452_v39, %v1456_v40  ;;  %5587 = vmatprep.subr.bf16.mxu1 %v7710_v42  ;;  %v7573_v57 = vcombine.low %v1452_v39, %v1456_v40 }
 0x3cd   :  { %v1584_v29 = vld [vmem:[#allocation2 + $0xc60] sm:$0xff]  ;;  %5588 = vmatpush1.bf16.msra.mxu1 %v7709_v44 }
 0x3ce   :  { %v1444_v46 = vld [vmem:[#allocation2 + $0x800] sm:$0xff]  ;;  %v7702_v52 = vcombine.high %v1580_v41, %v1584_v29  ;;  %5548 = vmatprep.subr.bf16.mxu0 %v7574_v45  ;;  %v7701_v58 = vcombine.low %v1580_v41, %v1584_v29 }
 0x3cf   :  { %v1448_v48 = vld [vmem:[#allocation2 + $0x820] sm:$0xff]  ;;  %5549 = vmatpush1.bf16.msra.mxu0 %v7573_v57 }
 0x3d0   :  { %v1572_v51 = vld [vmem:[#allocation2 + $0xc00] sm:$0xff]  ;;  %v7566_v59 = vcombine.high %v1444_v46, %v1448_v48  ;;  %5589 = vmatprep.subr.bf16.mxu1 %v7702_v52  ;;  %v7565_v4 = vcombine.low %v1444_v46, %v1448_v48 }
 0x3d1   :  { %v1576_v56 = vld [vmem:[#allocation2 + $0xc20] sm:$0xff]  ;;  %5590 = vmatpush1.bf16.msra.mxu1 %v7701_v58 }
 0x3d2   :  { %v1564_v49 = vld [vmem:[#allocation2 + $0xbc0] sm:$0xff]  ;;  %v7694_v0 = vcombine.high %v1572_v51, %v1576_v56  ;;  %5550 = vmatprep.subr.bf16.mxu0 %v7566_v59  ;;  %v7693_v5 = vcombine.low %v1572_v51, %v1576_v56 }
 0x3d3   :  { %v1568_v61 = vld [vmem:[#allocation2 + $0xbe0] sm:$0xff]  ;;  %5551 = vmatpush1.bf16.msra.mxu0 %v7565_v4 }
 0x3d4   :  { %v1692_v62 = vld [vmem:[#allocation2 + $0xfc0] sm:$0xff]  ;;  %v7686_v9 = vcombine.high %v1564_v49, %v1568_v61  ;;  %5591 = vmatprep.subr.bf16.mxu1 %v7694_v0  ;;  %v7685_v15 = vcombine.low %v1564_v49, %v1568_v61 }
 0x3d5   :  { %v1696_v2 = vld [vmem:[#allocation2 + $0xfe0] sm:$0xff]  ;;  %5592 = vmatpush1.bf16.msra.mxu1 %v7693_v5 }
 0x3d6   :  { %v1556_v10 = vld [vmem:[#allocation2 + $0xb80] sm:$0xff]  ;;  %v7814_v13 = vcombine.high %v1692_v62, %v1696_v2  ;;  %5552 = vmatprep.subr.bf16.mxu0 %v7686_v9  ;;  %v7813_v16 = vcombine.low %v1692_v62, %v1696_v2 }
 0x3d7   :  { %v1560_v11 = vld [vmem:[#allocation2 + $0xba0] sm:$0xff]  ;;  %5553 = vmatpush2.bf16.msra.mxu0 %v7685_v15 }
 0x3d8   :  { %v1684_v12 = vld [vmem:[#allocation2 + $0xf80] sm:$0xff]  ;;  %v7678_v17 = vcombine.high %v1556_v10, %v1560_v11  ;;  %5593 = vmatprep.subr.bf16.mxu1 %v7814_v13  ;;  %v7677_v23 = vcombine.low %v1556_v10, %v1560_v11 }
 0x3d9   :  { %v1688_v14 = vld [vmem:[#allocation2 + $0xfa0] sm:$0xff]  ;;  %5594 = vmatpush2.bf16.msra.mxu1 %v7813_v16 }
 0x3da   :  { %v1548_v18 = vld [vmem:[#allocation2 + $0xb40] sm:$0xff]  ;;  %v7806_v21 = vcombine.high %v1684_v12, %v1688_v14  ;;  %5554 = vmatprep.subr.bf16.mxu0 %v7678_v17  ;;  %v7805_v26 = vcombine.low %v1684_v12, %v1688_v14 }
 0x3db   :  { %v1552_v19 = vld [vmem:[#allocation2 + $0xb60] sm:$0xff]  ;;  %5555 = vmatpush2.bf16.msra.mxu0 %v7677_v23 }
 0x3dc   :  { %v1676_v20 = vld [vmem:[#allocation2 + $0xf40] sm:$0xff]  ;;  %v7670_v30 = vcombine.high %v1548_v18, %v1552_v19  ;;  %5595 = vmatprep.subr.bf16.mxu1 %v7806_v21  ;;  %v7669_v36 = vcombine.low %v1548_v18, %v1552_v19 }
 0x3dd   :  { %v1680_v22 = vld [vmem:[#allocation2 + $0xf60] sm:$0xff]  ;;  %5596 = vmatpush2.bf16.msra.mxu1 %v7805_v26 }
 0x3de   :  { %v1540_v31 = vld [vmem:[#allocation2 + $0xb00] sm:$0xff]  ;;  %v7798_v34 = vcombine.high %v1676_v20, %v1680_v22  ;;  %5556 = vmatprep.subr.bf16.mxu0 %v7670_v30  ;;  %v7797_v37 = vcombine.low %v1676_v20, %v1680_v22 }
 0x3df   :  { %v1544_v32 = vld [vmem:[#allocation2 + $0xb20] sm:$0xff]  ;;  %5557 = vmatpush2.bf16.msra.mxu0 %v7669_v36 }
 0x3e0   :  { %v1668_v33 = vld [vmem:[#allocation2 + $0xf00] sm:$0xff]  ;;  %v7662_v38 = vcombine.high %v1540_v31, %v1544_v32  ;;  %5597 = vmatprep.subr.bf16.mxu1 %v7798_v34  ;;  %v7661_v29 = vcombine.low %v1540_v31, %v1544_v32 }
 0x3e1   :  { %v1672_v35 = vld [vmem:[#allocation2 + $0xf20] sm:$0xff]  ;;  %5598 = vmatpush2.bf16.msra.mxu1 %v7797_v37 }
 0x3e2   :  { %v1532_v28 = vld [vmem:[#allocation2 + $0xac0] sm:$0xff]  ;;  %v7790_v41 = vcombine.high %v1668_v33, %v1672_v35  ;;  %5558 = vmatprep.subr.bf16.mxu0 %v7662_v38  ;;  %v7789_v43 = vcombine.low %v1668_v33, %v1672_v35 }
 0x3e3   :  { %v1536_v39 = vld [vmem:[#allocation2 + $0xae0] sm:$0xff]  ;;  %5559 = vmatpush2.bf16.msra.mxu0 %v7661_v29 }
 0x3e4   :  { %v1660_v40 = vld [vmem:[#allocation2 + $0xec0] sm:$0xff]  ;;  %v7654_v44 = vcombine.high %v1532_v28, %v1536_v39  ;;  %5599 = vmatprep.subr.bf16.mxu1 %v7790_v41  ;;  %v7653_v56 = vcombine.low %v1532_v28, %v1536_v39 }
 0x3e5   :  { %v1664_v42 = vld [vmem:[#allocation2 + $0xee0] sm:$0xff]  ;;  %5600 = vmatpush2.bf16.msra.mxu1 %v7789_v43 }
 0x3e6   :  { %v1524_v45 = vld [vmem:[#allocation2 + $0xa80] sm:$0xff]  ;;  %v7782_v51 = vcombine.high %v1660_v40, %v1664_v42  ;;  %5560 = vmatprep.subr.bf16.mxu0 %v7654_v44  ;;  %v7781_v57 = vcombine.low %v1660_v40, %v1664_v42 }
 0x3e7   :  { %v1528_v46 = vld [vmem:[#allocation2 + $0xaa0] sm:$0xff]  ;;  %5561 = vmatpush2.bf16.msra.mxu0 %v7653_v56 }
 0x3e8   :  { %v1652_v48 = vld [vmem:[#allocation2 + $0xe80] sm:$0xff]  ;;  %v7646_v58 = vcombine.high %v1524_v45, %v1528_v46  ;;  %5601 = vmatprep.subr.bf16.mxu1 %v7782_v51  ;;  %v7645_v2 = vcombine.low %v1524_v45, %v1528_v46 }
 0x3e9   :  { %v1656_v52 = vld [vmem:[#allocation2 + $0xea0] sm:$0xff]  ;;  %5602 = vmatpush2.bf16.msra.mxu1 %v7781_v57 }
 0x3ea   :  { %v1516_v59 = vld [vmem:[#allocation2 + $0xa40] sm:$0xff]  ;;  %v7774_v62 = vcombine.high %v1652_v48, %v1656_v52  ;;  %5562 = vmatprep.subr.bf16.mxu0 %v7646_v58  ;;  %v7773_v4 = vcombine.low %v1652_v48, %v1656_v52  ;;  %v8493_v48 = vmov 0  }
 0x3eb   :  { %v1520_v49 = vld [vmem:[#allocation2 + $0xa60] sm:$0xff]  ;;  %5563 = vmatpush2.bf16.msra.mxu0 %v7645_v2 }
 0x3ec   :  { %v1644_v61 = vld [vmem:[#allocation2 + $0xe40] sm:$0xff]  ;;  %v7638_v5 = vcombine.high %v1516_v59, %v1520_v49  ;;  %5603 = vmatprep.subr.bf16.mxu1 %v7774_v62  ;;  %v7637_v14 = vcombine.low %v1516_v59, %v1520_v49 }
 0x3ed   :  { %v1648_v0 = vld [vmem:[#allocation2 + $0xe60] sm:$0xff]  ;;  %5604 = vmatpush2.bf16.msra.mxu1 %v7773_v4 }
 0x3ee   :  { %v1508_v9 = vld [vmem:[#allocation2 + $0xa00] sm:$0xff]  ;;  %v7766_v12 = vcombine.high %v1644_v61, %v1648_v0  ;;  %5564 = vmatprep.subr.bf16.mxu0 %v7638_v5  ;;  %v7765_v15 = vcombine.low %v1644_v61, %v1648_v0 }
 0x3ef   :  { %v1512_v10 = vld [vmem:[#allocation2 + $0xa20] sm:$0xff]  ;;  %5565 = vmatpush2.bf16.msra.mxu0 %v7637_v14 }
 0x3f0   :  { %v1636_v11 = vld [vmem:[#allocation2 + $0xe00] sm:$0xff]  ;;  %v7630_v16 = vcombine.high %v1508_v9, %v1512_v10  ;;  %5605 = vmatprep.subr.bf16.mxu1 %v7766_v12  ;;  %v7629_v22 = vcombine.low %v1508_v9, %v1512_v10 }
 0x3f1   :  { %v1640_v13 = vld [vmem:[#allocation2 + $0xe20] sm:$0xff]  ;;  %5606 = vmatpush2.bf16.msra.mxu1 %v7765_v15 }
 0x3f2   :  { %v1756_v17 = vld [vmem:[#allocation2 + $0x11c0] sm:$0xff]  ;;  %v7758_v20 = vcombine.high %v1636_v11, %v1640_v13  ;;  %5566 = vmatprep.subr.bf16.mxu0 %v7630_v16  ;;  %v7757_v23 = vcombine.low %v1636_v11, %v1640_v13 }
 0x3f3   :  { %v1760_v18 = vld [vmem:[#allocation2 + $0x11e0] sm:$0xff]  ;;  %5567 = vmatpush2.bf16.msra.mxu0 %v7629_v22 }
 0x3f4   :  { %v1884_v19 = vld [vmem:[#allocation2 + $0x15c0] sm:$0xff]  ;;  %v7878_v26 = vcombine.high %v1756_v17, %v1760_v18  ;;  %5607 = vmatprep.subr.bf16.mxu1 %v7758_v20  ;;  %v7877_v35 = vcombine.low %v1756_v17, %v1760_v18 }
 0x3f5   :  { %v1888_v21 = vld [vmem:[#allocation2 + $0x15e0] sm:$0xff]  ;;  %5608 = vmatpush2.bf16.msra.mxu1 %v7757_v23 }
 0x3f6   :  { %v1748_v30 = vld [vmem:[#allocation2 + $0x1180] sm:$0xff]  ;;  %v8006_v33 = vcombine.high %v1884_v19, %v1888_v21  ;;  %5618 = vmatprep.subr.bf16.mxu0 %v7878_v26  ;;  %v8005_v36 = vcombine.low %v1884_v19, %v1888_v21  ;;  %5569 = vmatmul.mubr.bf16.vlgmr.msra.gmra.mxu0 %v9106_v60 }
 0x3f7   :  { %v1752_v31 = vld [vmem:[#allocation2 + $0x11a0] sm:$0xff]  ;;  %5619 = vmatpush1.bf16.msra.mxu0 %v7877_v35  ;;  %5650 = vmatprep.mubr.bf16.mxu0 %v9118_v8 }
 0x3f8   :  { %v1876_v32 = vld [vmem:[#allocation2 + $0x1580] sm:$0xff]  ;;  %v7870_v37 = vcombine.high %v1748_v30, %v1752_v31  ;;  %5659 = vmatprep.subr.bf16.mxu1 %v8006_v33  ;;  %5610 = vmatmul.mubr.bf16.vlgmr.msra.gmra.mxu1 %v9110_v50  ;;  %v7869_v42 = vcombine.low %v1748_v30, %v1752_v31 }
 0x3f9   :  { %v1880_v34 = vld [vmem:[#allocation2 + $0x15a0] sm:$0xff]  ;;  %5660 = vmatpush1.bf16.msra.mxu1 %v8005_v36  ;;  %5691 = vmatprep.mubr.bf16.mxu1 %v8493_v48 }
 0x3fa   :  { %v7998_v38 = vcombine.high %v1876_v32, %v1880_v34  ;;  %v1740_v28 = vld [vmem:[#allocation2 + $0x1140] sm:$0xff]  ;;  %5620 = vmatprep.subr.bf16.mxu0 %v7870_v37  ;;  %v7997_v29 = vcombine.low %v1876_v32, %v1880_v34 }
 0x3fb   :  { %v1744_v39 = vld [vmem:[#allocation2 + $0x1160] sm:$0xff]  ;;  %5621 = vmatpush1.bf16.msra.mxu0 %v7869_v42 }
 0x3fc   :  { %v1868_v40 = vld [vmem:[#allocation2 + $0x1540] sm:$0xff]  ;;  %v7862_v43 = vcombine.high %v1740_v28, %v1744_v39  ;;  %5661 = vmatprep.subr.bf16.mxu1 %v7998_v38  ;;  %v7861_v56 = vcombine.low %v1740_v28, %v1744_v39 }
 0x3fd   :  { %v1872_v41 = vld [vmem:[#allocation2 + $0x1560] sm:$0xff]  ;;  %5662 = vmatpush1.bf16.msra.mxu1 %v7997_v29 }
 0x3fe   :  { %v7990_v44 = vcombine.high %v1868_v40, %v1872_v41  ;;  %v1732_v45 = vld [vmem:[#allocation2 + $0x1100] sm:$0xff]  ;;  %5622 = vmatprep.subr.bf16.mxu0 %v7862_v43  ;;  %v7989_v57 = vcombine.low %v1868_v40, %v1872_v41  ;;  %v1245_v40 = vld [vmem:[#allocation2 + $0x1c8] sm:$0xff] }
 0x3ff   :  { %v1736_v46 = vld [vmem:[#allocation2 + $0x1120] sm:$0xff]  ;;  %5623 = vmatpush1.bf16.msra.mxu0 %v7861_v56  ;;  %v1249_v41 = vld [vmem:[#allocation2 + $0x1e8] sm:$0xff] }
 0x400   :  { %v1860_v51 = vld [vmem:[#allocation2 + $0x1500] sm:$0xff]  ;;  %v7854_v58 = vcombine.high %v1732_v45, %v1736_v46  ;;  %5663 = vmatprep.subr.bf16.mxu1 %v7990_v44  ;;  %v7853_v2 = vcombine.low %v1732_v45, %v1736_v46  ;;  %v7368_v44 = vcombine.high %v1245_v40, %v1249_v41 }
 0x401   :  { %v1864_v52 = vld [vmem:[#allocation2 + $0x1520] sm:$0xff]  ;;  %5664 = vmatpush1.bf16.msra.mxu1 %v7989_v57  ;;  %v7367_v57 = vcombine.low %v1245_v40, %v1249_v41  ;;  %v1197_v40 = vld [vmem:[#allocation2 + $0x48] sm:$0xff] }
 0x402   :  { %v7982_v59 = vcombine.high %v1860_v51, %v1864_v52  ;;  %v1724_v49 = vld [vmem:[#allocation2 + $0x10c0] sm:$0xff]  ;;  %5624 = vmatprep.subr.bf16.mxu0 %v7854_v58  ;;  %v7981_v4 = vcombine.low %v1860_v51, %v1864_v52  ;;  %v1237_v51 = vld [vmem:[#allocation2 + $0x188] sm:$0xff] }
 0x403   :  { %v1728_v61 = vld [vmem:[#allocation2 + $0x10e0] sm:$0xff]  ;;  %5625 = vmatpush1.bf16.msra.mxu0 %v7853_v2  ;;  %v1241_v52 = vld [vmem:[#allocation2 + $0x1a8] sm:$0xff] }
 0x404   :  { %v1852_v62 = vld [vmem:[#allocation2 + $0x14c0] sm:$0xff]  ;;  %v7846_v5 = vcombine.high %v1724_v49, %v1728_v61  ;;  %5665 = vmatprep.subr.bf16.mxu1 %v7982_v59  ;;  %v7845_v14 = vcombine.low %v1724_v49, %v1728_v61  ;;  %v7360_v59 = vcombine.high %v1237_v51, %v1241_v52  ;;  %v1201_v41 = vld [vmem:[#allocation2 + $0x68] sm:$0xff] }
 0x405   :  { %v1856_v0 = vld [vmem:[#allocation2 + $0x14e0] sm:$0xff]  ;;  %5666 = vmatpush1.bf16.msra.mxu1 %v7981_v4  ;;  %v7359_v4 = vcombine.low %v1237_v51, %v1241_v52  ;;  %v1189_v51 = vld [vmem:[#allocation2 + $0x8] sm:$0xff] }
 0x406   :  { %v7974_v9 = vcombine.high %v1852_v62, %v1856_v0  ;;  %v1716_v10 = vld [vmem:[#allocation2 + $0x1080] sm:$0xff]  ;;  %5626 = vmatprep.subr.bf16.mxu0 %v7846_v5  ;;  %v7973_v15 = vcombine.low %v1852_v62, %v1856_v0  ;;  %v1229_v62 = vld [vmem:[#allocation2 + $0x148] sm:$0xff] }
 0x407   :  { %v1720_v11 = vld [vmem:[#allocation2 + $0x10a0] sm:$0xff]  ;;  %5627 = vmatpush1.bf16.msra.mxu0 %v7845_v14  ;;  %v1233_v0 = vld [vmem:[#allocation2 + $0x168] sm:$0xff] }
 0x408   :  { %v1844_v12 = vld [vmem:[#allocation2 + $0x1480] sm:$0xff]  ;;  %v7838_v16 = vcombine.high %v1716_v10, %v1720_v11  ;;  %5667 = vmatprep.subr.bf16.mxu1 %v7974_v9  ;;  %v7837_v22 = vcombine.low %v1716_v10, %v1720_v11  ;;  %v7352_v9 = vcombine.high %v1229_v62, %v1233_v0  ;;  %v1193_v52 = vld [vmem:[#allocation2 + $0x28] sm:$0xff] }
 0x409   :  { %v1848_v13 = vld [vmem:[#allocation2 + $0x14a0] sm:$0xff]  ;;  %5668 = vmatpush1.bf16.msra.mxu1 %v7973_v15  ;;  %v7351_v15 = vcombine.low %v1229_v62, %v1233_v0  ;;  %v1309_v62 = vld [vmem:[#allocation2 + $0x3c8] sm:$0xff] }
 0x40a   :  { %v7966_v17 = vcombine.high %v1844_v12, %v1848_v13  ;;  %v1708_v18 = vld [vmem:[#allocation2 + $0x1040] sm:$0xff]  ;;  %5628 = vmatprep.subr.bf16.mxu0 %v7838_v16  ;;  %v7965_v23 = vcombine.low %v1844_v12, %v1848_v13  ;;  %v1221_v12 = vld [vmem:[#allocation2 + $0x108] sm:$0xff] }
 0x40b   :  { %v1712_v19 = vld [vmem:[#allocation2 + $0x1060] sm:$0xff]  ;;  %5629 = vmatpush1.bf16.msra.mxu0 %v7837_v22  ;;  %v1225_v13 = vld [vmem:[#allocation2 + $0x128] sm:$0xff] }
 0x40c   :  { %v1836_v20 = vld [vmem:[#allocation2 + $0x1440] sm:$0xff]  ;;  %v7830_v26 = vcombine.high %v1708_v18, %v1712_v19  ;;  %5669 = vmatprep.subr.bf16.mxu1 %v7966_v17  ;;  %v7829_v35 = vcombine.low %v1708_v18, %v1712_v19  ;;  %v7344_v17 = vcombine.high %v1221_v12, %v1225_v13  ;;  %v1313_v0 = vld [vmem:[#allocation2 + $0x3e8] sm:$0xff] }
 0x40d   :  { %v1840_v21 = vld [vmem:[#allocation2 + $0x1460] sm:$0xff]  ;;  %5670 = vmatpush1.bf16.msra.mxu1 %v7965_v23  ;;  %v7343_v23 = vcombine.low %v1221_v12, %v1225_v13  ;;  %v1301_v12 = vld [vmem:[#allocation2 + $0x388] sm:$0xff] }
 0x40e   :  { %v7958_v30 = vcombine.high %v1836_v20, %v1840_v21  ;;  %v1700_v31 = vld [vmem:[#allocation2 + $0x1000] sm:$0xff]  ;;  %5630 = vmatprep.subr.bf16.mxu0 %v7830_v26  ;;  %v7957_v36 = vcombine.low %v1836_v20, %v1840_v21  ;;  %v1213_v20 = vld [vmem:[#allocation2 + $0xc8] sm:$0xff] }
 0x40f   :  { %v1704_v32 = vld [vmem:[#allocation2 + $0x1020] sm:$0xff]  ;;  %5631 = vmatpush1.bf16.msra.mxu0 %v7829_v35  ;;  %v1217_v21 = vld [vmem:[#allocation2 + $0xe8] sm:$0xff] }
 0x410   :  { %v1828_v33 = vld [vmem:[#allocation2 + $0x1400] sm:$0xff]  ;;  %v7822_v37 = vcombine.high %v1700_v31, %v1704_v32  ;;  %5671 = vmatprep.subr.bf16.mxu1 %v7958_v30  ;;  %v7821_v42 = vcombine.low %v1700_v31, %v1704_v32  ;;  %v7336_v30 = vcombine.high %v1213_v20, %v1217_v21  ;;  %v1305_v13 = vld [vmem:[#allocation2 + $0x3a8] sm:$0xff] }
 0x411   :  { %v1832_v34 = vld [vmem:[#allocation2 + $0x1420] sm:$0xff]  ;;  %5672 = vmatpush1.bf16.msra.mxu1 %v7957_v36  ;;  %v7335_v36 = vcombine.low %v1213_v20, %v1217_v21  ;;  %v1293_v20 = vld [vmem:[#allocation2 + $0x348] sm:$0xff] }
 0x412   :  { %v7950_v38 = vcombine.high %v1828_v33, %v1832_v34  ;;  %v1820_v28 = vld [vmem:[#allocation2 + $0x13c0] sm:$0xff]  ;;  %5632 = vmatprep.subr.bf16.mxu0 %v7822_v37  ;;  %v7949_v29 = vcombine.low %v1828_v33, %v1832_v34  ;;  %v1205_v33 = vld [vmem:[#allocation2 + $0x88] sm:$0xff] }
 0x413   :  { %v1824_v39 = vld [vmem:[#allocation2 + $0x13e0] sm:$0xff]  ;;  %5633 = vmatpush1.bf16.msra.mxu0 %v7821_v42  ;;  %v1209_v34 = vld [vmem:[#allocation2 + $0xa8] sm:$0xff] }
 0x414   :  { %v7942_v43 = vcombine.high %v1820_v28, %v1824_v39  ;;  %5673 = vmatprep.subr.bf16.mxu1 %v7950_v38  ;;  %v1812_v45 = vld [vmem:[#allocation2 + $0x1380] sm:$0xff]  ;;  %v7941_v56 = vcombine.low %v1820_v28, %v1824_v39  ;;  %v7328_v38 = vcombine.high %v1205_v33, %v1209_v34  ;;  %v1297_v21 = vld [vmem:[#allocation2 + $0x368] sm:$0xff] }
 0x415   :  { %v1816_v46 = vld [vmem:[#allocation2 + $0x13a0] sm:$0xff]  ;;  %5674 = vmatpush1.bf16.msra.mxu1 %v7949_v29  ;;  %v7327_v29 = vcombine.low %v1205_v33, %v1209_v34  ;;  %v1285_v33 = vld [vmem:[#allocation2 + $0x308] sm:$0xff] }
 0x416   :  { %5634 = vmatprep.subr.bf16.mxu0 %v7942_v43  ;;  %v7934_v58 = vcombine.high %v1812_v45, %v1816_v46  ;;  %5700 = vmatprep.subr.bf16.mxu1 %v7368_v44  ;;  %v1804_v49 = vld [vmem:[#allocation2 + $0x1340] sm:$0xff]  ;;  %v7933_v2 = vcombine.low %v1812_v45, %v1816_v46  ;;  %v7320_v44 = vcombine.high %v1197_v40, %v1201_v41  ;;  %v1289_v34 = vld [vmem:[#allocation2 + $0x328] sm:$0xff] }
 0x417   :  { %v1808_v61 = vld [vmem:[#allocation2 + $0x1360] sm:$0xff]  ;;  %5635 = vmatpush2.bf16.msra.mxu0 %v7941_v56 }
 0x418   :  { %5692 = vmatmul.mubr.bf16.vlgmr.msra.gmra.mxu1 %v9116_v7  ;;  %5636 = vmatprep.subr.bf16.mxu0 %v7934_v58  ;;  %v7926_v5 = vcombine.high %v1804_v49, %v1808_v61  ;;  %v1796_v10 = vld [vmem:[#allocation2 + $0x1300] sm:$0xff]  ;;  %v7925_v14 = vcombine.low %v1804_v49, %v1808_v61  ;;  %v1373_v49 = vld [vmem:[#allocation2 + $0x5c8] sm:$0xff] }
 0x419   :  { %5701 = vmatpush1.bf16.msra.mxu1 %v7367_v57  ;;  %v1800_v11 = vld [vmem:[#allocation2 + $0x1320] sm:$0xff]  ;;  %5732 = vmatprep.mubr.bf16.mxu1 %v9099_v53  ;;  %v7319_v57 = vcombine.low %v1197_v40, %v1201_v41  ;;  %v1377_v61 = vld [vmem:[#allocation2 + $0x5e8] sm:$0xff] }
 0x41a   :  { %5702 = vmatprep.subr.bf16.mxu1 %v7360_v59  ;;  %v7918_v16 = vcombine.high %v1796_v10, %v1800_v11  ;;  %v1788_v18 = vld [vmem:[#allocation2 + $0x12c0] sm:$0xff]  ;;  %v7917_v22 = vcombine.low %v1796_v10, %v1800_v11  ;;  %v7312_v59 = vcombine.high %v1189_v51, %v1193_v52  ;;  %v1365_v10 = vld [vmem:[#allocation2 + $0x588] sm:$0xff] }
 0x41b   :  { %5637 = vmatpush2.bf16.msra.mxu0 %v7933_v2  ;;  %v1792_v19 = vld [vmem:[#allocation2 + $0x12e0] sm:$0xff]  ;;  %v1369_v11 = vld [vmem:[#allocation2 + $0x5a8] sm:$0xff] }
 0x41c   :  { %5638 = vmatprep.subr.bf16.mxu0 %v7926_v5  ;;  %v7910_v26 = vcombine.high %v1788_v18, %v1792_v19  ;;  %v1780_v31 = vld [vmem:[#allocation2 + $0x1280] sm:$0xff]  ;;  %v7909_v35 = vcombine.low %v1788_v18, %v1792_v19  ;;  %v7496_v5 = vcombine.high %v1373_v49, %v1377_v61  ;;  %v1357_v18 = vld [vmem:[#allocation2 + $0x548] sm:$0xff] }
 0x41d   :  { %5703 = vmatpush1.bf16.msra.mxu1 %v7359_v4  ;;  %v1784_v32 = vld [vmem:[#allocation2 + $0x12a0] sm:$0xff]  ;;  %v7311_v4 = vcombine.low %v1189_v51, %v1193_v52  ;;  %v1361_v19 = vld [vmem:[#allocation2 + $0x568] sm:$0xff] }
 0x41e   :  { %5704 = vmatprep.subr.bf16.mxu1 %v7352_v9  ;;  %v7902_v37 = vcombine.high %v1780_v31, %v1784_v32  ;;  %v1772_v28 = vld [vmem:[#allocation2 + $0x1240] sm:$0xff]  ;;  %v7901_v42 = vcombine.low %v1780_v31, %v1784_v32  ;;  %v7432_v9 = vcombine.high %v1309_v62, %v1313_v0  ;;  %v1349_v31 = vld [vmem:[#allocation2 + $0x508] sm:$0xff] }
 0x41f   :  { %5639 = vmatpush2.bf16.msra.mxu0 %v7925_v14  ;;  %v1776_v39 = vld [vmem:[#allocation2 + $0x1260] sm:$0xff]  ;;  %v7495_v14 = vcombine.low %v1373_v49, %v1377_v61  ;;  %v1353_v32 = vld [vmem:[#allocation2 + $0x528] sm:$0xff] }
 0x420   :  { %5640 = vmatprep.subr.bf16.mxu0 %v7918_v16  ;;  %v7894_v43 = vcombine.high %v1772_v28, %v1776_v39  ;;  %v1764_v45 = vld [vmem:[#allocation2 + $0x1200] sm:$0xff]  ;;  %v7893_v56 = vcombine.low %v1772_v28, %v1776_v39  ;;  %v7488_v16 = vcombine.high %v1365_v10, %v1369_v11  ;;  %v1341_v28 = vld [vmem:[#allocation2 + $0x4c8] sm:$0xff] }
 0x421   :  { %5705 = vmatpush1.bf16.msra.mxu1 %v7351_v15  ;;  %v1768_v46 = vld [vmem:[#allocation2 + $0x1220] sm:$0xff]  ;;  %v7431_v15 = vcombine.low %v1309_v62, %v1313_v0  ;;  %v1345_v39 = vld [vmem:[#allocation2 + $0x4e8] sm:$0xff] }
 0x422   :  { %5706 = vmatprep.subr.bf16.mxu1 %v7344_v17  ;;  %v7886_v58 = vcombine.high %v1764_v45, %v1768_v46  ;;  %v7885_v2 = vcombine.low %v1764_v45, %v1768_v46  ;;  %v7424_v17 = vcombine.high %v1301_v12, %v1305_v13  ;;  %v1277_v40 = vld [vmem:[#allocation2 + $0x2c8] sm:$0xff] }
 0x423   :  { %5641 = vmatpush2.bf16.msra.mxu0 %v7917_v22  ;;  %v7487_v22 = vcombine.low %v1365_v10, %v1369_v11  ;;  %v1281_v41 = vld [vmem:[#allocation2 + $0x2e8] sm:$0xff] }
 0x424   :  { %5642 = vmatprep.subr.bf16.mxu0 %v7910_v26  ;;  %v7480_v26 = vcombine.high %v1357_v18, %v1361_v19  ;;  %v1333_v45 = vld [vmem:[#allocation2 + $0x488] sm:$0xff] }
 0x425   :  { %5707 = vmatpush1.bf16.msra.mxu1 %v7343_v23  ;;  %v7423_v23 = vcombine.low %v1301_v12, %v1305_v13  ;;  %v1337_v46 = vld [vmem:[#allocation2 + $0x4a8] sm:$0xff] }
 0x426   :  { %5708 = vmatprep.subr.bf16.mxu1 %v7336_v30  ;;  %v7416_v30 = vcombine.high %v1293_v20, %v1297_v21  ;;  %v1269_v51 = vld [vmem:[#allocation2 + $0x288] sm:$0xff] }
 0x427   :  { %5643 = vmatpush2.bf16.msra.mxu0 %v7909_v35  ;;  %v7479_v35 = vcombine.low %v1357_v18, %v1361_v19  ;;  %v1273_v52 = vld [vmem:[#allocation2 + $0x2a8] sm:$0xff] }
 0x428   :  { %5644 = vmatprep.subr.bf16.mxu0 %v7902_v37  ;;  %v7472_v37 = vcombine.high %v1349_v31, %v1353_v32  ;;  %v1325_v49 = vld [vmem:[#allocation2 + $0x448] sm:$0xff] }
 0x429   :  { %5709 = vmatpush1.bf16.msra.mxu1 %v7335_v36  ;;  %v7415_v36 = vcombine.low %v1293_v20, %v1297_v21  ;;  %v1329_v61 = vld [vmem:[#allocation2 + $0x468] sm:$0xff] }
 0x42a   :  { %5710 = vmatprep.subr.bf16.mxu1 %v7328_v38  ;;  %v7408_v38 = vcombine.high %v1285_v33, %v1289_v34  ;;  %v1261_v62 = vld [vmem:[#allocation2 + $0x248] sm:$0xff] }
 0x42b   :  { %5645 = vmatpush2.bf16.msra.mxu0 %v7901_v42  ;;  %v7471_v42 = vcombine.low %v1349_v31, %v1353_v32  ;;  %v1265_v0 = vld [vmem:[#allocation2 + $0x268] sm:$0xff] }
 0x42c   :  { %5646 = vmatprep.subr.bf16.mxu0 %v7894_v43  ;;  %v7464_v43 = vcombine.high %v1341_v28, %v1345_v39  ;;  %v1317_v10 = vld [vmem:[#allocation2 + $0x408] sm:$0xff] }
 0x42d   :  { %5711 = vmatpush1.bf16.msra.mxu1 %v7327_v29  ;;  %v7407_v29 = vcombine.low %v1285_v33, %v1289_v34  ;;  %v1321_v11 = vld [vmem:[#allocation2 + $0x428] sm:$0xff] }
 0x42e   :  { %5712 = vmatprep.subr.bf16.mxu1 %v7320_v44  ;;  %v7400_v44 = vcombine.high %v1277_v40, %v1281_v41  ;;  %v1253_v12 = vld [vmem:[#allocation2 + $0x208] sm:$0xff] }
 0x42f   :  { %5647 = vmatpush2.bf16.msra.mxu0 %v7893_v56  ;;  %v7463_v56 = vcombine.low %v1341_v28, %v1345_v39  ;;  %v1257_v13 = vld [vmem:[#allocation2 + $0x228] sm:$0xff] }
 0x430   :  { %5648 = vmatprep.subr.bf16.mxu0 %v7886_v58  ;;  %v7456_v58 = vcombine.high %v1333_v45, %v1337_v46  ;;  %v1437_v18 = vld [vmem:[#allocation2 + $0x7c8] sm:$0xff] }
 0x431   :  { %5713 = vmatpush1.bf16.msra.mxu1 %v7319_v57  ;;  %v7399_v57 = vcombine.low %v1277_v40, %v1281_v41  ;;  %v1441_v19 = vld [vmem:[#allocation2 + $0x7e8] sm:$0xff] }
 0x432   :  { %5714 = vmatprep.subr.bf16.mxu1 %v7312_v59  ;;  %v7392_v59 = vcombine.high %v1269_v51, %v1273_v52  ;;  %v1501_v20 = vld [vmem:[#allocation2 + $0x9c8] sm:$0xff] }
 0x433   :  { %5649 = vmatpush2.bf16.msra.mxu0 %v7885_v2  ;;  %v7455_v2 = vcombine.low %v1333_v45, %v1337_v46  ;;  %v1505_v21 = vld [vmem:[#allocation2 + $0x9e8] sm:$0xff] }
 0x434   :  { %5741 = vmatprep.subr.bf16.mxu0 %v7496_v5  ;;  %v7448_v5 = vcombine.high %v1325_v49, %v1329_v61  ;;  %v1429_v31 = vld [vmem:[#allocation2 + $0x788] sm:$0xff] }
 0x435   :  { %5715 = vmatpush1.bf16.msra.mxu1 %v7311_v4  ;;  %v7391_v4 = vcombine.low %v1269_v51, %v1273_v52  ;;  %v1433_v32 = vld [vmem:[#allocation2 + $0x7a8] sm:$0xff] }
 0x436   :  { %5716 = vmatprep.subr.bf16.mxu1 %v7432_v9  ;;  %5651 = vmatmul.mubr.bf16.vlgmr.msra.gmra.mxu0 %v9114_v6  ;;  %v7384_v9 = vcombine.high %v1261_v62, %v1265_v0  ;;  %v1493_v33 = vld [vmem:[#allocation2 + $0x988] sm:$0xff] }
 0x437   :  { %5742 = vmatpush1.bf16.msra.mxu0 %v7495_v14  ;;  %5773 = vmatprep.mubr.bf16.mxu0 %v9104_v55  ;;  %v7447_v14 = vcombine.low %v1325_v49, %v1329_v61  ;;  %v1497_v34 = vld [vmem:[#allocation2 + $0x9a8] sm:$0xff] }
 0x438   :  { %5743 = vmatprep.subr.bf16.mxu0 %v7488_v16  ;;  %v7440_v16 = vcombine.high %v1317_v10, %v1321_v11  ;;  %v1421_v28 = vld [vmem:[#allocation2 + $0x748] sm:$0xff] }
 0x439   :  { %5717 = vmatpush2.bf16.msra.mxu1 %v7431_v15  ;;  %v7383_v15 = vcombine.low %v1261_v62, %v1265_v0  ;;  %v1425_v39 = vld [vmem:[#allocation2 + $0x768] sm:$0xff] }
 0x43a   :  { %5718 = vmatprep.subr.bf16.mxu1 %v7424_v17  ;;  %v7376_v17 = vcombine.high %v1253_v12, %v1257_v13  ;;  %v1485_v40 = vld [vmem:[#allocation2 + $0x948] sm:$0xff] }
 0x43b   :  { %5744 = vmatpush1.bf16.msra.mxu0 %v7487_v22  ;;  %v7439_v22 = vcombine.low %v1317_v10, %v1321_v11  ;;  %v1489_v41 = vld [vmem:[#allocation2 + $0x968] sm:$0xff] }
 0x43c   :  { %5745 = vmatprep.subr.bf16.mxu0 %v7480_v26  ;;  %v7560_v26 = vcombine.high %v1437_v18, %v1441_v19  ;;  %v1413_v45 = vld [vmem:[#allocation2 + $0x708] sm:$0xff] }
 0x43d   :  { %5719 = vmatpush2.bf16.msra.mxu1 %v7423_v23  ;;  %v7375_v23 = vcombine.low %v1253_v12, %v1257_v13  ;;  %v1417_v46 = vld [vmem:[#allocation2 + $0x728] sm:$0xff] }
 0x43e   :  { %5720 = vmatprep.subr.bf16.mxu1 %v7416_v30  ;;  %v7624_v30 = vcombine.high %v1501_v20, %v1505_v21  ;;  %v1477_v51 = vld [vmem:[#allocation2 + $0x908] sm:$0xff] }
 0x43f   :  { %5746 = vmatpush1.bf16.msra.mxu0 %v7479_v35  ;;  %v7559_v35 = vcombine.low %v1437_v18, %v1441_v19  ;;  %v1481_v52 = vld [vmem:[#allocation2 + $0x928] sm:$0xff] }
 0x440   :  { %5747 = vmatprep.subr.bf16.mxu0 %v7472_v37  ;;  %v7552_v37 = vcombine.high %v1429_v31, %v1433_v32  ;;  %v1405_v49 = vld [vmem:[#allocation2 + $0x6c8] sm:$0xff] }
 0x441   :  { %5721 = vmatpush2.bf16.msra.mxu1 %v7415_v36  ;;  %v7623_v36 = vcombine.low %v1501_v20, %v1505_v21  ;;  %v1409_v61 = vld [vmem:[#allocation2 + $0x6e8] sm:$0xff] }
 0x442   :  { %5722 = vmatprep.subr.bf16.mxu1 %v7408_v38  ;;  %v7616_v38 = vcombine.high %v1493_v33, %v1497_v34  ;;  %v1469_v62 = vld [vmem:[#allocation2 + $0x8c8] sm:$0xff] }
 0x443   :  { %5748 = vmatpush1.bf16.msra.mxu0 %v7471_v42  ;;  %v7551_v42 = vcombine.low %v1429_v31, %v1433_v32  ;;  %v1473_v0 = vld [vmem:[#allocation2 + $0x8e8] sm:$0xff] }
 0x444   :  { %5749 = vmatprep.subr.bf16.mxu0 %v7464_v43  ;;  %v7544_v43 = vcombine.high %v1421_v28, %v1425_v39  ;;  %v1397_v10 = vld [vmem:[#allocation2 + $0x688] sm:$0xff] }
 0x445   :  { %5723 = vmatpush2.bf16.msra.mxu1 %v7407_v29  ;;  %v7615_v29 = vcombine.low %v1493_v33, %v1497_v34  ;;  %v1401_v11 = vld [vmem:[#allocation2 + $0x6a8] sm:$0xff] }
 0x446   :  { %5724 = vmatprep.subr.bf16.mxu1 %v7400_v44  ;;  %v7608_v44 = vcombine.high %v1485_v40, %v1489_v41  ;;  %v1461_v12 = vld [vmem:[#allocation2 + $0x888] sm:$0xff] }
 0x447   :  { %5750 = vmatpush1.bf16.msra.mxu0 %v7463_v56  ;;  %v7543_v56 = vcombine.low %v1421_v28, %v1425_v39  ;;  %v1465_v13 = vld [vmem:[#allocation2 + $0x8a8] sm:$0xff] }
 0x448   :  { %5751 = vmatprep.subr.bf16.mxu0 %v7456_v58  ;;  %v7536_v58 = vcombine.high %v1413_v45, %v1417_v46  ;;  %v1389_v18 = vld [vmem:[#allocation2 + $0x648] sm:$0xff] }
 0x449   :  { %5725 = vmatpush2.bf16.msra.mxu1 %v7399_v57  ;;  %v7607_v57 = vcombine.low %v1485_v40, %v1489_v41  ;;  %v1393_v19 = vld [vmem:[#allocation2 + $0x668] sm:$0xff] }
 0x44a   :  { %5726 = vmatprep.subr.bf16.mxu1 %v7392_v59  ;;  %v7600_v59 = vcombine.high %v1477_v51, %v1481_v52  ;;  %v1453_v20 = vld [vmem:[#allocation2 + $0x848] sm:$0xff] }
 0x44b   :  { %5752 = vmatpush1.bf16.msra.mxu0 %v7455_v2  ;;  %v7535_v2 = vcombine.low %v1413_v45, %v1417_v46  ;;  %v1457_v21 = vld [vmem:[#allocation2 + $0x868] sm:$0xff] }
 0x44c   :  { %5753 = vmatprep.subr.bf16.mxu0 %v7448_v5  ;;  %v7528_v5 = vcombine.high %v1405_v49, %v1409_v61  ;;  %v1381_v31 = vld [vmem:[#allocation2 + $0x608] sm:$0xff] }
 0x44d   :  { %5727 = vmatpush2.bf16.msra.mxu1 %v7391_v4  ;;  %v7599_v4 = vcombine.low %v1477_v51, %v1481_v52  ;;  %v1385_v32 = vld [vmem:[#allocation2 + $0x628] sm:$0xff] }
 0x44e   :  { %5728 = vmatprep.subr.bf16.mxu1 %v7384_v9  ;;  %v7592_v9 = vcombine.high %v1469_v62, %v1473_v0  ;;  %v1445_v33 = vld [vmem:[#allocation2 + $0x808] sm:$0xff] }
 0x44f   :  { %5754 = vmatpush1.bf16.msra.mxu0 %v7447_v14  ;;  %v7527_v14 = vcombine.low %v1405_v49, %v1409_v61  ;;  %v1449_v34 = vld [vmem:[#allocation2 + $0x828] sm:$0xff] }
 0x450   :  { %5755 = vmatprep.subr.bf16.mxu0 %v7440_v16  ;;  %v7520_v16 = vcombine.high %v1397_v10, %v1401_v11  ;;  %v1629_v28 = vld [vmem:[#allocation2 + $0xdc8] sm:$0xff] }
 0x451   :  { %5729 = vmatpush2.bf16.msra.mxu1 %v7383_v15  ;;  %v7591_v15 = vcombine.low %v1469_v62, %v1473_v0  ;;  %v1633_v39 = vld [vmem:[#allocation2 + $0xde8] sm:$0xff] }
 0x452   :  { %5730 = vmatprep.subr.bf16.mxu1 %v7376_v17  ;;  %v7584_v17 = vcombine.high %v1461_v12, %v1465_v13  ;;  %v1565_v40 = vld [vmem:[#allocation2 + $0xbc8] sm:$0xff] }
 0x453   :  { %5756 = vmatpush1.bf16.msra.mxu0 %v7439_v22  ;;  %v7519_v22 = vcombine.low %v1397_v10, %v1401_v11  ;;  %v1569_v41 = vld [vmem:[#allocation2 + $0xbe8] sm:$0xff] }
 0x454   :  { %5757 = vmatprep.subr.bf16.mxu0 %v7560_v26  ;;  %v7512_v26 = vcombine.high %v1389_v18, %v1393_v19  ;;  %v7688_v45 = vcombine.high %v1565_v40, %v1569_v41  ;;  %v1621_v46 = vld [vmem:[#allocation2 + $0xd88] sm:$0xff] }
 0x455   :  { %5731 = vmatpush2.bf16.msra.mxu1 %v7375_v23  ;;  %v7583_v23 = vcombine.low %v1461_v12, %v1465_v13  ;;  %v1625_v51 = vld [vmem:[#allocation2 + $0xda8] sm:$0xff] }
 0x456   :  { %5782 = vmatprep.subr.bf16.mxu1 %v7624_v30  ;;  %v7576_v30 = vcombine.high %v1453_v20, %v1457_v21  ;;  %v1557_v52 = vld [vmem:[#allocation2 + $0xb88] sm:$0xff]  ;;  %v7744_v49 = vcombine.high %v1621_v46, %v1625_v51 }
 0x457   :  { %5758 = vmatpush2.bf16.msra.mxu0 %v7559_v35  ;;  %v7511_v35 = vcombine.low %v1389_v18, %v1393_v19  ;;  %v1613_v0 = vld [vmem:[#allocation2 + $0xd48] sm:$0xff] }
 0x458   :  { %5733 = vmatmul.mubr.bf16.vlgmr.msra.gmra.mxu1 %v9096_v47  ;;  %5759 = vmatprep.subr.bf16.mxu0 %v7552_v37  ;;  %v7504_v37 = vcombine.high %v1381_v31, %v1385_v32  ;;  %v1605_v18 = vld [vmem:[#allocation2 + $0xd08] sm:$0xff] }
 0x459   :  { %5783 = vmatpush1.bf16.msra.mxu1 %v7623_v36  ;;  %5814 = vmatprep.mubr.bf16.mxu1 %v9108_v63  ;;  %v7575_v36 = vcombine.low %v1453_v20, %v1457_v21  ;;  %v1609_v19 = vld [vmem:[#allocation2 + $0xd28] sm:$0xff] }
 0x45a   :  { %5784 = vmatprep.subr.bf16.mxu1 %v7616_v38  ;;  %v7568_v38 = vcombine.high %v1445_v33, %v1449_v34  ;;  %v1541_v21 = vld [vmem:[#allocation2 + $0xb08] sm:$0xff] }
 0x45b   :  { %5760 = vmatpush2.bf16.msra.mxu0 %v7551_v42  ;;  %v7503_v42 = vcombine.low %v1381_v31, %v1385_v32 }
 0x45c   :  { %5761 = vmatprep.subr.bf16.mxu0 %v7544_v43  ;;  %v1892_v43 = vld [vmem:[#allocation14] sm:$0xff] }
 0x45d   :  { %5785 = vmatpush1.bf16.msra.mxu1 %v7615_v29  ;;  %v7567_v29 = vcombine.low %v1445_v33, %v1449_v34  ;;  %v1901_v61 = vrot.slane %v1892_v43, %v8878_v27  ;;  %v7728_v33 = vcombine.high %v1605_v18, %v1609_v19 }
 0x45e   :  { %5786 = vmatprep.subr.bf16.mxu1 %v7608_v44  ;;  %v7752_v44 = vcombine.high %v1629_v28, %v1633_v39 }
 0x45f   :  { %5762 = vmatpush2.bf16.msra.mxu0 %v7543_v56  ;;  %v1561_v56 = vld [vmem:[#allocation2 + $0xba8] sm:$0xff] }
 0x460   :  { %5763 = vmatprep.subr.bf16.mxu0 %v7536_v58  ;;  %v7751_v58 = vcombine.low %v1629_v28, %v1633_v39  ;;  %v7680_v62 = vcombine.high %v1557_v52, %v1561_v56  ;;  %v7679_v13 = vcombine.low %v1557_v52, %v1561_v56  ;;  %v1537_v28 = vld [vmem:[#allocation2 + $0xae8] sm:$0xff]  ;;  %v7727_v39 = vcombine.low %v1605_v18, %v1609_v19 }
 0x461   :  { %5787 = vmatpush1.bf16.msra.mxu1 %v7607_v57  ;;  %v1897_v57 = vrot.slane %v1892_v43, %v8875_v25  ;;  %v7743_v25 = vcombine.low %v1621_v46, %v1625_v51  ;;  %v1593_v43 = vld [vmem:[#allocation2 + $0xca8] sm:$0xff] }
 0x462   :  { %5788 = vmatprep.subr.bf16.mxu1 %v7600_v59  ;;  %v7687_v59 = vcombine.low %v1565_v40, %v1569_v41 }
 0x463   :  { %5764 = vmatpush2.bf16.msra.mxu0 %v7535_v2  ;;  %v1617_v2 = vld [vmem:[#allocation2 + $0xd68] sm:$0xff] }
 0x464   :  { %5765 = vmatprep.subr.bf16.mxu0 %v7528_v5  ;;  %v1549_v5 = vld [vmem:[#allocation2 + $0xb48] sm:$0xff] }
 0x465   :  { %5789 = vmatpush1.bf16.msra.mxu1 %v7599_v4 }
 0x466   :  { %5790 = vmatprep.subr.bf16.mxu1 %v7592_v9  ;;  %v1553_v9 = vld [vmem:[#allocation2 + $0xb68] sm:$0xff] }
 0x467   :  { %5766 = vmatpush2.bf16.msra.mxu0 %v7527_v14  ;;  %v7736_v14 = vcombine.high %v1613_v0, %v1617_v2  ;;  %v7671_v32 = vcombine.low %v1549_v5, %v1553_v9 }
 0x468   :  { %5767 = vmatprep.subr.bf16.mxu0 %v7520_v16 }
 0x469   :  { %5791 = vmatpush1.bf16.msra.mxu1 %v7591_v15 }
 0x46a   :  { %5792 = vmatprep.subr.bf16.mxu1 %v7584_v17  ;;  %v7672_v17 = vcombine.high %v1549_v5, %v1553_v9  ;;  %v1577_v5 = vld [vmem:[#allocation2 + $0xc28] sm:$0xff] }
 0x46b   :  { %5768 = vmatpush2.bf16.msra.mxu0 %v7519_v22  ;;  %v1545_v22 = vld [vmem:[#allocation2 + $0xb28] sm:$0xff] }
 0x46c   :  { %5769 = vmatprep.subr.bf16.mxu0 %v7512_v26  ;;  %v7663_v40 = vcombine.low %v1541_v21, %v1545_v22  ;;  %v1509_v9 = vld [vmem:[#allocation2 + $0xa08] sm:$0xff] }
 0x46d   :  { %5793 = vmatpush1.bf16.msra.mxu1 %v7583_v23 }
 0x46e   :  { %5794 = vmatprep.subr.bf16.mxu1 %v7576_v30  ;;  %v7735_v30 = vcombine.low %v1613_v0, %v1617_v2 }
 0x46f   :  { %5770 = vmatpush2.bf16.msra.mxu0 %v7511_v35  ;;  %v7664_v35 = vcombine.high %v1541_v21, %v1545_v22  ;;  %v1685_v22 = vld [vmem:[#allocation2 + $0xf88] sm:$0xff] }
 0x470   :  { %5771 = vmatprep.subr.bf16.mxu0 %v7504_v37  ;;  %v1601_v37 = vld [vmem:[#allocation2 + $0xce8] sm:$0xff] }
 0x471   :  { %5795 = vmatpush1.bf16.msra.mxu1 %v7575_v36  ;;  %v1597_v36 = vld [vmem:[#allocation2 + $0xcc8] sm:$0xff] }
 0x472   :  { %5796 = vmatprep.subr.bf16.mxu1 %v7568_v38  ;;  %v1533_v38 = vld [vmem:[#allocation2 + $0xac8] sm:$0xff]  ;;  %v7720_v41 = vcombine.high %v1597_v36, %v1601_v37  ;;  %v7719_v46 = vcombine.low %v1597_v36, %v1601_v37 }
 0x473   :  { %5772 = vmatpush2.bf16.msra.mxu0 %v7503_v42  ;;  %v7656_v42 = vcombine.high %v1533_v38, %v1537_v28  ;;  %v7655_v51 = vcombine.low %v1533_v38, %v1537_v28  ;;  %v1677_v36 = vld [vmem:[#allocation2 + $0xf48] sm:$0xff] }
 0x474   :  { %5823 = vmatprep.subr.bf16.mxu0 %v7752_v44  ;;  %v1525_v44 = vld [vmem:[#allocation2 + $0xa88] sm:$0xff] }
 0x475   :  { %5797 = vmatpush1.bf16.msra.mxu1 %v7567_v29  ;;  %v1589_v29 = vld [vmem:[#allocation2 + $0xc88] sm:$0xff] }
 0x476   :  { %5798 = vmatprep.subr.bf16.mxu1 %v7688_v45  ;;  %v5488_v4 = vpop.f32.mrf.mxu0  ;;  %5774 = vmatmul.mubr.bf16.vlgmr.msra.gmra.mxu0 %v9101_v54  ;;  %v1529_v45 = vld [vmem:[#allocation2 + $0xaa8] sm:$0xff]  ;;  %v7712_v52 = vcombine.high %v1589_v29, %v1593_v43 }
 0x477   :  { %v5489_v10 = vadd.f32 %v5488_v4, %v1897_v57  ;;  %5824 = vmatpush1.bf16.msra.mxu0 %v7751_v58  ;;  %5855 = vmatprep.mubr.bf16.mxu0 %v9112_v3  ;;  %v7648_v56 = vcombine.high %v1525_v44, %v1529_v45  ;;  %v1581_v57 = vld [vmem:[#allocation2 + $0xc48] sm:$0xff] }
 0x478   :  { %v5529_v11 = vpop.f32.mrf.mxu1  ;;  %v5490_v12 = vpop.f32.mrf.mxu0  ;;  %5825 = vmatprep.subr.bf16.mxu0 %v7744_v49  ;;  %v1585_v58 = vld [vmem:[#allocation2 + $0xc68] sm:$0xff] }
 0x479   :  { %5799 = vmatpush2.bf16.msra.mxu1 %v7687_v59  ;;  %v9140_v27 = vadd.f32 %v5529_v11, %v5489_v10  ;;  %v5491_v15 = vadd.f32 %v5490_v12, %v1901_v61  ;;  %v1517_v59 = vld [vmem:[#allocation2 + $0xa48] sm:$0xff]  ;;  %v7711_v61 = vcombine.low %v1589_v29, %v1593_v43  ;;  %v7704_v0 = vcombine.high %v1581_v57, %v1585_v58 }
 0x47a   :  { %v5531_v16 = vpop.f32.mrf.mxu1  ;;  %5800 = vmatprep.subr.bf16.mxu1 %v7680_v62  ;;  %v5492_v20 = vpop.f32.mrf.mxu0  ;;  %v1521_v49 = vld [vmem:[#allocation2 + $0xa68] sm:$0xff]  ;;  %v7647_v62 = vcombine.low %v1525_v44, %v1529_v45  ;;  %v7703_v11 = vcombine.low %v1581_v57, %v1585_v58 }
 0x47b   :  { %v9142_v23 = vadd.f32 %v5531_v16, %v5491_v15  ;;  %5826 = vmatpush1.bf16.msra.mxu0 %v7743_v25  ;;  %v7640_v2 = vcombine.high %v1517_v59, %v1521_v49  ;;  %v1573_v4 = vld [vmem:[#allocation2 + $0xc08] sm:$0xff]  ;;  %v7639_v25 = vcombine.low %v1517_v59, %v1521_v49 }
 0x47c   :  { %v5533_v26 = vpop.f32.mrf.mxu1  ;;  %v5493_v31 = vpop.f32.mrf.mxu0  ;;  %5827 = vmatprep.subr.bf16.mxu0 %v7736_v14  ;;  %v1513_v10 = vld [vmem:[#allocation2 + $0xa28] sm:$0xff]  ;;  %v7696_v12 = vcombine.high %v1573_v4, %v1577_v5  ;;  %v7695_v18 = vcombine.low %v1573_v4, %v1577_v5 }
 0x47d   :  { %5801 = vmatpush2.bf16.msra.mxu1 %v7679_v13  ;;  %v7632_v13 = vcombine.high %v1509_v9, %v1513_v10  ;;  %v1693_v14 = vld [vmem:[#allocation2 + $0xfc8] sm:$0xff]  ;;  %v7631_v19 = vcombine.low %v1509_v9, %v1513_v10 }
 0x47e   :  { %v5534_v34 = vpop.f32.mrf.mxu1  ;;  %5802 = vmatprep.subr.bf16.mxu1 %v7672_v17  ;;  %v1697_v15 = vld [vmem:[#allocation2 + $0xfe8] sm:$0xff] }
 0x47f   :  { %5828 = vmatpush1.bf16.msra.mxu0 %v7735_v30  ;;  %v1757_v16 = vld [vmem:[#allocation2 + $0x11c8] sm:$0xff]  ;;  %v7816_v20 = vcombine.high %v1693_v14, %v1697_v15 }
 0x480   :  { %5829 = vmatprep.subr.bf16.mxu0 %v7728_v33  ;;  %v1761_v17 = vld [vmem:[#allocation2 + $0x11e8] sm:$0xff] }
 0x481   :  { %5803 = vmatpush2.bf16.msra.mxu1 %v7671_v32  ;;  %v7880_v21 = vcombine.high %v1757_v16, %v1761_v17  ;;  %v1689_v26 = vld [vmem:[#allocation2 + $0xfa8] sm:$0xff]  ;;  %v7815_v32 = vcombine.low %v1693_v14, %v1697_v15  ;;  %v7879_v33 = vcombine.low %v1757_v16, %v1761_v17 }
 0x482   :  { %5804 = vmatprep.subr.bf16.mxu1 %v7664_v35  ;;  %v1749_v30 = vld [vmem:[#allocation2 + $0x1188] sm:$0xff]  ;;  %v7808_v34 = vcombine.high %v1685_v22, %v1689_v26 }
 0x483   :  { %5830 = vmatpush1.bf16.msra.mxu0 %v7727_v39  ;;  %v1753_v31 = vld [vmem:[#allocation2 + $0x11a8] sm:$0xff]  ;;  %v7807_v39 = vcombine.low %v1685_v22, %v1689_v26 }
 0x484   :  { %5831 = vmatprep.subr.bf16.mxu0 %v7720_v41  ;;  %v7872_v35 = vcombine.high %v1749_v30, %v1753_v31  ;;  %v1681_v37 = vld [vmem:[#allocation2 + $0xf68] sm:$0xff] }
 0x485   :  { %5805 = vmatpush2.bf16.msra.mxu1 %v7663_v40  ;;  %v1741_v38 = vld [vmem:[#allocation2 + $0x1148] sm:$0xff]  ;;  %v7871_v40 = vcombine.low %v1749_v30, %v1753_v31  ;;  %v7800_v41 = vcombine.high %v1677_v36, %v1681_v37 }
 0x486   :  { %5806 = vmatprep.subr.bf16.mxu1 %v7656_v42  ;;  %v1745_v28 = vld [vmem:[#allocation2 + $0x1168] sm:$0xff] }
 0x487   :  { %5832 = vmatpush1.bf16.msra.mxu0 %v7719_v46  ;;  %v7864_v42 = vcombine.high %v1741_v38, %v1745_v28  ;;  %v1669_v29 = vld [vmem:[#allocation2 + $0xf08] sm:$0xff]  ;;  %v7799_v46 = vcombine.low %v1677_v36, %v1681_v37 }
 0x488   :  { %5833 = vmatprep.subr.bf16.mxu0 %v7712_v52  ;;  %v1673_v43 = vld [vmem:[#allocation2 + $0xf28] sm:$0xff] }
 0x489   :  { %5807 = vmatpush2.bf16.msra.mxu1 %v7655_v51  ;;  %v1733_v44 = vld [vmem:[#allocation2 + $0x1108] sm:$0xff]  ;;  %v7863_v51 = vcombine.low %v1741_v38, %v1745_v28  ;;  %v7792_v52 = vcombine.high %v1669_v29, %v1673_v43 }
 0x48a   :  { %5808 = vmatprep.subr.bf16.mxu1 %v7648_v56  ;;  %v1737_v45 = vld [vmem:[#allocation2 + $0x1128] sm:$0xff] }
 0x48b   :  { %5834 = vmatpush1.bf16.msra.mxu0 %v7711_v61  ;;  %v7856_v56 = vcombine.high %v1733_v44, %v1737_v45  ;;  %v1661_v57 = vld [vmem:[#allocation2 + $0xec8] sm:$0xff]  ;;  %v7791_v61 = vcombine.low %v1669_v29, %v1673_v43 }
 0x48c   :  { %5835 = vmatprep.subr.bf16.mxu0 %v7704_v0  ;;  %v1665_v58 = vld [vmem:[#allocation2 + $0xee8] sm:$0xff] }
 0x48d   :  { %5809 = vmatpush2.bf16.msra.mxu1 %v7647_v62  ;;  %v1725_v59 = vld [vmem:[#allocation2 + $0x10c8] sm:$0xff]  ;;  %v7855_v62 = vcombine.low %v1733_v44, %v1737_v45  ;;  %v7784_v0 = vcombine.high %v1661_v57, %v1665_v58 }
 0x48e   :  { %5810 = vmatprep.subr.bf16.mxu1 %v7640_v2  ;;  %v1729_v49 = vld [vmem:[#allocation2 + $0x10e8] sm:$0xff] }
 0x48f   :  { %5836 = vmatpush1.bf16.msra.mxu0 %v7703_v11  ;;  %v7848_v2 = vcombine.high %v1725_v59, %v1729_v49  ;;  %v1653_v4 = vld [vmem:[#allocation2 + $0xe88] sm:$0xff]  ;;  %v7783_v11 = vcombine.low %v1661_v57, %v1665_v58 }
 0x490   :  { %5837 = vmatprep.subr.bf16.mxu0 %v7696_v12  ;;  %v1657_v5 = vld [vmem:[#allocation2 + $0xea8] sm:$0xff] }
 0x491   :  { %5811 = vmatpush2.bf16.msra.mxu1 %v7639_v25  ;;  %v1717_v9 = vld [vmem:[#allocation2 + $0x1088] sm:$0xff]  ;;  %v7847_v25 = vcombine.low %v1725_v59, %v1729_v49  ;;  %v7776_v12 = vcombine.high %v1653_v4, %v1657_v5 }
 0x492   :  { %5812 = vmatprep.subr.bf16.mxu1 %v7632_v13  ;;  %v1721_v10 = vld [vmem:[#allocation2 + $0x10a8] sm:$0xff] }
 0x493   :  { %5838 = vmatpush1.bf16.msra.mxu0 %v7695_v18  ;;  %v7840_v13 = vcombine.high %v1717_v9, %v1721_v10  ;;  %v1645_v14 = vld [vmem:[#allocation2 + $0xe48] sm:$0xff]  ;;  %v7775_v18 = vcombine.low %v1653_v4, %v1657_v5 }
 0x494   :  { %5839 = vmatprep.subr.bf16.mxu0 %v7816_v20  ;;  %v1649_v15 = vld [vmem:[#allocation2 + $0xe68] sm:$0xff] }
 0x495   :  { %5813 = vmatpush2.bf16.msra.mxu1 %v7631_v19  ;;  %v1709_v16 = vld [vmem:[#allocation2 + $0x1048] sm:$0xff]  ;;  %v7839_v19 = vcombine.low %v1717_v9, %v1721_v10  ;;  %v7768_v20 = vcombine.high %v1645_v14, %v1649_v15 }
 0x496   :  { %5864 = vmatprep.subr.bf16.mxu1 %v7880_v21  ;;  %v1713_v17 = vld [vmem:[#allocation2 + $0x1068] sm:$0xff] }
 0x497   :  { %5840 = vmatpush2.bf16.msra.mxu0 %v7815_v32  ;;  %v7832_v21 = vcombine.high %v1709_v16, %v1713_v17  ;;  %v1637_v22 = vld [vmem:[#allocation2 + $0xe08] sm:$0xff]  ;;  %v7767_v32 = vcombine.low %v1645_v14, %v1649_v15 }
 0x498   :  { %5815 = vmatmul.mubr.bf16.vlgmr.msra.gmra.mxu1 %v9106_v60  ;;  %5841 = vmatprep.subr.bf16.mxu0 %v7808_v34  ;;  %v1641_v26 = vld [vmem:[#allocation2 + $0xe28] sm:$0xff] }
 0x499   :  { %5865 = vmatpush1.bf16.msra.mxu1 %v7879_v33  ;;  %5896 = vmatprep.mubr.bf16.mxu1 %v9118_v8  ;;  %v1701_v30 = vld [vmem:[#allocation2 + $0x1008] sm:$0xff]  ;;  %v7831_v33 = vcombine.low %v1709_v16, %v1713_v17  ;;  %v7760_v34 = vcombine.high %v1637_v22, %v1641_v26 }
 0x49a   :  { %5866 = vmatprep.subr.bf16.mxu1 %v7872_v35  ;;  %v1705_v31 = vld [vmem:[#allocation2 + $0x1028] sm:$0xff] }
 0x49b   :  { %5842 = vmatpush2.bf16.msra.mxu0 %v7807_v39  ;;  %v7824_v35 = vcombine.high %v1701_v30, %v1705_v31  ;;  %v1885_v36 = vld [vmem:[#allocation2 + $0x15c8] sm:$0xff]  ;;  %v7759_v39 = vcombine.low %v1637_v22, %v1641_v26 }
 0x49c   :  { %5843 = vmatprep.subr.bf16.mxu0 %v7800_v41  ;;  %v1889_v37 = vld [vmem:[#allocation2 + $0x15e8] sm:$0xff] }
 0x49d   :  { %5867 = vmatpush1.bf16.msra.mxu1 %v7871_v40  ;;  %v1821_v38 = vld [vmem:[#allocation2 + $0x13c8] sm:$0xff]  ;;  %v7823_v40 = vcombine.low %v1701_v30, %v1705_v31  ;;  %v8008_v41 = vcombine.high %v1885_v36, %v1889_v37 }
 0x49e   :  { %5868 = vmatprep.subr.bf16.mxu1 %v7864_v42  ;;  %v1825_v28 = vld [vmem:[#allocation2 + $0x13e8] sm:$0xff] }
 0x49f   :  { %5844 = vmatpush2.bf16.msra.mxu0 %v7799_v46  ;;  %v7944_v42 = vcombine.high %v1821_v38, %v1825_v28  ;;  %v1877_v29 = vld [vmem:[#allocation2 + $0x1588] sm:$0xff]  ;;  %v8007_v46 = vcombine.low %v1885_v36, %v1889_v37 }
 0x4a0   :  { %5845 = vmatprep.subr.bf16.mxu0 %v7792_v52  ;;  %v1881_v43 = vld [vmem:[#allocation2 + $0x15a8] sm:$0xff] }
 0x4a1   :  { %5869 = vmatpush1.bf16.msra.mxu1 %v7863_v51  ;;  %v1813_v44 = vld [vmem:[#allocation2 + $0x1388] sm:$0xff]  ;;  %v7943_v51 = vcombine.low %v1821_v38, %v1825_v28  ;;  %v8000_v52 = vcombine.high %v1877_v29, %v1881_v43 }
 0x4a2   :  { %5870 = vmatprep.subr.bf16.mxu1 %v7856_v56  ;;  %v1817_v45 = vld [vmem:[#allocation2 + $0x13a8] sm:$0xff] }
 0x4a3   :  { %5846 = vmatpush2.bf16.msra.mxu0 %v7791_v61  ;;  %v7936_v56 = vcombine.high %v1813_v44, %v1817_v45  ;;  %v1869_v57 = vld [vmem:[#allocation2 + $0x1548] sm:$0xff]  ;;  %v7935_v5 = vcombine.low %v1813_v44, %v1817_v45 }
 0x4a4   :  { %5847 = vmatprep.subr.bf16.mxu0 %v7784_v0  ;;  %v1873_v58 = vld [vmem:[#allocation2 + $0x1568] sm:$0xff] }
 0x4a5   :  { %5871 = vmatpush1.bf16.msra.mxu1 %v7855_v62  ;;  %v1805_v49 = vld [vmem:[#allocation2 + $0x1348] sm:$0xff]  ;;  %v7992_v9 = vcombine.high %v1869_v57, %v1873_v58 }
 0x4a6   :  { %5872 = vmatprep.subr.bf16.mxu1 %v7848_v2  ;;  %v1809_v61 = vld [vmem:[#allocation2 + $0x1368] sm:$0xff]  ;;  %v7999_v2 = vcombine.low %v1877_v29, %v1881_v43 }
 0x4a7   :  { %5848 = vmatpush2.bf16.msra.mxu0 %v7783_v11  ;;  %v1865_v14 = vld [vmem:[#allocation2 + $0x1528] sm:$0xff] }
 0x4a8   :  { %5849 = vmatprep.subr.bf16.mxu0 %v7776_v12  ;;  %v7928_v12 = vcombine.high %v1805_v49, %v1809_v61  ;;  %v1797_v15 = vld [vmem:[#allocation2 + $0x1308] sm:$0xff] }
 0x4a9   :  { %5873 = vmatpush1.bf16.msra.mxu1 %v7847_v25  ;;  %v1801_v16 = vld [vmem:[#allocation2 + $0x1328] sm:$0xff] }
 0x4aa   :  { %5874 = vmatprep.subr.bf16.mxu1 %v7840_v13  ;;  %v1861_v13 = vld [vmem:[#allocation2 + $0x1508] sm:$0xff] }
 0x4ab   :  { %5850 = vmatpush2.bf16.msra.mxu0 %v7775_v18  ;;  %v7984_v22 = vcombine.high %v1861_v13, %v1865_v14  ;;  %v1853_v30 = vld [vmem:[#allocation2 + $0x14c8] sm:$0xff] }
 0x4ac   :  { %5851 = vmatprep.subr.bf16.mxu0 %v7768_v20  ;;  %v1857_v31 = vld [vmem:[#allocation2 + $0x14e8] sm:$0xff] }
 0x4ad   :  { %5875 = vmatpush1.bf16.msra.mxu1 %v7839_v19  ;;  %v7991_v19 = vcombine.low %v1869_v57, %v1873_v58  ;;  %v7976_v36 = vcombine.high %v1853_v30, %v1857_v31  ;;  %v1845_v38 = vld [vmem:[#allocation2 + $0x1488] sm:$0xff] }
 0x4ae   :  { %5876 = vmatprep.subr.bf16.mxu1 %v7832_v21  ;;  %v7927_v21 = vcombine.low %v1805_v49, %v1809_v61  ;;  %v1849_v28 = vld [vmem:[#allocation2 + $0x14a8] sm:$0xff] }
 0x4af   :  { %5852 = vmatpush2.bf16.msra.mxu0 %v7767_v32  ;;  %v1789_v32 = vld [vmem:[#allocation2 + $0x12c8] sm:$0xff]  ;;  %v7968_v29 = vcombine.high %v1845_v38, %v1849_v28 }
 0x4b0   :  { %5853 = vmatprep.subr.bf16.mxu0 %v7760_v34  ;;  %v7983_v34 = vcombine.low %v1861_v13, %v1865_v14  ;;  %v1837_v44 = vld [vmem:[#allocation2 + $0x1448] sm:$0xff] }
 0x4b1   :  { %5877 = vmatpush1.bf16.msra.mxu1 %v7831_v33  ;;  %v1793_v33 = vld [vmem:[#allocation2 + $0x12e8] sm:$0xff] }
 0x4b2   :  { %5878 = vmatprep.subr.bf16.mxu1 %v7824_v35  ;;  %v7919_v35 = vcombine.low %v1797_v15, %v1801_v16  ;;  %v7912_v37 = vcombine.high %v1789_v32, %v1793_v33  ;;  %v1841_v45 = vld [vmem:[#allocation2 + $0x1468] sm:$0xff] }
 0x4b3   :  { %5854 = vmatpush2.bf16.msra.mxu0 %v7759_v39  ;;  %v1781_v39 = vld [vmem:[#allocation2 + $0x1288] sm:$0xff]  ;;  %v7960_v57 = vcombine.high %v1837_v44, %v1841_v45 }
 0x4b4   :  { %5905 = vmatprep.subr.bf16.mxu0 %v8008_v41  ;;  %v7975_v41 = vcombine.low %v1853_v30, %v1857_v31  ;;  %v1833_v49 = vld [vmem:[#allocation2 + $0x1428] sm:$0xff]  ;;  %v1230_v30 = vld [vmem:[#allocation2 + $0x150] sm:$0xff] }
 0x4b5   :  { %5879 = vmatpush1.bf16.msra.mxu1 %v7823_v40  ;;  %v1785_v40 = vld [vmem:[#allocation2 + $0x12a8] sm:$0xff]  ;;  %v1234_v31 = vld [vmem:[#allocation2 + $0x170] sm:$0xff] }
 0x4b6   :  { %5880 = vmatprep.subr.bf16.mxu1 %v7944_v42  ;;  %v5570_v59 = vpop.f32.mrf.mxu0  ;;  %5856 = vmatmul.mubr.bf16.vlgmr.msra.gmra.mxu0 %v9110_v50  ;;  %v7911_v42 = vcombine.low %v1789_v32, %v1793_v33  ;;  %v7904_v43 = vcombine.high %v1781_v39, %v1785_v40  ;;  %v1765_v61 = vld [vmem:[#allocation2 + $0x1208] sm:$0xff]  ;;  %v1358_v32 = vld [vmem:[#allocation2 + $0x550] sm:$0xff] }
 0x4b7   :  { %v5571_v62 = vadd.f32 %v5570_v59, %v9140_v27  ;;  %5906 = vmatpush1.bf16.msra.mxu0 %v8007_v46  ;;  %5937 = vmatprep.mubr.bf16.mxu0 %v8493_v48  ;;  %v1773_v46 = vld [vmem:[#allocation2 + $0x1248] sm:$0xff]  ;;  %v1362_v33 = vld [vmem:[#allocation2 + $0x570] sm:$0xff] }
 0x4b8   :  { %v5611_v0 = vpop.f32.mrf.mxu1  ;;  %v5572_v4 = vpop.f32.mrf.mxu0  ;;  %5907 = vmatprep.subr.bf16.mxu0 %v8000_v52  ;;  %v7967_v52 = vcombine.low %v1845_v38, %v1849_v28  ;;  %v1829_v59 = vld [vmem:[#allocation2 + $0x1408] sm:$0xff]  ;;  %v7482_v28 = vcombine.high %v1358_v32, %v1362_v33 }
 0x4b9   :  { %5881 = vmatpush2.bf16.msra.mxu1 %v7943_v51  ;;  %v9149_v10 = vadd.f32 %v5611_v0, %v5571_v62  ;;  %v5573_v11 = vadd.f32 %v5572_v4, %v9142_v23  ;;  %v7920_v23 = vcombine.high %v1797_v15, %v1801_v16  ;;  %v1777_v51 = vld [vmem:[#allocation2 + $0x1268] sm:$0xff]  ;;  %v7959_v0 = vcombine.low %v1837_v44, %v1841_v45  ;;  %v1238_v16 = vld [vmem:[#allocation2 + $0x190] sm:$0xff] }
 0x4ba   :  { %v5613_v25 = vpop.f32.mrf.mxu1  ;;  %5882 = vmatprep.subr.bf16.mxu1 %v7936_v56  ;;  %v5574_v27 = vpop.f32.mrf.mxu0  ;;  %v7903_v56 = vcombine.low %v1781_v39, %v1785_v40  ;;  %v7896_v58 = vcombine.high %v1773_v46, %v1777_v51  ;;  %v1769_v62 = vld [vmem:[#allocation2 + $0x1228] sm:$0xff]  ;;  %v7952_v4 = vcombine.high %v1829_v59, %v1833_v49  ;;  %v7951_v13 = vcombine.low %v1829_v59, %v1833_v49  ;;  %v1222_v39 = vld [vmem:[#allocation2 + $0x110] sm:$0xff] }
 0x4bb   :  { %v9152_v17 = vadd.f32 %v5613_v25, %v5573_v11  ;;  %5908 = vmatpush1.bf16.msra.mxu0 %v7999_v2  ;;  %v7895_v2 = vcombine.low %v1773_v46, %v1777_v51  ;;  %v1250_v11 = vld [vmem:[#allocation2 + $0x1f0] sm:$0xff]  ;;  %v7887_v14 = vcombine.low %v1765_v61, %v1769_v62  ;;  %v7481_v44 = vcombine.low %v1358_v32, %v1362_v33 }
 0x4bc   :  { %v5615_v18 = vpop.f32.mrf.mxu1  ;;  %v5575_v20 = vpop.f32.mrf.mxu0  ;;  %5909 = vmatprep.subr.bf16.mxu0 %v7992_v9  ;;  %v1246_v9 = vld [vmem:[#allocation2 + $0x1d0] sm:$0xff] }
 0x4bd   :  { %5883 = vmatpush2.bf16.msra.mxu1 %v7935_v5  ;;  %v7888_v5 = vcombine.high %v1765_v61, %v1769_v62  ;;  %v1374_v25 = vld [vmem:[#allocation2 + $0x5d0] sm:$0xff]  ;;  %v7370_v27 = vcombine.high %v1246_v9, %v1250_v11 }
 0x4be   :  { %v5616_v26 = vpop.f32.mrf.mxu1  ;;  %5884 = vmatprep.subr.bf16.mxu1 %v7928_v12  ;;  %v1378_v12 = vld [vmem:[#allocation2 + $0x5f0] sm:$0xff] }
 0x4bf   :  { %5910 = vmatpush1.bf16.msra.mxu0 %v7991_v19  ;;  %v7498_v15 = vcombine.high %v1374_v25, %v1378_v12  ;;  %v1242_v18 = vld [vmem:[#allocation2 + $0x1b0] sm:$0xff] }
 0x4c0   :  { %5911 = vmatprep.subr.bf16.mxu0 %v7984_v22  ;;  %v1366_v19 = vld [vmem:[#allocation2 + $0x590] sm:$0xff]  ;;  %v7497_v22 = vcombine.low %v1374_v25, %v1378_v12  ;;  %v7362_v26 = vcombine.high %v1238_v16, %v1242_v18 }
 0x4c1   :  { %5885 = vmatpush2.bf16.msra.mxu1 %v7927_v21  ;;  %v1370_v20 = vld [vmem:[#allocation2 + $0x5b0] sm:$0xff]  ;;  %v7369_v21 = vcombine.low %v1246_v9, %v1250_v11 }
 0x4c2   :  { %5886 = vmatprep.subr.bf16.mxu1 %v7920_v23  ;;  %v7490_v23 = vcombine.high %v1366_v19, %v1370_v20  ;;  %v1226_v40 = vld [vmem:[#allocation2 + $0x130] sm:$0xff] }
 0x4c3   :  { %5912 = vmatpush1.bf16.msra.mxu0 %v7983_v34  ;;  %v7346_v45 = vcombine.high %v1222_v39, %v1226_v40  ;;  %v7345_v59 = vcombine.low %v1222_v39, %v1226_v40 }
 0x4c4   :  { %5913 = vmatprep.subr.bf16.mxu0 %v7976_v36  ;;  %v7489_v36 = vcombine.low %v1366_v19, %v1370_v20 }
 0x4c5   :  { %5887 = vmatpush2.bf16.msra.mxu1 %v7919_v35  ;;  %v7361_v35 = vcombine.low %v1238_v16, %v1242_v18 }
 0x4c6   :  { %5888 = vmatprep.subr.bf16.mxu1 %v7912_v37  ;;  %v7354_v37 = vcombine.high %v1230_v30, %v1234_v31 }
 0x4c7   :  { %5914 = vmatpush1.bf16.msra.mxu0 %v7975_v41  ;;  %v1350_v41 = vld [vmem:[#allocation2 + $0x510] sm:$0xff] }
 0x4c8   :  { %5915 = vmatprep.subr.bf16.mxu0 %v7968_v29 }
 0x4c9   :  { %5889 = vmatpush2.bf16.msra.mxu1 %v7911_v42  ;;  %v1354_v42 = vld [vmem:[#allocation2 + $0x530] sm:$0xff] }
 0x4ca   :  { %5890 = vmatprep.subr.bf16.mxu1 %v7904_v43  ;;  %v7353_v43 = vcombine.low %v1230_v30, %v1234_v31  ;;  %v7474_v51 = vcombine.high %v1350_v41, %v1354_v42  ;;  %v7473_v49 = vcombine.low %v1350_v41, %v1354_v42 }
 0x4cb   :  { %5916 = vmatpush1.bf16.msra.mxu0 %v7967_v52  ;;  %v1214_v52 = vld [vmem:[#allocation2 + $0xd0] sm:$0xff] }
 0x4cc   :  { %5917 = vmatprep.subr.bf16.mxu0 %v7960_v57  ;;  %v1342_v57 = vld [vmem:[#allocation2 + $0x4d0] sm:$0xff] }
 0x4cd   :  { %5891 = vmatpush2.bf16.msra.mxu1 %v7903_v56  ;;  %v1218_v56 = vld [vmem:[#allocation2 + $0xf0] sm:$0xff] }
 0x4ce   :  { %5892 = vmatprep.subr.bf16.mxu1 %v7896_v58  ;;  %v1346_v58 = vld [vmem:[#allocation2 + $0x4f0] sm:$0xff]  ;;  %v7338_v61 = vcombine.high %v1214_v52, %v1218_v56  ;;  %v7337_v9 = vcombine.low %v1214_v52, %v1218_v56 }
 0x4cf   :  { %5918 = vmatpush1.bf16.msra.mxu0 %v7959_v0  ;;  %v7466_v62 = vcombine.high %v1342_v57, %v1346_v58  ;;  %v1206_v0 = vld [vmem:[#allocation2 + $0x90] sm:$0xff]  ;;  %v7465_v11 = vcombine.low %v1342_v57, %v1346_v58 }
 0x4d0   :  { %5919 = vmatprep.subr.bf16.mxu0 %v7952_v4  ;;  %v1334_v4 = vld [vmem:[#allocation2 + $0x490] sm:$0xff] }
 0x4d1   :  { %5893 = vmatpush2.bf16.msra.mxu1 %v7895_v2  ;;  %v1210_v2 = vld [vmem:[#allocation2 + $0xb0] sm:$0xff] }
 0x4d2   :  { %5894 = vmatprep.subr.bf16.mxu1 %v7888_v5  ;;  %v1338_v5 = vld [vmem:[#allocation2 + $0x4b0] sm:$0xff]  ;;  %v7330_v25 = vcombine.high %v1206_v0, %v1210_v2  ;;  %v7329_v16 = vcombine.low %v1206_v0, %v1210_v2 }
 0x4d3   :  { %5920 = vmatpush1.bf16.msra.mxu0 %v7951_v13  ;;  %v7458_v12 = vcombine.high %v1334_v4, %v1338_v5  ;;  %v1198_v13 = vld [vmem:[#allocation2 + $0x50] sm:$0xff]  ;;  %v7457_v18 = vcombine.low %v1334_v4, %v1338_v5 }
 0x4d4   :  { %5946 = vmatprep.subr.bf16.mxu0 %v7370_v27  ;;  %v1326_v27 = vld [vmem:[#allocation2 + $0x450] sm:$0xff] }
 0x4d5   :  { %5895 = vmatpush2.bf16.msra.mxu1 %v7887_v14  ;;  %v1202_v14 = vld [vmem:[#allocation2 + $0x70] sm:$0xff] }
 0x4d6   :  { %5987 = vmatprep.subr.bf16.mxu1 %v7498_v15  ;;  %5938 = vmatmul.mubr.bf16.vlgmr.msra.gmra.mxu0 %v9116_v7  ;;  %v1330_v15 = vld [vmem:[#allocation2 + $0x470] sm:$0xff]  ;;  %v7322_v19 = vcombine.high %v1198_v13, %v1202_v14  ;;  %v7321_v30 = vcombine.low %v1198_v13, %v1202_v14 }
 0x4d7   :  { %5947 = vmatpush1.bf16.msra.mxu0 %v7369_v21  ;;  %5978 = vmatprep.mubr.bf16.mxu0 %v9099_v53  ;;  %v7450_v20 = vcombine.high %v1326_v27, %v1330_v15  ;;  %v1190_v21 = vld [vmem:[#allocation2 + $0x10] sm:$0xff]  ;;  %v7449_v31 = vcombine.low %v1326_v27, %v1330_v15 }
 0x4d8   :  { %v9155_v34 = vpop.f32.mrf.mxu1  ;;  %5897 = vmatmul.mubr.bf16.vlgmr.msra.gmra.mxu1 %v9114_v6  ;;  %5948 = vmatprep.subr.bf16.mxu0 %v7362_v26  ;;  %v1318_v26 = vld [vmem:[#allocation2 + $0x410] sm:$0xff] }
 0x4d9   :  { %5988 = vmatpush1.bf16.msra.mxu1 %v7497_v22  ;;  %6019 = vmatprep.mubr.bf16.mxu1 %v9104_v55  ;;  %v1194_v22 = vld [vmem:[#allocation2 + $0x30] sm:$0xff] }
 0x4da   :  { %v9158_v38 = vpop.f32.mrf.mxu1  ;;  %5989 = vmatprep.subr.bf16.mxu1 %v7490_v23  ;;  %v1322_v23 = vld [vmem:[#allocation2 + $0x430] sm:$0xff]  ;;  %v7314_v32 = vcombine.high %v1190_v21, %v1194_v22  ;;  %v7313_v39 = vcombine.low %v1190_v21, %v1194_v22 }
 0x4db   :  { %5949 = vmatpush1.bf16.msra.mxu0 %v7361_v35  ;;  %v7442_v33 = vcombine.high %v1318_v26, %v1322_v23  ;;  %v1310_v35 = vld [vmem:[#allocation2 + $0x3d0] sm:$0xff]  ;;  %v7441_v40 = vcombine.low %v1318_v26, %v1322_v23 }
 0x4dc   :  { %v5697_v29 = vpop.f32.mrf.mxu1  ;;  %5950 = vmatprep.subr.bf16.mxu0 %v7354_v37  ;;  %v1438_v37 = vld [vmem:[#allocation2 + $0x7d0] sm:$0xff] }
 0x4dd   :  { %5990 = vmatpush1.bf16.msra.mxu1 %v7489_v36  ;;  %v1314_v36 = vld [vmem:[#allocation2 + $0x3f0] sm:$0xff] }
 0x4de   :  { %v5698_v46 = vpop.f32.mrf.mxu1  ;;  %5991 = vmatprep.subr.bf16.mxu1 %v7482_v28  ;;  %v1442_v28 = vld [vmem:[#allocation2 + $0x7f0] sm:$0xff]  ;;  %v7434_v41 = vcombine.high %v1310_v35, %v1314_v36 }
 0x4df   :  { %5951 = vmatpush1.bf16.msra.mxu0 %v7353_v43  ;;  %v7562_v42 = vcombine.high %v1438_v37, %v1442_v28  ;;  %v1302_v29 = vld [vmem:[#allocation2 + $0x390] sm:$0xff]  ;;  %v7433_v46 = vcombine.low %v1310_v35, %v1314_v36 }
 0x4e0   :  { %5952 = vmatprep.subr.bf16.mxu0 %v7346_v45  ;;  %v1306_v43 = vld [vmem:[#allocation2 + $0x3b0] sm:$0xff] }
 0x4e1   :  { %5992 = vmatpush1.bf16.msra.mxu1 %v7481_v44  ;;  %v1430_v44 = vld [vmem:[#allocation2 + $0x790] sm:$0xff]  ;;  %v7426_v52 = vcombine.high %v1302_v29, %v1306_v43  ;;  %v7425_v0 = vcombine.low %v1302_v29, %v1306_v43 }
 0x4e2   :  { %5993 = vmatprep.subr.bf16.mxu1 %v7474_v51  ;;  %v1434_v45 = vld [vmem:[#allocation2 + $0x7b0] sm:$0xff]  ;;  %v7561_v51 = vcombine.low %v1438_v37, %v1442_v28 }
 0x4e3   :  { %5953 = vmatpush1.bf16.msra.mxu0 %v7345_v59  ;;  %v7554_v56 = vcombine.high %v1430_v44, %v1434_v45  ;;  %v1294_v57 = vld [vmem:[#allocation2 + $0x350] sm:$0xff]  ;;  %v7553_v4 = vcombine.low %v1430_v44, %v1434_v45 }
 0x4e4   :  { %5954 = vmatprep.subr.bf16.mxu0 %v7338_v61  ;;  %v1298_v58 = vld [vmem:[#allocation2 + $0x370] sm:$0xff] }
 0x4e5   :  { %5994 = vmatpush1.bf16.msra.mxu1 %v7473_v49  ;;  %v1422_v49 = vld [vmem:[#allocation2 + $0x750] sm:$0xff]  ;;  %v7418_v5 = vcombine.high %v1294_v57, %v1298_v58 }
 0x4e6   :  { %5995 = vmatprep.subr.bf16.mxu1 %v7466_v62  ;;  %v1426_v61 = vld [vmem:[#allocation2 + $0x770] sm:$0xff] }
 0x4e7   :  { %5955 = vmatpush1.bf16.msra.mxu0 %v7337_v9  ;;  %v1290_v13 = vld [vmem:[#allocation2 + $0x330] sm:$0xff] }
 0x4e8   :  { %5956 = vmatprep.subr.bf16.mxu0 %v7330_v25  ;;  %v7546_v25 = vcombine.high %v1422_v49, %v1426_v61  ;;  %v1414_v27 = vld [vmem:[#allocation2 + $0x710] sm:$0xff] }
 0x4e9   :  { %5996 = vmatpush1.bf16.msra.mxu1 %v7465_v11  ;;  %v1418_v15 = vld [vmem:[#allocation2 + $0x730] sm:$0xff] }
 0x4ea   :  { %5997 = vmatprep.subr.bf16.mxu1 %v7458_v12  ;;  %v1286_v12 = vld [vmem:[#allocation2 + $0x310] sm:$0xff] }
 0x4eb   :  { %5957 = vmatpush1.bf16.msra.mxu0 %v7329_v16  ;;  %v7417_v16 = vcombine.low %v1294_v57, %v1298_v58  ;;  %v1282_v21 = vld [vmem:[#allocation2 + $0x2f0] sm:$0xff]  ;;  %v7409_v23 = vcombine.low %v1286_v12, %v1290_v13 }
 0x4ec   :  { %5958 = vmatprep.subr.bf16.mxu0 %v7322_v19  ;;  %v7545_v19 = vcombine.low %v1422_v49, %v1426_v61  ;;  %v1406_v22 = vld [vmem:[#allocation2 + $0x6d0] sm:$0xff] }
 0x4ed   :  { %5998 = vmatpush1.bf16.msra.mxu1 %v7457_v18  ;;  %v1410_v26 = vld [vmem:[#allocation2 + $0x6f0] sm:$0xff] }
 0x4ee   :  { %5999 = vmatprep.subr.bf16.mxu1 %v7450_v20  ;;  %v7538_v20 = vcombine.high %v1414_v27, %v1418_v15  ;;  %v1398_v35 = vld [vmem:[#allocation2 + $0x690] sm:$0xff]  ;;  %v7529_v28 = vcombine.low %v1406_v22, %v1410_v26 }
 0x4ef   :  { %5959 = vmatpush1.bf16.msra.mxu0 %v7321_v30  ;;  %v7537_v30 = vcombine.low %v1414_v27, %v1418_v15  ;;  %v1402_v36 = vld [vmem:[#allocation2 + $0x6b0] sm:$0xff] }
 0x4f0   :  { %5960 = vmatprep.subr.bf16.mxu0 %v7314_v32  ;;  %v1270_v32 = vld [vmem:[#allocation2 + $0x290] sm:$0xff]  ;;  %v7521_v45 = vcombine.low %v1398_v35, %v1402_v36 }
 0x4f1   :  { %6000 = vmatpush1.bf16.msra.mxu1 %v7449_v31  ;;  %v7530_v31 = vcombine.high %v1406_v22, %v1410_v26  ;;  %v1390_v29 = vld [vmem:[#allocation2 + $0x650] sm:$0xff] }
 0x4f2   :  { %6001 = vmatprep.subr.bf16.mxu1 %v7442_v33  ;;  %v1274_v33 = vld [vmem:[#allocation2 + $0x2b0] sm:$0xff] }
 0x4f3   :  { %5961 = vmatpush1.bf16.msra.mxu0 %v7313_v39  ;;  %v7394_v39 = vcombine.high %v1270_v32, %v1274_v33  ;;  %v1394_v43 = vld [vmem:[#allocation2 + $0x670] sm:$0xff]  ;;  %v7393_v44 = vcombine.low %v1270_v32, %v1274_v33 }
 0x4f4   :  { %5962 = vmatprep.subr.bf16.mxu0 %v7434_v41  ;;  %v1262_v41 = vld [vmem:[#allocation2 + $0x250] sm:$0xff]  ;;  %v7513_v49 = vcombine.low %v1390_v29, %v1394_v43 }
 0x4f5   :  { %6002 = vmatpush1.bf16.msra.mxu1 %v7441_v40  ;;  %v7522_v40 = vcombine.high %v1398_v35, %v1402_v36  ;;  %v1382_v57 = vld [vmem:[#allocation2 + $0x610] sm:$0xff] }
 0x4f6   :  { %6003 = vmatprep.subr.bf16.mxu1 %v7562_v42  ;;  %v5652_v59 = vpop.f32.mrf.mxu0  ;;  %v1266_v42 = vld [vmem:[#allocation2 + $0x270] sm:$0xff] }
 0x4f7   :  { %v5653_v62 = vadd.f32 %v5652_v59, %v9149_v10  ;;  %5963 = vmatpush2.bf16.msra.mxu0 %v7433_v46  ;;  %v7386_v46 = vcombine.high %v1262_v41, %v1266_v42  ;;  %v1386_v58 = vld [vmem:[#allocation2 + $0x630] sm:$0xff]  ;;  %v7385_v59 = vcombine.low %v1262_v41, %v1266_v42 }
 0x4f8   :  { %v5654_v2 = vpop.f32.mrf.mxu0  ;;  %5964 = vmatprep.subr.bf16.mxu0 %v7426_v52  ;;  %v1254_v52 = vld [vmem:[#allocation2 + $0x210] sm:$0xff] }
 0x4f9   :  { %6004 = vmatpush2.bf16.msra.mxu1 %v7561_v51  ;;  %v9164_v9 = vadd.f32 %v9155_v34, %v5653_v62  ;;  %v5655_v11 = vadd.f32 %v5654_v2, %v9152_v17  ;;  %v7410_v34 = vcombine.high %v1286_v12, %v1290_v13  ;;  %v1278_v17 = vld [vmem:[#allocation2 + $0x2d0] sm:$0xff]  ;;  %v7514_v51 = vcombine.high %v1390_v29, %v1394_v43 }
 0x4fa   :  { %6005 = vmatprep.subr.bf16.mxu1 %v7554_v56  ;;  %v5656_v14 = vpop.f32.mrf.mxu0  ;;  %v7401_v37 = vcombine.low %v1278_v17, %v1282_v21  ;;  %v1258_v56 = vld [vmem:[#allocation2 + $0x230] sm:$0xff]  ;;  %v7506_v62 = vcombine.high %v1382_v57, %v1386_v58 }
 0x4fb   :  { %v9168_v10 = vadd.f32 %v9158_v38, %v5655_v11  ;;  %5965 = vmatpush2.bf16.msra.mxu0 %v7425_v0  ;;  %v7402_v38 = vcombine.high %v1278_v17, %v1282_v21  ;;  %v7378_v61 = vcombine.high %v1254_v52, %v1258_v56  ;;  %v1502_v0 = vld [vmem:[#allocation2 + $0x9d0] sm:$0xff]  ;;  %v7377_v11 = vcombine.low %v1254_v52, %v1258_v56 }
 0x4fc   :  { %v5657_v18 = vpop.f32.mrf.mxu0  ;;  %5966 = vmatprep.subr.bf16.mxu0 %v7418_v5  ;;  %v1506_v2 = vld [vmem:[#allocation2 + $0x9f0] sm:$0xff]  ;;  %vm6438_vm7 = vcmp.gt.f32.partialorder %v9164_v9, 0.0 }
 0x4fd   :  { %6006 = vmatpush2.bf16.msra.mxu1 %v7553_v4  ;;  %v1630_v4 = vld [vmem:[#allocation2 + $0xdd0] sm:$0xff]  ;;  %v7626_v12 = vcombine.high %v1502_v0, %v1506_v2  ;;  %v7625_v18 = vcombine.low %v1502_v0, %v1506_v2  ;;  %vm6439_vm5 = vcmp.gt.f32.partialorder %v9168_v10, 0.0 }
 0x4fe   :  { %6007 = vmatprep.subr.bf16.mxu1 %v7546_v25  ;;  %v1634_v5 = vld [vmem:[#allocation2 + $0xdf0] sm:$0xff]  ;;  %v7505_v25 = vcombine.low %v1382_v57, %v1386_v58 }
 0x4ff   :  { %5967 = vmatpush2.bf16.msra.mxu0 %v7417_v16  ;;  %v7754_v13 = vcombine.high %v1630_v4, %v1634_v5  ;;  %v1494_v14 = vld [vmem:[#allocation2 + $0x990] sm:$0xff] }
 0x500   :  { %5968 = vmatprep.subr.bf16.mxu0 %v7410_v34  ;;  %v1498_v27 = vld [vmem:[#allocation2 + $0x9b0] sm:$0xff] }
 0x501   :  { %6008 = vmatpush2.bf16.msra.mxu1 %v7545_v19  ;;  %v1622_v15 = vld [vmem:[#allocation2 + $0xd90] sm:$0xff]  ;;  %v7753_v19 = vcombine.low %v1630_v4, %v1634_v5  ;;  %v7618_v34 = vcombine.high %v1494_v14, %v1498_v27 }
 0x502   :  { %6009 = vmatprep.subr.bf16.mxu1 %v7538_v20  ;;  %v1626_v16 = vld [vmem:[#allocation2 + $0xdb0] sm:$0xff] }
 0x503   :  { %5969 = vmatpush2.bf16.msra.mxu0 %v7409_v23  ;;  %v7746_v20 = vcombine.high %v1622_v15, %v1626_v16  ;;  %v1486_v17 = vld [vmem:[#allocation2 + $0x950] sm:$0xff] }
 0x504   :  { %5970 = vmatprep.subr.bf16.mxu0 %v7402_v38  ;;  %v1490_v21 = vld [vmem:[#allocation2 + $0x970] sm:$0xff]  ;;  %v7745_v38 = vcombine.low %v1622_v15, %v1626_v16 }
 0x505   :  { %6010 = vmatpush2.bf16.msra.mxu1 %v7537_v30  ;;  %v1614_v22 = vld [vmem:[#allocation2 + $0xd50] sm:$0xff]  ;;  %v7617_v30 = vcombine.low %v1494_v14, %v1498_v27 }
 0x506   :  { %6011 = vmatprep.subr.bf16.mxu1 %v7530_v31  ;;  %v1618_v26 = vld [vmem:[#allocation2 + $0xd70] sm:$0xff]  ;;  %v7610_v31 = vcombine.high %v1486_v17, %v1490_v21 }
 0x507   :  { %5971 = vmatpush2.bf16.msra.mxu0 %v7401_v37  ;;  %v7738_v33 = vcombine.high %v1614_v22, %v1618_v26  ;;  %v1478_v35 = vld [vmem:[#allocation2 + $0x910] sm:$0xff]  ;;  %v7737_v41 = vcombine.low %v1614_v22, %v1618_v26  ;;  %v1904_v26 = vsub.s32 2, %v8872_v24 }
 0x508   :  { %5972 = vmatprep.subr.bf16.mxu0 %v7394_v39  ;;  %v1482_v36 = vld [vmem:[#allocation2 + $0x930] sm:$0xff] }
 0x509   :  { %6012 = vmatpush2.bf16.msra.mxu1 %v7529_v28  ;;  %v1606_v37 = vld [vmem:[#allocation2 + $0xd10] sm:$0xff]  ;;  %v7602_v42 = vcombine.high %v1478_v35, %v1482_v36  ;;  %v7601_v52 = vcombine.low %v1478_v35, %v1482_v36  ;;  %v1908_v36 = vsub.s32 3, %v8872_v24 }
 0x50a   :  { %6013 = vmatprep.subr.bf16.mxu1 %v7522_v40  ;;  %v1610_v28 = vld [vmem:[#allocation2 + $0xd30] sm:$0xff]  ;;  %v7609_v40 = vcombine.low %v1486_v17, %v1490_v21 }
 0x50b   :  { %5973 = vmatpush2.bf16.msra.mxu0 %v7393_v44  ;;  %v7730_v43 = vcombine.high %v1606_v37, %v1610_v28  ;;  %v1470_v44 = vld [vmem:[#allocation2 + $0x8d0] sm:$0xff]  ;;  %v7729_v56 = vcombine.low %v1606_v37, %v1610_v28 }
 0x50c   :  { %5974 = vmatprep.subr.bf16.mxu0 %v7386_v46  ;;  %v1598_v46 = vld [vmem:[#allocation2 + $0xcd0] sm:$0xff] }
 0x50d   :  { %6014 = vmatpush2.bf16.msra.mxu1 %v7521_v45  ;;  %v1474_v45 = vld [vmem:[#allocation2 + $0x8f0] sm:$0xff] }
 0x50e   :  { %6015 = vmatprep.subr.bf16.mxu1 %v7514_v51  ;;  %v1602_v51 = vld [vmem:[#allocation2 + $0xcf0] sm:$0xff]  ;;  %v7594_v57 = vcombine.high %v1470_v44, %v1474_v45  ;;  %v7593_v0 = vcombine.low %v1470_v44, %v1474_v45 }
 0x50f   :  { %5975 = vmatpush2.bf16.msra.mxu0 %v7385_v59  ;;  %v7722_v58 = vcombine.high %v1598_v46, %v1602_v51  ;;  %v1462_v59 = vld [vmem:[#allocation2 + $0x890] sm:$0xff]  ;;  %v7721_v2 = vcombine.low %v1598_v46, %v1602_v51 }
 0x510   :  { %5976 = vmatprep.subr.bf16.mxu0 %v7378_v61  ;;  %v1590_v61 = vld [vmem:[#allocation2 + $0xc90] sm:$0xff] }
 0x511   :  { %6016 = vmatpush2.bf16.msra.mxu1 %v7513_v49  ;;  %v1466_v49 = vld [vmem:[#allocation2 + $0x8b0] sm:$0xff] }
 0x512   :  { %6017 = vmatprep.subr.bf16.mxu1 %v7506_v62  ;;  %v1594_v62 = vld [vmem:[#allocation2 + $0xcb0] sm:$0xff]  ;;  %v7586_v4 = vcombine.high %v1462_v59, %v1466_v49  ;;  %v7585_v14 = vcombine.low %v1462_v59, %v1466_v49 }
 0x513   :  { %5977 = vmatpush2.bf16.msra.mxu0 %v7377_v11  ;;  %v7714_v5 = vcombine.high %v1590_v61, %v1594_v62  ;;  %v1454_v11 = vld [vmem:[#allocation2 + $0x850] sm:$0xff]  ;;  %v7713_v27 = vcombine.low %v1590_v61, %v1594_v62 }
 0x514   :  { %6028 = vmatprep.subr.bf16.mxu0 %v7626_v12  ;;  %v1582_v12 = vld [vmem:[#allocation2 + $0xc50] sm:$0xff] }
 0x515   :  { %6018 = vmatpush2.bf16.msra.mxu1 %v7505_v25  ;;  %v1458_v25 = vld [vmem:[#allocation2 + $0x870] sm:$0xff] }
 0x516   :  { %6069 = vmatprep.subr.bf16.mxu1 %v7754_v13  ;;  %5979 = vmatmul.mubr.bf16.vlgmr.msra.gmra.mxu0 %v9096_v47  ;;  %v1586_v13 = vld [vmem:[#allocation2 + $0xc70] sm:$0xff]  ;;  %v7578_v15 = vcombine.high %v1454_v11, %v1458_v25  ;;  %v7577_v17 = vcombine.low %v1454_v11, %v1458_v25 }
 0x517   :  { %6029 = vmatpush1.bf16.msra.mxu0 %v7625_v18  ;;  %6060 = vmatprep.mubr.bf16.mxu0 %v9108_v63  ;;  %v7706_v16 = vcombine.high %v1582_v12, %v1586_v13  ;;  %v1446_v18 = vld [vmem:[#allocation2 + $0x810] sm:$0xff]  ;;  %v7705_v21 = vcombine.low %v1582_v12, %v1586_v13 }
 0x518   :  { %v9171_v23 = vpop.f32.mrf.mxu1  ;;  %6020 = vmatmul.mubr.bf16.vlgmr.msra.gmra.mxu1 %v9101_v54  ;;  %6030 = vmatprep.subr.bf16.mxu0 %v7618_v34  ;;  %v1574_v34 = vld [vmem:[#allocation2 + $0xc10] sm:$0xff] }
 0x519   :  { %6070 = vmatpush1.bf16.msra.mxu1 %v7753_v19  ;;  %6101 = vmatprep.mubr.bf16.mxu1 %v9112_v3  ;;  %v1450_v19 = vld [vmem:[#allocation2 + $0x830] sm:$0xff] }
 0x51a   :  { %v9174_v32 = vpop.f32.mrf.mxu1  ;;  %6071 = vmatprep.subr.bf16.mxu1 %v7746_v20  ;;  %v1578_v20 = vld [vmem:[#allocation2 + $0xc30] sm:$0xff]  ;;  %v7570_v22 = vcombine.high %v1446_v18, %v1450_v19  ;;  %v7569_v37 = vcombine.low %v1446_v18, %v1450_v19 }
 0x51b   :  { %6031 = vmatpush1.bf16.msra.mxu0 %v7617_v30  ;;  %v7698_v30 = vcombine.high %v1574_v34, %v1578_v20  ;;  %v1698_v35 = vld [vmem:[#allocation2 + $0xff0] sm:$0xff]  ;;  %v7697_v28 = vcombine.low %v1574_v34, %v1578_v20 }
 0x51c   :  { %v5738_v39 = vpop.f32.mrf.mxu1  ;;  %6032 = vmatprep.subr.bf16.mxu0 %v7610_v31  ;;  %v1570_v31 = vld [vmem:[#allocation2 + $0xbf0] sm:$0xff] }
 0x51d   :  { %6072 = vmatpush1.bf16.msra.mxu1 %v7745_v38  ;;  %v1566_v38 = vld [vmem:[#allocation2 + $0xbd0] sm:$0xff] }
 0x51e   :  { %v5739_v29 = vpop.f32.mrf.mxu1  ;;  %6073 = vmatprep.subr.bf16.mxu1 %v7738_v33  ;;  %v1694_v33 = vld [vmem:[#allocation2 + $0xfd0] sm:$0xff]  ;;  %v7690_v39 = vcombine.high %v1566_v38, %v1570_v31  ;;  %v7689_v51 = vcombine.low %v1566_v38, %v1570_v31 }
 0x51f   :  { %6033 = vmatpush1.bf16.msra.mxu0 %v7609_v40  ;;  %v8307_v40 = vld [vmem:[#allocation14] sm:$0xff] }
 0x520   :  { %6034 = vmatprep.subr.bf16.mxu0 %v7602_v42  ;;  %v7818_v42 = vcombine.high %v1694_v33, %v1698_v35  ;;  %v1558_v29 = vld [vmem:[#allocation2 + $0xb90] sm:$0xff]  ;;  %v1909_v46 = vrot.slane %v8307_v40, %v1908_v36 }
 0x521   :  { %6074 = vmatpush1.bf16.msra.mxu1 %v7737_v41  ;;  %v1905_v41 = vrot.slane %v8307_v40, %v1904_v26  ;;  %v1686_v44 = vld [vmem:[#allocation2 + $0xf90] sm:$0xff] }
 0x522   :  { %6075 = vmatprep.subr.bf16.mxu1 %v7730_v43  ;;  %v1562_v43 = vld [vmem:[#allocation2 + $0xbb0] sm:$0xff] }
 0x523   :  { %6035 = vmatpush1.bf16.msra.mxu0 %v7601_v52  ;;  %v1690_v45 = vld [vmem:[#allocation2 + $0xfb0] sm:$0xff]  ;;  %v7817_v52 = vcombine.low %v1694_v33, %v1698_v35 }
 0x524   :  { %6036 = vmatprep.subr.bf16.mxu0 %v7594_v57  ;;  %v5735_v57 = vadd.f32 %v9171_v23, %v1905_v41  ;;  %v1550_v59 = vld [vmem:[#allocation2 + $0xb50] sm:$0xff]  ;;  %v7809_v25 = vcombine.low %v1686_v44, %v1690_v45 }
 0x525   :  { %6076 = vmatpush1.bf16.msra.mxu1 %v7729_v56  ;;  %v7682_v56 = vcombine.high %v1558_v29, %v1562_v43  ;;  %v1554_v49 = vld [vmem:[#allocation2 + $0xb70] sm:$0xff] }
 0x526   :  { %6077 = vmatprep.subr.bf16.mxu1 %v7722_v58  ;;  %v7810_v58 = vcombine.high %v1686_v44, %v1690_v45  ;;  %v1678_v62 = vld [vmem:[#allocation2 + $0xf50] sm:$0xff]  ;;  %v7674_v12 = vcombine.high %v1550_v59, %v1554_v49 }
 0x527   :  { %6037 = vmatpush1.bf16.msra.mxu0 %v7593_v0  ;;  %v1682_v0 = vld [vmem:[#allocation2 + $0xf70] sm:$0xff] }
 0x528   :  { %6038 = vmatprep.subr.bf16.mxu0 %v7586_v4  ;;  %v7802_v23 = vcombine.high %v1678_v62, %v1682_v0  ;;  %v1674_v18 = vld [vmem:[#allocation2 + $0xf30] sm:$0xff]  ;;  %v7801_v34 = vcombine.low %v1678_v62, %v1682_v0 }
 0x529   :  { %6078 = vmatpush1.bf16.msra.mxu1 %v7721_v2  ;;  %v5737_v2 = vadd.f32 %v9174_v32, %v1909_v46  ;;  %v7673_v32 = vcombine.low %v1550_v59, %v1554_v49  ;;  %v1662_v26 = vld [vmem:[#allocation2 + $0xed0] sm:$0xff] }
 0x52a   :  { %6079 = vmatprep.subr.bf16.mxu1 %v7714_v5  ;;  %v7681_v5 = vcombine.low %v1558_v29, %v1562_v43  ;;  %v1526_v36 = vld [vmem:[#allocation2 + $0xa90] sm:$0xff] }
 0x52b   :  { %6039 = vmatpush1.bf16.msra.mxu0 %v7585_v14  ;;  %v1542_v14 = vld [vmem:[#allocation2 + $0xb10] sm:$0xff] }
 0x52c   :  { %6040 = vmatprep.subr.bf16.mxu0 %v7578_v15  ;;  %v1518_v43 = vld [vmem:[#allocation2 + $0xa50] sm:$0xff] }
 0x52d   :  { %6080 = vmatpush1.bf16.msra.mxu1 %v7713_v27  ;;  %v1546_v27 = vld [vmem:[#allocation2 + $0xb30] sm:$0xff] }
 0x52e   :  { %6081 = vmatprep.subr.bf16.mxu1 %v7706_v16  ;;  %v1670_v16 = vld [vmem:[#allocation2 + $0xf10] sm:$0xff]  ;;  %v7666_v20 = vcombine.high %v1542_v14, %v1546_v27  ;;  %v7665_v38 = vcombine.low %v1542_v14, %v1546_v27 }
 0x52f   :  { %6041 = vmatpush1.bf16.msra.mxu0 %v7577_v17  ;;  %v7794_v17 = vcombine.high %v1670_v16, %v1674_v18  ;;  %v7793_v31 = vcombine.low %v1670_v16, %v1674_v18  ;;  %v1522_v44 = vld [vmem:[#allocation2 + $0xa70] sm:$0xff] }
 0x530   :  { %6042 = vmatprep.subr.bf16.mxu0 %v7570_v22  ;;  %v1538_v22 = vld [vmem:[#allocation2 + $0xaf0] sm:$0xff]  ;;  %v7641_v62 = vcombine.low %v1518_v43, %v1522_v44 }
 0x531   :  { %6082 = vmatpush1.bf16.msra.mxu1 %v7705_v21  ;;  %v1534_v21 = vld [vmem:[#allocation2 + $0xad0] sm:$0xff] }
 0x532   :  { %6083 = vmatprep.subr.bf16.mxu1 %v7698_v30  ;;  %v1666_v30 = vld [vmem:[#allocation2 + $0xef0] sm:$0xff]  ;;  %v7658_v33 = vcombine.high %v1534_v21, %v1538_v22  ;;  %v7657_v40 = vcombine.low %v1534_v21, %v1538_v22 }
 0x533   :  { %6043 = vmatpush1.bf16.msra.mxu0 %v7569_v37  ;;  %v7786_v35 = vcombine.high %v1662_v26, %v1666_v30  ;;  %v1530_v37 = vld [vmem:[#allocation2 + $0xab0] sm:$0xff]  ;;  %v7785_v41 = vcombine.low %v1662_v26, %v1666_v30 }
 0x534   :  { %6044 = vmatprep.subr.bf16.mxu0 %v7690_v39  ;;  %v1658_v39 = vld [vmem:[#allocation2 + $0xeb0] sm:$0xff] }
 0x535   :  { %6084 = vmatpush1.bf16.msra.mxu1 %v7697_v28  ;;  %v1654_v28 = vld [vmem:[#allocation2 + $0xe90] sm:$0xff] }
 0x536   :  { %6085 = vmatprep.subr.bf16.mxu1 %v7818_v42  ;;  %v5775_v61 = vpop.f32.mrf.mxu0  ;;  %v7650_v42 = vcombine.high %v1526_v36, %v1530_v37  ;;  %v7778_v29 = vcombine.high %v1654_v28, %v1658_v39  ;;  %v1646_v45 = vld [vmem:[#allocation2 + $0xe50] sm:$0xff] }
 0x537   :  { %v9182_v4 = vadd.f32 %v5775_v61, %v5735_v57  ;;  %6045 = vmatpush2.bf16.msra.mxu0 %v7689_v51  ;;  %v1650_v46 = vld [vmem:[#allocation2 + $0xe70] sm:$0xff]  ;;  %v7649_v51 = vcombine.low %v1526_v36, %v1530_v37 }
 0x538   :  { %v5777_v11 = vpop.f32.mrf.mxu0  ;;  %6046 = vmatprep.subr.bf16.mxu0 %v7682_v56  ;;  %v7642_v56 = vcombine.high %v1518_v43, %v1522_v44  ;;  %v7770_v57 = vcombine.high %v1646_v45, %v1650_v46  ;;  %v1514_v59 = vld [vmem:[#allocation2 + $0xa30] sm:$0xff]  ;;  %v7769_v0 = vcombine.low %v1646_v45, %v1650_v46 }
 0x539   :  { %6086 = vmatpush2.bf16.msra.mxu1 %v7817_v52  ;;  %v9184_v13 = vadd.f32 %v5777_v11, %v5737_v2  ;;  %v7777_v52 = vcombine.low %v1654_v28, %v1658_v39  ;;  %v1638_v49 = vld [vmem:[#allocation2 + $0xe10] sm:$0xff] }
 0x53a   :  { %6087 = vmatprep.subr.bf16.mxu1 %v7810_v58  ;;  %v5779_v15 = vpop.f32.mrf.mxu0  ;;  %v1510_v58 = vld [vmem:[#allocation2 + $0xa10] sm:$0xff] }
 0x53b   :  { %6047 = vmatpush2.bf16.msra.mxu0 %v7681_v5  ;;  %v1642_v61 = vld [vmem:[#allocation2 + $0xe30] sm:$0xff]  ;;  %v7634_v2 = vcombine.high %v1510_v58, %v1514_v59  ;;  %v7633_v14 = vcombine.low %v1510_v58, %v1514_v59 }
 0x53c   :  { %v5780_v19 = vpop.f32.mrf.mxu0  ;;  %6048 = vmatprep.subr.bf16.mxu0 %v7674_v12  ;;  %v7762_v5 = vcombine.high %v1638_v49, %v1642_v61  ;;  %v1758_v11 = vld [vmem:[#allocation2 + $0x11d0] sm:$0xff]  ;;  %v7761_v27 = vcombine.low %v1638_v49, %v1642_v61 }
 0x53d   :  { %6088 = vmatpush2.bf16.msra.mxu1 %v7809_v25  ;;  %v1762_v25 = vld [vmem:[#allocation2 + $0x11f0] sm:$0xff] }
 0x53e   :  { %6089 = vmatprep.subr.bf16.mxu1 %v7802_v23  ;;  %v1886_v12 = vld [vmem:[#allocation2 + $0x15d0] sm:$0xff]  ;;  %v7882_v15 = vcombine.high %v1758_v11, %v1762_v25 }
 0x53f   :  { %6049 = vmatpush2.bf16.msra.mxu0 %v7673_v32  ;;  %v1890_v23 = vld [vmem:[#allocation2 + $0x15f0] sm:$0xff] }
 0x540   :  { %6050 = vmatprep.subr.bf16.mxu0 %v7666_v20  ;;  %v8010_v16 = vcombine.high %v1886_v12, %v1890_v23  ;;  %v1750_v18 = vld [vmem:[#allocation2 + $0x1190] sm:$0xff]  ;;  %v7881_v20 = vcombine.low %v1758_v11, %v1762_v25 }
 0x541   :  { %6090 = vmatpush2.bf16.msra.mxu1 %v7801_v34  ;;  %v1754_v32 = vld [vmem:[#allocation2 + $0x11b0] sm:$0xff] }
 0x542   :  { %6091 = vmatprep.subr.bf16.mxu1 %v7794_v17  ;;  %v1878_v19 = vld [vmem:[#allocation2 + $0x1590] sm:$0xff]  ;;  %v8009_v17 = vcombine.low %v1886_v12, %v1890_v23  ;;  %v7874_v21 = vcombine.high %v1750_v18, %v1754_v32 }
 0x543   :  { %6051 = vmatpush2.bf16.msra.mxu0 %v7665_v38  ;;  %v1882_v34 = vld [vmem:[#allocation2 + $0x15b0] sm:$0xff] }
 0x544   :  { %6052 = vmatprep.subr.bf16.mxu0 %v7658_v33  ;;  %v8002_v22 = vcombine.high %v1878_v19, %v1882_v34  ;;  %v1742_v26 = vld [vmem:[#allocation2 + $0x1150] sm:$0xff]  ;;  %v8001_v37 = vcombine.low %v1878_v19, %v1882_v34 }
 0x545   :  { %6092 = vmatpush2.bf16.msra.mxu1 %v7793_v31  ;;  %v1746_v30 = vld [vmem:[#allocation2 + $0x1170] sm:$0xff] }
 0x546   :  { %6093 = vmatprep.subr.bf16.mxu1 %v7786_v35  ;;  %v1870_v38 = vld [vmem:[#allocation2 + $0x1550] sm:$0xff]  ;;  %v7873_v35 = vcombine.low %v1750_v18, %v1754_v32  ;;  %v7866_v28 = vcombine.high %v1742_v26, %v1746_v30  ;;  %v7865_v45 = vcombine.low %v1742_v26, %v1746_v30 }
 0x547   :  { %6053 = vmatpush2.bf16.msra.mxu0 %v7657_v40  ;;  %v1874_v31 = vld [vmem:[#allocation2 + $0x1570] sm:$0xff] }
 0x548   :  { %6054 = vmatprep.subr.bf16.mxu0 %v7650_v42  ;;  %v7994_v40 = vcombine.high %v1870_v38, %v1874_v31  ;;  %v1738_v42 = vld [vmem:[#allocation2 + $0x1130] sm:$0xff]  ;;  %v7993_v46 = vcombine.low %v1870_v38, %v1874_v31 }
 0x549   :  { %6094 = vmatpush2.bf16.msra.mxu1 %v7785_v41  ;;  %v1734_v41 = vld [vmem:[#allocation2 + $0x1110] sm:$0xff] }
 0x54a   :  { %6095 = vmatprep.subr.bf16.mxu1 %v7778_v29  ;;  %v1862_v43 = vld [vmem:[#allocation2 + $0x1510] sm:$0xff] }
 0x54b   :  { %6055 = vmatpush2.bf16.msra.mxu0 %v7649_v51  ;;  %v1866_v44 = vld [vmem:[#allocation2 + $0x1530] sm:$0xff]  ;;  %v7858_v51 = vcombine.high %v1734_v41, %v1738_v42 }
 0x54c   :  { %6056 = vmatprep.subr.bf16.mxu0 %v7642_v56  ;;  %v7986_v56 = vcombine.high %v1862_v43, %v1866_v44  ;;  %v1730_v58 = vld [vmem:[#allocation2 + $0x10f0] sm:$0xff]  ;;  %v7985_v61 = vcombine.low %v1862_v43, %v1866_v44 }
 0x54d   :  { %6096 = vmatpush2.bf16.msra.mxu1 %v7777_v52  ;;  %v1854_v59 = vld [vmem:[#allocation2 + $0x14d0] sm:$0xff] }
 0x54e   :  { %6097 = vmatprep.subr.bf16.mxu1 %v7770_v57  ;;  %v1726_v57 = vld [vmem:[#allocation2 + $0x10d0] sm:$0xff] }
 0x54f   :  { %6057 = vmatpush2.bf16.msra.mxu0 %v7641_v62  ;;  %v1858_v49 = vld [vmem:[#allocation2 + $0x14f0] sm:$0xff]  ;;  %v7850_v62 = vcombine.high %v1726_v57, %v1730_v58  ;;  %v7849_v12 = vcombine.low %v1726_v57, %v1730_v58 }
 0x550   :  { %6058 = vmatprep.subr.bf16.mxu0 %v7634_v2  ;;  %v1718_v2 = vld [vmem:[#allocation2 + $0x1090] sm:$0xff]  ;;  %v7977_v23 = vcombine.low %v1854_v59, %v1858_v49 }
 0x551   :  { %6098 = vmatpush2.bf16.msra.mxu1 %v7769_v0  ;;  %v7978_v0 = vcombine.high %v1854_v59, %v1858_v49  ;;  %v1846_v11 = vld [vmem:[#allocation2 + $0x1490] sm:$0xff] }
 0x552   :  { %6099 = vmatprep.subr.bf16.mxu1 %v7762_v5  ;;  %v1722_v5 = vld [vmem:[#allocation2 + $0x10b0] sm:$0xff] }
 0x553   :  { %6059 = vmatpush2.bf16.msra.mxu0 %v7633_v14  ;;  %v1850_v25 = vld [vmem:[#allocation2 + $0x14b0] sm:$0xff]  ;;  %v7842_v14 = vcombine.high %v1718_v2, %v1722_v5  ;;  %v7841_v19 = vcombine.low %v1718_v2, %v1722_v5 }
 0x554   :  { %6110 = vmatprep.subr.bf16.mxu0 %v7882_v15  ;;  %v1710_v15 = vld [vmem:[#allocation2 + $0x1050] sm:$0xff]  ;;  %v7969_v34 = vcombine.low %v1846_v11, %v1850_v25 }
 0x555   :  { %6100 = vmatpush2.bf16.msra.mxu1 %v7761_v27  ;;  %v7970_v27 = vcombine.high %v1846_v11, %v1850_v25  ;;  %v1838_v18 = vld [vmem:[#allocation2 + $0x1450] sm:$0xff] }
 0x556   :  { %6151 = vmatprep.subr.bf16.mxu1 %v8010_v16  ;;  %6061 = vmatmul.mubr.bf16.vlgmr.msra.gmra.mxu0 %v9106_v60  ;;  %v1714_v16 = vld [vmem:[#allocation2 + $0x1070] sm:$0xff] }
 0x557   :  { %6111 = vmatpush1.bf16.msra.mxu0 %v7881_v20  ;;  %6142 = vmatprep.mubr.bf16.mxu0 %v9118_v8  ;;  %v1842_v32 = vld [vmem:[#allocation2 + $0x1470] sm:$0xff]  ;;  %v7834_v20 = vcombine.high %v1710_v15, %v1714_v16  ;;  %v7833_v38 = vcombine.low %v1710_v15, %v1714_v16  ;;  %v1223_v15 = vld [vmem:[#allocation2 + $0x118] sm:$0xff] }
 0x558   :  { %v5816_v33 = vpop.f32.mrf.mxu1  ;;  %6102 = vmatmul.mubr.bf16.vlgmr.msra.gmra.mxu1 %v9110_v50  ;;  %6112 = vmatprep.subr.bf16.mxu0 %v7874_v21  ;;  %v1702_v21 = vld [vmem:[#allocation2 + $0x1010] sm:$0xff]  ;;  %v7961_v31 = vcombine.low %v1838_v18, %v1842_v32  ;;  %v1227_v16 = vld [vmem:[#allocation2 + $0x138] sm:$0xff] }
 0x559   :  { %v9189_v36 = vadd.f32 %v5816_v33, %v9182_v4  ;;  %6152 = vmatpush1.bf16.msra.mxu1 %v8009_v17  ;;  %6183 = vmatprep.mubr.bf16.mxu1 %v8493_v48  ;;  %v7962_v17 = vcombine.high %v1838_v18, %v1842_v32  ;;  %v1830_v26 = vld [vmem:[#allocation2 + $0x1410] sm:$0xff] }
 0x55a   :  { %v5818_v39 = vpop.f32.mrf.mxu1  ;;  %6153 = vmatprep.subr.bf16.mxu1 %v8002_v22  ;;  %v1706_v22 = vld [vmem:[#allocation2 + $0x1030] sm:$0xff] }
 0x55b   :  { %v9193_v29 = vadd.f32 %v5818_v39, %v9184_v13  ;;  %6113 = vmatpush1.bf16.msra.mxu0 %v7873_v35  ;;  %v7857_v13 = vcombine.low %v1734_v41, %v1738_v42  ;;  %v1834_v30 = vld [vmem:[#allocation2 + $0x1430] sm:$0xff]  ;;  %v7826_v33 = vcombine.high %v1702_v21, %v1706_v22  ;;  %v1247_v39 = vld [vmem:[#allocation2 + $0x1d8] sm:$0xff]  ;;  %v7825_v41 = vcombine.low %v1702_v21, %v1706_v22 }
 0x55c   :  { %v5820_v4 = vpop.f32.mrf.mxu1  ;;  %6114 = vmatprep.subr.bf16.mxu0 %v7866_v28  ;;  %v7954_v35 = vcombine.high %v1830_v26, %v1834_v30  ;;  %v1826_v28 = vld [vmem:[#allocation2 + $0x13f0] sm:$0xff]  ;;  %v7953_v42 = vcombine.low %v1830_v26, %v1834_v30  ;;  %v1215_v21 = vld [vmem:[#allocation2 + $0xd8] sm:$0xff] }
 0x55d   :  { %6154 = vmatpush1.bf16.msra.mxu1 %v8001_v37  ;;  %v1822_v37 = vld [vmem:[#allocation2 + $0x13d0] sm:$0xff]  ;;  %v1219_v22 = vld [vmem:[#allocation2 + $0xf8] sm:$0xff] }
 0x55e   :  { %v5821_v52 = vpop.f32.mrf.mxu1  ;;  %6155 = vmatprep.subr.bf16.mxu1 %v7994_v40  ;;  %v1251_v40 = vld [vmem:[#allocation2 + $0x1f8] sm:$0xff]  ;;  %v7946_v43 = vcombine.high %v1822_v37, %v1826_v28  ;;  %v1814_v4 = vld [vmem:[#allocation2 + $0x1390] sm:$0xff] }
 0x55f   :  { %6115 = vmatpush1.bf16.msra.mxu0 %v7865_v45  ;;  %v7372_v44 = vcombine.high %v1247_v39, %v1251_v40  ;;  %v1818_v45 = vld [vmem:[#allocation2 + $0x13b0] sm:$0xff]  ;;  %v7945_v52 = vcombine.low %v1822_v37, %v1826_v28  ;;  %v1211_v37 = vld [vmem:[#allocation2 + $0xb8] sm:$0xff] }
 0x560   :  { %6116 = vmatprep.subr.bf16.mxu0 %v7858_v51  ;;  %v1243_v51 = vld [vmem:[#allocation2 + $0x1b8] sm:$0xff]  ;;  %v7938_v57 = vcombine.high %v1814_v4, %v1818_v45  ;;  %v1806_v59 = vld [vmem:[#allocation2 + $0x1350] sm:$0xff]  ;;  %v7937_v2 = vcombine.low %v1814_v4, %v1818_v45 }
 0x561   :  { %6156 = vmatpush1.bf16.msra.mxu1 %v7993_v46  ;;  %v1239_v46 = vld [vmem:[#allocation2 + $0x198] sm:$0xff]  ;;  %v1810_v49 = vld [vmem:[#allocation2 + $0x1370] sm:$0xff] }
 0x562   :  { %6157 = vmatprep.subr.bf16.mxu1 %v7986_v56  ;;  %v7371_v56 = vcombine.low %v1247_v39, %v1251_v40  ;;  %v7364_v58 = vcombine.high %v1239_v46, %v1243_v51  ;;  %v7363_v11 = vcombine.low %v1239_v46, %v1243_v51  ;;  %v7930_v25 = vcombine.high %v1806_v59, %v1810_v49  ;;  %v1203_v4 = vld [vmem:[#allocation2 + $0x78] sm:$0xff] }
 0x563   :  { %6117 = vmatpush1.bf16.msra.mxu0 %v7857_v13  ;;  %v7929_v18 = vcombine.low %v1806_v59, %v1810_v49  ;;  %v7339_v39 = vcombine.low %v1215_v21, %v1219_v22  ;;  %v1195_v59 = vld [vmem:[#allocation2 + $0x38] sm:$0xff] }
 0x564   :  { %6118 = vmatprep.subr.bf16.mxu0 %v7850_v62  ;;  %v1235_v62 = vld [vmem:[#allocation2 + $0x178] sm:$0xff] }
 0x565   :  { %6158 = vmatpush1.bf16.msra.mxu1 %v7985_v61  ;;  %v1231_v61 = vld [vmem:[#allocation2 + $0x158] sm:$0xff] }
 0x566   :  { %6159 = vmatprep.subr.bf16.mxu1 %v7978_v0 }
 0x567   :  { %6119 = vmatpush1.bf16.msra.mxu0 %v7849_v12 }
 0x568   :  { %6120 = vmatprep.subr.bf16.mxu0 %v7842_v14  ;;  %v1798_v14 = vld [vmem:[#allocation2 + $0x1310] sm:$0xff] }
 0x569   :  { %6160 = vmatpush1.bf16.msra.mxu1 %v7977_v23  ;;  %v7356_v23 = vcombine.high %v1231_v61, %v1235_v62 }
 0x56a   :  { %6161 = vmatprep.subr.bf16.mxu1 %v7970_v27  ;;  %v1802_v27 = vld [vmem:[#allocation2 + $0x1330] sm:$0xff] }
 0x56b   :  { %6121 = vmatpush1.bf16.msra.mxu0 %v7841_v19  ;;  %v7355_v19 = vcombine.low %v1231_v61, %v1235_v62  ;;  %v7921_v26 = vcombine.low %v1798_v14, %v1802_v27 }
 0x56c   :  { %6122 = vmatprep.subr.bf16.mxu0 %v7834_v20  ;;  %v7348_v20 = vcombine.high %v1223_v15, %v1227_v16 }
 0x56d   :  { %6162 = vmatpush1.bf16.msra.mxu1 %v7969_v34  ;;  %v7922_v34 = vcombine.high %v1798_v14, %v1802_v27 }
 0x56e   :  { %6163 = vmatprep.subr.bf16.mxu1 %v7962_v17  ;;  %v1794_v17 = vld [vmem:[#allocation2 + $0x12f0] sm:$0xff] }
 0x56f   :  { %6123 = vmatpush1.bf16.msra.mxu0 %v7833_v38  ;;  %v7340_v38 = vcombine.high %v1215_v21, %v1219_v22  ;;  %v1363_v21 = vld [vmem:[#allocation2 + $0x578] sm:$0xff] }
 0x570   :  { %6124 = vmatprep.subr.bf16.mxu0 %v7826_v33  ;;  %v1786_v33 = vld [vmem:[#allocation2 + $0x12b0] sm:$0xff] }
 0x571   :  { %6164 = vmatpush1.bf16.msra.mxu1 %v7961_v31  ;;  %v1782_v31 = vld [vmem:[#allocation2 + $0x1290] sm:$0xff] }
 0x572   :  { %6165 = vmatprep.subr.bf16.mxu1 %v7954_v35  ;;  %v1207_v35 = vld [vmem:[#allocation2 + $0x98] sm:$0xff]  ;;  %v7906_v40 = vcombine.high %v1782_v31, %v1786_v33  ;;  %v7905_v45 = vcombine.low %v1782_v31, %v1786_v33 }
 0x573   :  { %6125 = vmatpush1.bf16.msra.mxu0 %v7825_v41  ;;  %v7332_v41 = vcombine.high %v1207_v35, %v1211_v37  ;;  %v7331_v46 = vcombine.low %v1207_v35, %v1211_v37 }
 0x574   :  { %6126 = vmatprep.subr.bf16.mxu0 %v7946_v43  ;;  %v1778_v43 = vld [vmem:[#allocation2 + $0x1270] sm:$0xff] }
 0x575   :  { %6166 = vmatpush1.bf16.msra.mxu1 %v7953_v42  ;;  %v1774_v42 = vld [vmem:[#allocation2 + $0x1250] sm:$0xff] }
 0x576   :  { %6192 = vmatprep.subr.bf16.mxu1 %v7372_v44  ;;  %v5857_v13 = vpop.f32.mrf.mxu0  ;;  %v1199_v44 = vld [vmem:[#allocation2 + $0x58] sm:$0xff]  ;;  %v7898_v51 = vcombine.high %v1774_v42, %v1778_v43  ;;  %v7897_v49 = vcombine.low %v1774_v42, %v1778_v43 }
 0x577   :  { %v9197_v0 = vadd.f32 %v5857_v13, %v9189_v36  ;;  %6127 = vmatpush2.bf16.msra.mxu0 %v7945_v52  ;;  %v7324_v52 = vcombine.high %v1199_v44, %v1203_v4  ;;  %v7323_v13 = vcombine.low %v1199_v44, %v1203_v4  ;;  %v1287_v4 = vld [vmem:[#allocation2 + $0x318] sm:$0xff] }
 0x578   :  { %6184 = vmatmul.mubr.bf16.vlgmr.msra.gmra.mxu1 %v9116_v7  ;;  %v5859_v5 = vpop.f32.mrf.mxu0  ;;  %6128 = vmatprep.subr.bf16.mxu0 %v7938_v57  ;;  %v1770_v57 = vld [vmem:[#allocation2 + $0x1230] sm:$0xff] }
 0x579   :  { %6193 = vmatpush1.bf16.msra.mxu1 %v7371_v56  ;;  %v9201_v12 = vadd.f32 %v5859_v5, %v9193_v29  ;;  %6224 = vmatprep.mubr.bf16.mxu1 %v9099_v53  ;;  %v1790_v29 = vld [vmem:[#allocation2 + $0x12d0] sm:$0xff]  ;;  %v7347_v53 = vcombine.low %v1223_v15, %v1227_v16  ;;  %v1379_v5 = vld [vmem:[#allocation2 + $0x5f8] sm:$0xff] }
 0x57a   :  { %6194 = vmatprep.subr.bf16.mxu1 %v7364_v58  ;;  %v5861_v36 = vpop.f32.mrf.mxu0  ;;  %v7914_v30 = vcombine.high %v1790_v29, %v1794_v17  ;;  %v7913_v28 = vcombine.low %v1790_v29, %v1794_v17  ;;  %v1766_v56 = vld [vmem:[#allocation2 + $0x1210] sm:$0xff]  ;;  %v1191_v58 = vld [vmem:[#allocation2 + $0x18] sm:$0xff] }
 0x57b   :  { %6129 = vmatpush2.bf16.msra.mxu0 %v7937_v2  ;;  %v7890_v61 = vcombine.high %v1766_v56, %v1770_v57  ;;  %v7316_v62 = vcombine.high %v1191_v58, %v1195_v59  ;;  %v1375_v2 = vld [vmem:[#allocation2 + $0x5d8] sm:$0xff]  ;;  %v7315_v14 = vcombine.low %v1191_v58, %v1195_v59 }
 0x57c   :  { %v5862_v32 = vpop.f32.mrf.mxu0  ;;  %6130 = vmatprep.subr.bf16.mxu0 %v7930_v25  ;;  %v1315_v25 = vld [vmem:[#allocation2 + $0x3f8] sm:$0xff]  ;;  %v7500_v27 = vcombine.high %v1375_v2, %v1379_v5 }
 0x57d   :  { %6195 = vmatpush1.bf16.msra.mxu1 %v7363_v11  ;;  %v1311_v11 = vld [vmem:[#allocation2 + $0x3d8] sm:$0xff] }
 0x57e   :  { %6196 = vmatprep.subr.bf16.mxu1 %v7356_v23  ;;  %v7889_v23 = vcombine.low %v1766_v56, %v1770_v57  ;;  %v7436_v36 = vcombine.high %v1311_v11, %v1315_v25  ;;  %v1367_v15 = vld [vmem:[#allocation2 + $0x598] sm:$0xff] }
 0x57f   :  { %6131 = vmatpush2.bf16.msra.mxu0 %v7929_v18  ;;  %v1371_v16 = vld [vmem:[#allocation2 + $0x5b8] sm:$0xff] }
 0x580   :  { %6132 = vmatprep.subr.bf16.mxu0 %v7922_v34  ;;  %v1303_v18 = vld [vmem:[#allocation2 + $0x398] sm:$0xff]  ;;  %v7435_v34 = vcombine.low %v1311_v11, %v1315_v25 }
 0x581   :  { %6197 = vmatpush1.bf16.msra.mxu1 %v7355_v19  ;;  %v1307_v32 = vld [vmem:[#allocation2 + $0x3b8] sm:$0xff]  ;;  %v7499_v19 = vcombine.low %v1375_v2, %v1379_v5 }
 0x582   :  { %6198 = vmatprep.subr.bf16.mxu1 %v7348_v20  ;;  %v7492_v20 = vcombine.high %v1367_v15, %v1371_v16  ;;  %v7428_v29 = vcombine.high %v1303_v18, %v1307_v32  ;;  %v1359_v17 = vld [vmem:[#allocation2 + $0x558] sm:$0xff]  ;;  %v7427_v35 = vcombine.low %v1303_v18, %v1307_v32 }
 0x583   :  { %6133 = vmatpush2.bf16.msra.mxu0 %v7921_v26  ;;  %v1295_v26 = vld [vmem:[#allocation2 + $0x358] sm:$0xff]  ;;  %v7484_v37 = vcombine.high %v1359_v17, %v1363_v21 }
 0x584   :  { %6134 = vmatprep.subr.bf16.mxu0 %v7914_v30  ;;  %v1343_v59 = vld [vmem:[#allocation2 + $0x4d8] sm:$0xff] }
 0x585   :  { %6199 = vmatpush1.bf16.msra.mxu1 %v7347_v53  ;;  %v1299_v53 = vld [vmem:[#allocation2 + $0x378] sm:$0xff] }
 0x586   :  { %6200 = vmatprep.subr.bf16.mxu1 %v7340_v38  ;;  %v7491_v38 = vcombine.low %v1367_v15, %v1371_v16  ;;  %v1335_v11 = vld [vmem:[#allocation2 + $0x498] sm:$0xff] }
 0x587   :  { %6135 = vmatpush2.bf16.msra.mxu0 %v7913_v28  ;;  %v1339_v25 = vld [vmem:[#allocation2 + $0x4b8] sm:$0xff] }
 0x588   :  { %6136 = vmatprep.subr.bf16.mxu0 %v7906_v40  ;;  %v1351_v40 = vld [vmem:[#allocation2 + $0x518] sm:$0xff]  ;;  %v7460_v15 = vcombine.high %v1335_v11, %v1339_v25 }
 0x589   :  { %6201 = vmatpush1.bf16.msra.mxu1 %v7339_v39  ;;  %v7420_v39 = vcombine.high %v1295_v26, %v1299_v53  ;;  %v1327_v18 = vld [vmem:[#allocation2 + $0x458] sm:$0xff] }
 0x58a   :  { %6202 = vmatprep.subr.bf16.mxu1 %v7332_v41  ;;  %v1355_v41 = vld [vmem:[#allocation2 + $0x538] sm:$0xff] }
 0x58b   :  { %6137 = vmatpush2.bf16.msra.mxu0 %v7905_v45  ;;  %v1291_v45 = vld [vmem:[#allocation2 + $0x338] sm:$0xff]  ;;  %v7476_v56 = vcombine.high %v1351_v40, %v1355_v41 }
 0x58c   :  { %6138 = vmatprep.subr.bf16.mxu0 %v7898_v51  ;;  %v7412_v58 = vcombine.high %v1287_v4, %v1291_v45  ;;  %v1331_v32 = vld [vmem:[#allocation2 + $0x478] sm:$0xff] }
 0x58d   :  { %6203 = vmatpush1.bf16.msra.mxu1 %v7331_v46 }
 0x58e   :  { %6204 = vmatprep.subr.bf16.mxu1 %v7324_v52  ;;  %v7419_v52 = vcombine.low %v1295_v26, %v1299_v53  ;;  %v1323_v26 = vld [vmem:[#allocation2 + $0x438] sm:$0xff] }
 0x58f   :  { %6139 = vmatpush2.bf16.msra.mxu0 %v7897_v49  ;;  %v1347_v49 = vld [vmem:[#allocation2 + $0x4f8] sm:$0xff] }
 0x590   :  { %6140 = vmatprep.subr.bf16.mxu0 %v7890_v61  ;;  %v7475_v61 = vcombine.low %v1351_v40, %v1355_v41  ;;  %v7468_v2 = vcombine.high %v1343_v59, %v1347_v49  ;;  %v1255_v53 = vld [vmem:[#allocation2 + $0x218] sm:$0xff] }
 0x591   :  { %6205 = vmatpush1.bf16.msra.mxu1 %v7323_v13  ;;  %v1279_v13 = vld [vmem:[#allocation2 + $0x2d8] sm:$0xff] }
 0x592   :  { %6206 = vmatprep.subr.bf16.mxu1 %v7316_v62  ;;  %v7411_v62 = vcombine.low %v1287_v4, %v1291_v45  ;;  %v1507_v40 = vld [vmem:[#allocation2 + $0x9f8] sm:$0xff] }
 0x593   :  { %6141 = vmatpush2.bf16.msra.mxu0 %v7889_v23  ;;  %v1271_v23 = vld [vmem:[#allocation2 + $0x298] sm:$0xff] }
 0x594   :  { %6233 = vmatprep.subr.bf16.mxu0 %v7500_v27  ;;  %v7467_v27 = vcombine.low %v1343_v59, %v1347_v49  ;;  %v1431_v45 = vld [vmem:[#allocation2 + $0x798] sm:$0xff] }
 0x595   :  { %6207 = vmatpush1.bf16.msra.mxu1 %v7315_v14  ;;  %v1275_v14 = vld [vmem:[#allocation2 + $0x2b8] sm:$0xff] }
 0x596   :  { %6208 = vmatprep.subr.bf16.mxu1 %v7436_v36  ;;  %v5939_v22 = vpop.f32.mrf.mxu0  ;;  %6143 = vmatmul.mubr.bf16.vlgmr.msra.gmra.mxu0 %v9114_v6  ;;  %v7396_v16 = vcombine.high %v1271_v23, %v1275_v14  ;;  %v1423_v59 = vld [vmem:[#allocation2 + $0x758] sm:$0xff] }
 0x597   :  { %6234 = vmatpush1.bf16.msra.mxu0 %v7499_v19  ;;  %6265 = vmatprep.mubr.bf16.mxu0 %v9104_v55  ;;  %v1263_v19 = vld [vmem:[#allocation2 + $0x258] sm:$0xff] }
 0x598   :  { %v5898_v30 = vpop.f32.mrf.mxu1  ;;  %v5941_v33 = vpop.f32.mrf.mxu0  ;;  %6235 = vmatprep.subr.bf16.mxu0 %v7492_v20  ;;  %v7459_v20 = vcombine.low %v1335_v11, %v1339_v25  ;;  %v1427_v49 = vld [vmem:[#allocation2 + $0x778] sm:$0xff] }
 0x599   :  { %v5899_v31 = vadd.f32 %v5898_v30, %v9197_v0  ;;  %6209 = vmatpush2.bf16.msra.mxu1 %v7435_v34  ;;  %v7483_v0 = vcombine.low %v1359_v17, %v1363_v21  ;;  %v1267_v34 = vld [vmem:[#allocation2 + $0x278] sm:$0xff]  ;;  %v7452_v17 = vcombine.high %v1327_v18, %v1331_v32 }
 0x59a   :  { %v5900_v28 = vpop.f32.mrf.mxu1  ;;  %6210 = vmatprep.subr.bf16.mxu1 %v7428_v29  ;;  %v5943_v44 = vpop.f32.mrf.mxu0  ;;  %v7395_v29 = vcombine.low %v1271_v23, %v1275_v14  ;;  %v7388_v21 = vcombine.high %v1263_v19, %v1267_v34  ;;  %v1259_v30 = vld [vmem:[#allocation2 + $0x238] sm:$0xff] }
 0x59b   :  { %v9207_v42 = vadd.f32 %v5939_v22, %v5899_v31  ;;  %v5901_v43 = vadd.f32 %v5900_v28, %v9201_v12  ;;  %6236 = vmatpush1.bf16.msra.mxu0 %v7491_v38  ;;  %v1283_v12 = vld [vmem:[#allocation2 + $0x2f8] sm:$0xff]  ;;  %v7451_v38 = vcombine.low %v1327_v18, %v1331_v32  ;;  %v7387_v31 = vcombine.low %v1263_v19, %v1267_v34 }
 0x59c   :  { %v5902_v55 = vpop.f32.mrf.mxu1  ;;  %v5944_v51 = vpop.f32.mrf.mxu0  ;;  %6237 = vmatprep.subr.bf16.mxu0 %v7484_v37  ;;  %v7404_v5 = vcombine.high %v1279_v13, %v1283_v12  ;;  %v7403_v36 = vcombine.low %v1279_v13, %v1283_v12  ;;  %v1319_v22 = vld [vmem:[#allocation2 + $0x418] sm:$0xff] }
 0x59d   :  { %v9210_v46 = vadd.f32 %v5941_v33, %v5901_v43  ;;  %6211 = vmatpush2.bf16.msra.mxu1 %v7427_v35  ;;  %v7444_v33 = vcombine.high %v1319_v22, %v1323_v26  ;;  %v7380_v35 = vcombine.high %v1255_v53, %v1259_v30  ;;  %v1439_v37 = vld [vmem:[#allocation2 + $0x7d8] sm:$0xff]  ;;  %v7443_v41 = vcombine.low %v1319_v22, %v1323_v26 }
 0x59e   :  { %v5903_v57 = vpop.f32.mrf.mxu1  ;;  %6212 = vmatprep.subr.bf16.mxu1 %v7420_v39  ;;  %v1443_v28 = vld [vmem:[#allocation2 + $0x7f8] sm:$0xff]  ;;  %v7379_v43 = vcombine.low %v1255_v53, %v1259_v30  ;;  %vm6440_vm8 = vcmp.gt.f32.partialorder %v9207_v42, 0.0 }
 0x59f   :  { %6238 = vmatpush1.bf16.msra.mxu0 %v7483_v0  ;;  %v1503_v39 = vld [vmem:[#allocation2 + $0x9d8] sm:$0xff]  ;;  %v7564_v44 = vcombine.high %v1439_v37, %v1443_v28  ;;  %vm6441_vm6 = vcmp.gt.f32.partialorder %v9210_v46, 0.0 }
 0x5a0   :  { %6239 = vmatprep.subr.bf16.mxu0 %v7476_v56  ;;  %v7628_v4 = vcombine.high %v1503_v39, %v1507_v40  ;;  %v1435_v55 = vld [vmem:[#allocation2 + $0x7b8] sm:$0xff]  ;;  %v7627_v56 = vcombine.low %v1503_v39, %v1507_v40 }
 0x5a1   :  { %6213 = vmatpush2.bf16.msra.mxu1 %v7419_v52  ;;  %v1495_v0 = vld [vmem:[#allocation2 + $0x998] sm:$0xff]  ;;  %v7563_v52 = vcombine.low %v1439_v37, %v1443_v28  ;;  %v7556_v57 = vcombine.high %v1431_v45, %v1435_v55 }
 0x5a2   :  { %6214 = vmatprep.subr.bf16.mxu1 %v7412_v58  ;;  %v1499_v51 = vld [vmem:[#allocation2 + $0x9b8] sm:$0xff] }
 0x5a3   :  { %6240 = vmatpush1.bf16.msra.mxu0 %v7475_v61  ;;  %v7620_v58 = vcombine.high %v1495_v0, %v1499_v51  ;;  %v1487_v13 = vld [vmem:[#allocation2 + $0x958] sm:$0xff]  ;;  %v7555_v61 = vcombine.low %v1431_v45, %v1435_v55 }
 0x5a4   :  { %6241 = vmatprep.subr.bf16.mxu0 %v7468_v2  ;;  %v1491_v12 = vld [vmem:[#allocation2 + $0x978] sm:$0xff]  ;;  %v7548_v2 = vcombine.high %v1423_v59, %v1427_v49 }
 0x5a5   :  { %6215 = vmatpush2.bf16.msra.mxu1 %v7411_v62  ;;  %v7619_v62 = vcombine.low %v1495_v0, %v1499_v51  ;;  %v1415_v11 = vld [vmem:[#allocation2 + $0x718] sm:$0xff] }
 0x5a6   :  { %6216 = vmatprep.subr.bf16.mxu1 %v7404_v5  ;;  %v7612_v5 = vcombine.high %v1487_v13, %v1491_v12  ;;  %v1419_v25 = vld [vmem:[#allocation2 + $0x738] sm:$0xff] }
 0x5a7   :  { %6242 = vmatpush1.bf16.msra.mxu0 %v7467_v27  ;;  %v1479_v23 = vld [vmem:[#allocation2 + $0x918] sm:$0xff]  ;;  %v7547_v27 = vcombine.low %v1423_v59, %v1427_v49  ;;  %v7539_v34 = vcombine.low %v1415_v11, %v1419_v25 }
 0x5a8   :  { %6243 = vmatprep.subr.bf16.mxu0 %v7460_v15  ;;  %v1483_v14 = vld [vmem:[#allocation2 + $0x938] sm:$0xff] }
 0x5a9   :  { %6217 = vmatpush2.bf16.msra.mxu1 %v7403_v36  ;;  %v7611_v36 = vcombine.low %v1487_v13, %v1491_v12  ;;  %v7604_v15 = vcombine.high %v1479_v23, %v1483_v14  ;;  %v1411_v18 = vld [vmem:[#allocation2 + $0x6f8] sm:$0xff]  ;;  %v1912_v12 = vsub.s32 4, %v8872_v24 }
 0x5aa   :  { %6218 = vmatprep.subr.bf16.mxu1 %v7396_v16  ;;  %v1407_v16 = vld [vmem:[#allocation2 + $0x6d8] sm:$0xff] }
 0x5ab   :  { %6244 = vmatpush1.bf16.msra.mxu0 %v7459_v20  ;;  %v1471_v32 = vld [vmem:[#allocation2 + $0x8d8] sm:$0xff]  ;;  %v7603_v20 = vcombine.low %v1479_v23, %v1483_v14  ;;  %v7531_v53 = vcombine.low %v1407_v16, %v1411_v18 }
 0x5ac   :  { %6245 = vmatprep.subr.bf16.mxu0 %v7452_v17  ;;  %v1475_v19 = vld [vmem:[#allocation2 + $0x8f8] sm:$0xff] }
 0x5ad   :  { %6219 = vmatpush2.bf16.msra.mxu1 %v7395_v29  ;;  %v7596_v29 = vcombine.high %v1471_v32, %v1475_v19  ;;  %v1399_v17 = vld [vmem:[#allocation2 + $0x698] sm:$0xff]  ;;  %v7595_v30 = vcombine.low %v1471_v32, %v1475_v19 }
 0x5ae   :  { %6220 = vmatprep.subr.bf16.mxu1 %v7388_v21  ;;  %v1403_v21 = vld [vmem:[#allocation2 + $0x6b8] sm:$0xff] }
 0x5af   :  { %6246 = vmatpush1.bf16.msra.mxu0 %v7451_v38  ;;  %v1463_v22 = vld [vmem:[#allocation2 + $0x898] sm:$0xff]  ;;  %v7524_v38 = vcombine.high %v1399_v17, %v1403_v21  ;;  %v7523_v39 = vcombine.low %v1399_v17, %v1403_v21 }
 0x5b0   :  { %6247 = vmatprep.subr.bf16.mxu0 %v7444_v33  ;;  %v1467_v26 = vld [vmem:[#allocation2 + $0x8b8] sm:$0xff] }
 0x5b1   :  { %6221 = vmatpush2.bf16.msra.mxu1 %v7387_v31  ;;  %v7588_v31 = vcombine.high %v1463_v22, %v1467_v26  ;;  %v1391_v33 = vld [vmem:[#allocation2 + $0x658] sm:$0xff]  ;;  %v7587_v40 = vcombine.low %v1463_v22, %v1467_v26 }
 0x5b2   :  { %6222 = vmatprep.subr.bf16.mxu1 %v7380_v35  ;;  %v1395_v35 = vld [vmem:[#allocation2 + $0x678] sm:$0xff] }
 0x5b3   :  { %6248 = vmatpush1.bf16.msra.mxu0 %v7443_v41  ;;  %v1455_v37 = vld [vmem:[#allocation2 + $0x858] sm:$0xff]  ;;  %v7516_v41 = vcombine.high %v1391_v33, %v1395_v35  ;;  %v7515_v0 = vcombine.low %v1391_v33, %v1395_v35 }
 0x5b4   :  { %6249 = vmatprep.subr.bf16.mxu0 %v7564_v44  ;;  %v1459_v28 = vld [vmem:[#allocation2 + $0x878] sm:$0xff] }
 0x5b5   :  { %6223 = vmatpush2.bf16.msra.mxu1 %v7379_v43  ;;  %v7580_v43 = vcombine.high %v1455_v37, %v1459_v28  ;;  %v1383_v44 = vld [vmem:[#allocation2 + $0x618] sm:$0xff]  ;;  %v7579_v51 = vcombine.low %v1455_v37, %v1459_v28 }
 0x5b6   :  { %6274 = vmatprep.subr.bf16.mxu1 %v7628_v4  ;;  %v1387_v4 = vld [vmem:[#allocation2 + $0x638] sm:$0xff] }
 0x5b7   :  { %6250 = vmatpush2.bf16.msra.mxu0 %v7563_v52  ;;  %v1447_v45 = vld [vmem:[#allocation2 + $0x818] sm:$0xff]  ;;  %v7508_v52 = vcombine.high %v1383_v44, %v1387_v4  ;;  %v7507_v13 = vcombine.low %v1383_v44, %v1387_v4 }
 0x5b8   :  { %6225 = vmatmul.mubr.bf16.vlgmr.msra.gmra.mxu1 %v9096_v47  ;;  %6251 = vmatprep.subr.bf16.mxu0 %v7556_v57  ;;  %v7540_v47 = vcombine.high %v1415_v11, %v1419_v25  ;;  %v1451_v55 = vld [vmem:[#allocation2 + $0x838] sm:$0xff] }
 0x5b9   :  { %6275 = vmatpush1.bf16.msra.mxu1 %v7627_v56  ;;  %6306 = vmatprep.mubr.bf16.mxu1 %v9108_v63  ;;  %v7532_v63 = vcombine.high %v1407_v16, %v1411_v18  ;;  %v7572_v56 = vcombine.high %v1447_v45, %v1451_v55  ;;  %v1631_v57 = vld [vmem:[#allocation2 + $0xdd8] sm:$0xff] }
 0x5ba   :  { %6276 = vmatprep.subr.bf16.mxu1 %v7620_v58  ;;  %v1635_v58 = vld [vmem:[#allocation2 + $0xdf8] sm:$0xff] }
 0x5bb   :  { %6252 = vmatpush2.bf16.msra.mxu0 %v7555_v61  ;;  %v1567_v59 = vld [vmem:[#allocation2 + $0xbd8] sm:$0xff]  ;;  %v7571_v61 = vcombine.low %v1447_v45, %v1451_v55 }
 0x5bc   :  { %6253 = vmatprep.subr.bf16.mxu0 %v7548_v2  ;;  %v1571_v49 = vld [vmem:[#allocation2 + $0xbf8] sm:$0xff] }
 0x5bd   :  { %6277 = vmatpush1.bf16.msra.mxu1 %v7619_v62  ;;  %v7756_v62 = vcombine.high %v1631_v57, %v1635_v58  ;;  %v7692_v2 = vcombine.high %v1567_v59, %v1571_v49  ;;  %v1623_v11 = vld [vmem:[#allocation2 + $0xd98] sm:$0xff] }
 0x5be   :  { %6278 = vmatprep.subr.bf16.mxu1 %v7612_v5  ;;  %v1916_v5 = vsub.s32 5, %v8872_v24  ;;  %v1627_v25 = vld [vmem:[#allocation2 + $0xdb8] sm:$0xff] }
 0x5bf   :  { %6254 = vmatpush2.bf16.msra.mxu0 %v7547_v27  ;;  %v1559_v23 = vld [vmem:[#allocation2 + $0xb98] sm:$0xff]  ;;  %v9216_v27 = vld [vmem:[#allocation14] sm:$0xff]  ;;  %v7748_v16 = vcombine.high %v1623_v11, %v1627_v25  ;;  %v7747_v22 = vcombine.low %v1623_v11, %v1627_v25 }
 0x5c0   :  { %6255 = vmatprep.subr.bf16.mxu0 %v7540_v47  ;;  %v1563_v14 = vld [vmem:[#allocation2 + $0xbb8] sm:$0xff]  ;;  %v7755_v47 = vcombine.low %v1631_v57, %v1635_v58  ;;  %v1917_v18 = vrot.slane %v9216_v27, %v1916_v5 }
 0x5c1   :  { %6279 = vmatpush1.bf16.msra.mxu1 %v7611_v36  ;;  %v1913_v36 = vrot.slane %v9216_v27, %v1912_v12  ;;  %v7684_v32 = vcombine.high %v1559_v23, %v1563_v14  ;;  %v1615_v19 = vld [vmem:[#allocation2 + $0xd58] sm:$0xff] }
 0x5c2   :  { %6280 = vmatprep.subr.bf16.mxu1 %v7604_v15  ;;  %v7691_v15 = vcombine.low %v1567_v59, %v1571_v49  ;;  %v1611_v37 = vld [vmem:[#allocation2 + $0xd38] sm:$0xff] }
 0x5c3   :  { %6256 = vmatpush2.bf16.msra.mxu0 %v7539_v34  ;;  %v1619_v34 = vld [vmem:[#allocation2 + $0xd78] sm:$0xff] }
 0x5c4   :  { %6257 = vmatprep.subr.bf16.mxu0 %v7532_v63  ;;  %v1551_v63 = vld [vmem:[#allocation2 + $0xb58] sm:$0xff] }
 0x5c5   :  { %6281 = vmatpush1.bf16.msra.mxu1 %v7603_v20  ;;  %v1539_v57 = vld [vmem:[#allocation2 + $0xaf8] sm:$0xff] }
 0x5c6   :  { %6282 = vmatprep.subr.bf16.mxu1 %v7596_v29  ;;  %v1555_v29 = vld [vmem:[#allocation2 + $0xb78] sm:$0xff] }
 0x5c7   :  { %6258 = vmatpush2.bf16.msra.mxu0 %v7531_v53  ;;  %v7683_v53 = vcombine.low %v1559_v23, %v1563_v14  ;;  %v7676_v35 = vcombine.high %v1551_v63, %v1555_v29  ;;  %v7675_v4 = vcombine.low %v1551_v63, %v1555_v29  ;;  %v1591_v12 = vld [vmem:[#allocation2 + $0xc98] sm:$0xff] }
 0x5c8   :  { %6259 = vmatprep.subr.bf16.mxu0 %v7524_v38  ;;  %v1583_v14 = vld [vmem:[#allocation2 + $0xc58] sm:$0xff] }
 0x5c9   :  { %6283 = vmatpush1.bf16.msra.mxu1 %v7595_v30  ;;  %v7740_v30 = vcombine.high %v1615_v19, %v1619_v34  ;;  %v1511_v63 = vld [vmem:[#allocation2 + $0xa18] sm:$0xff] }
 0x5ca   :  { %6284 = vmatprep.subr.bf16.mxu1 %v7588_v31  ;;  %v1515_v29 = vld [vmem:[#allocation2 + $0xa38] sm:$0xff] }
 0x5cb   :  { %6260 = vmatpush2.bf16.msra.mxu0 %v7523_v39  ;;  %v1543_v39 = vld [vmem:[#allocation2 + $0xb18] sm:$0xff] }
 0x5cc   :  { %6261 = vmatprep.subr.bf16.mxu0 %v7516_v41 }
 0x5cd   :  { %6285 = vmatpush1.bf16.msra.mxu1 %v7587_v40  ;;  %v1547_v40 = vld [vmem:[#allocation2 + $0xb38] sm:$0xff] }
 0x5ce   :  { %6286 = vmatprep.subr.bf16.mxu1 %v7580_v43  ;;  %v7667_v59 = vcombine.low %v1543_v39, %v1547_v40 }
 0x5cf   :  { %6262 = vmatpush2.bf16.msra.mxu0 %v7515_v0  ;;  %v7668_v0 = vcombine.high %v1543_v39, %v1547_v40  ;;  %v1687_v39 = vld [vmem:[#allocation2 + $0xf98] sm:$0xff] }
 0x5d0   :  { %6263 = vmatprep.subr.bf16.mxu0 %v7508_v52  ;;  %v1603_v52 = vld [vmem:[#allocation2 + $0xcf8] sm:$0xff] }
 0x5d1   :  { %6287 = vmatpush1.bf16.msra.mxu1 %v7579_v51  ;;  %v1599_v51 = vld [vmem:[#allocation2 + $0xcd8] sm:$0xff] }
 0x5d2   :  { %6288 = vmatprep.subr.bf16.mxu1 %v7572_v56  ;;  %v1535_v56 = vld [vmem:[#allocation2 + $0xad8] sm:$0xff]  ;;  %v7724_v49 = vcombine.high %v1599_v51, %v1603_v52  ;;  %v7723_v5 = vcombine.low %v1599_v51, %v1603_v52 }
 0x5d3   :  { %6264 = vmatpush2.bf16.msra.mxu0 %v7507_v13  ;;  %v7660_v13 = vcombine.high %v1535_v56, %v1539_v57  ;;  %v7659_v11 = vcombine.low %v1535_v56, %v1539_v57  ;;  %v1691_v40 = vld [vmem:[#allocation2 + $0xfb8] sm:$0xff] }
 0x5d4   :  { %6315 = vmatprep.subr.bf16.mxu0 %v7756_v62  ;;  %v1527_v62 = vld [vmem:[#allocation2 + $0xa98] sm:$0xff]  ;;  %v7811_v57 = vcombine.low %v1687_v39, %v1691_v40 }
 0x5d5   :  { %6289 = vmatpush1.bf16.msra.mxu1 %v7571_v61  ;;  %v1595_v61 = vld [vmem:[#allocation2 + $0xcb8] sm:$0xff] }
 0x5d6   :  { %6290 = vmatprep.subr.bf16.mxu1 %v7692_v2  ;;  %v5980_v20 = vpop.f32.mrf.mxu0  ;;  %6266 = vmatmul.mubr.bf16.vlgmr.msra.gmra.mxu0 %v9101_v54  ;;  %v1607_v54 = vld [vmem:[#allocation2 + $0xd18] sm:$0xff]  ;;  %v7716_v25 = vcombine.high %v1591_v12, %v1595_v61 }
 0x5d7   :  { %v5981_v17 = vadd.f32 %v5980_v20, %v1913_v36  ;;  %6316 = vmatpush1.bf16.msra.mxu0 %v7755_v47  ;;  %6347 = vmatprep.mubr.bf16.mxu0 %v9112_v3  ;;  %v7739_v3 = vcombine.low %v1615_v19, %v1619_v34  ;;  %v7732_v45 = vcombine.high %v1607_v54, %v1611_v37  ;;  %v1531_v2 = vld [vmem:[#allocation2 + $0xab8] sm:$0xff] }
 0x5d8   :  { %v6021_v21 = vpop.f32.mrf.mxu1  ;;  %v5982_v26 = vpop.f32.mrf.mxu0  ;;  %6317 = vmatprep.subr.bf16.mxu0 %v7748_v16  ;;  %v7731_v58 = vcombine.low %v1607_v54, %v1611_v37  ;;  %v7652_v23 = vcombine.high %v1527_v62, %v1531_v2  ;;  %v1587_v36 = vld [vmem:[#allocation2 + $0xc78] sm:$0xff]  ;;  %v7715_v16 = vcombine.low %v1591_v12, %v1595_v61  ;;  %v7635_v54 = vcombine.low %v1511_v63, %v1515_v29 }
 0x5d9   :  { %6291 = vmatpush2.bf16.msra.mxu1 %v7691_v15  ;;  %v9222_v38 = vadd.f32 %v6021_v21, %v5981_v17  ;;  %v5983_v31 = vadd.f32 %v5982_v26, %v1917_v18  ;;  %v1519_v47 = vld [vmem:[#allocation2 + $0xa58] sm:$0xff]  ;;  %v7651_v18 = vcombine.low %v1527_v62, %v1531_v2  ;;  %v7707_v17 = vcombine.low %v1583_v14, %v1587_v36 }
 0x5da   :  { %v6023_v33 = vpop.f32.mrf.mxu1  ;;  %6292 = vmatprep.subr.bf16.mxu1 %v7684_v32  ;;  %v5984_v28 = vpop.f32.mrf.mxu0  ;;  %v1523_v15 = vld [vmem:[#allocation2 + $0xa78] sm:$0xff]  ;;  %v7708_v32 = vcombine.high %v1583_v14, %v1587_v36  ;;  %v7636_v26 = vcombine.high %v1511_v63, %v1515_v29 }
 0x5db   :  { %v9224_v41 = vadd.f32 %v6023_v33, %v5983_v31  ;;  %6318 = vmatpush1.bf16.msra.mxu0 %v7747_v22  ;;  %v7644_v19 = vcombine.high %v1519_v47, %v1523_v15  ;;  %v1575_v34 = vld [vmem:[#allocation2 + $0xc18] sm:$0xff]  ;;  %v7643_v21 = vcombine.low %v1519_v47, %v1523_v15 }
 0x5dc   :  { %v6025_v43 = vpop.f32.mrf.mxu1  ;;  %v5985_v44 = vpop.f32.mrf.mxu0  ;;  %6319 = vmatprep.subr.bf16.mxu0 %v7740_v30  ;;  %v1579_v20 = vld [vmem:[#allocation2 + $0xc38] sm:$0xff] }
 0x5dd   :  { %6293 = vmatpush2.bf16.msra.mxu1 %v7683_v53  ;;  %v7700_v22 = vcombine.high %v1575_v34, %v1579_v20  ;;  %v1695_v53 = vld [vmem:[#allocation2 + $0xfd8] sm:$0xff] }
 0x5de   :  { %v6026_v55 = vpop.f32.mrf.mxu1  ;;  %6294 = vmatprep.subr.bf16.mxu1 %v7676_v35  ;;  %v1699_v30 = vld [vmem:[#allocation2 + $0xff8] sm:$0xff]  ;;  %v7699_v35 = vcombine.low %v1575_v34, %v1579_v20 }
 0x5df   :  { %6320 = vmatpush1.bf16.msra.mxu0 %v7739_v3  ;;  %v1759_v31 = vld [vmem:[#allocation2 + $0x11d8] sm:$0xff]  ;;  %v7820_v37 = vcombine.high %v1695_v53, %v1699_v30  ;;  %v7819_v44 = vcombine.low %v1695_v53, %v1699_v30 }
 0x5e0   :  { %6321 = vmatprep.subr.bf16.mxu0 %v7732_v45  ;;  %v1763_v33 = vld [vmem:[#allocation2 + $0x11f8] sm:$0xff]  ;;  %v7812_v45 = vcombine.high %v1687_v39, %v1691_v40 }
 0x5e1   :  { %6295 = vmatpush2.bf16.msra.mxu1 %v7675_v4  ;;  %v7884_v28 = vcombine.high %v1759_v31, %v1763_v33  ;;  %v1751_v43 = vld [vmem:[#allocation2 + $0x1198] sm:$0xff]  ;;  %v7883_v4 = vcombine.low %v1759_v31, %v1763_v33 }
 0x5e2   :  { %6296 = vmatprep.subr.bf16.mxu1 %v7668_v0  ;;  %v1755_v3 = vld [vmem:[#allocation2 + $0x11b8] sm:$0xff] }
 0x5e3   :  { %6322 = vmatpush1.bf16.msra.mxu0 %v7731_v58  ;;  %v7876_v55 = vcombine.high %v1751_v43, %v1755_v3  ;;  %v1679_v0 = vld [vmem:[#allocation2 + $0xf58] sm:$0xff]  ;;  %v7875_v58 = vcombine.low %v1751_v43, %v1755_v3 }
 0x5e4   :  { %6323 = vmatprep.subr.bf16.mxu0 %v7724_v49  ;;  %v1683_v51 = vld [vmem:[#allocation2 + $0xf78] sm:$0xff] }
 0x5e5   :  { %6297 = vmatpush2.bf16.msra.mxu1 %v7667_v59  ;;  %v1743_v52 = vld [vmem:[#allocation2 + $0x1158] sm:$0xff]  ;;  %v7804_v59 = vcombine.high %v1679_v0, %v1683_v51  ;;  %v7803_v2 = vcombine.low %v1679_v0, %v1683_v51 }
 0x5e6   :  { %6298 = vmatprep.subr.bf16.mxu1 %v7660_v13  ;;  %v1747_v56 = vld [vmem:[#allocation2 + $0x1178] sm:$0xff] }
 0x5e7   :  { %6324 = vmatpush1.bf16.msra.mxu0 %v7723_v5  ;;  %v7868_v49 = vcombine.high %v1743_v52, %v1747_v56  ;;  %v1671_v13 = vld [vmem:[#allocation2 + $0xf18] sm:$0xff]  ;;  %v7867_v5 = vcombine.low %v1743_v52, %v1747_v56 }
 0x5e8   :  { %6325 = vmatprep.subr.bf16.mxu0 %v7716_v25  ;;  %v1675_v12 = vld [vmem:[#allocation2 + $0xf38] sm:$0xff] }
 0x5e9   :  { %6299 = vmatpush2.bf16.msra.mxu1 %v7659_v11  ;;  %v1735_v61 = vld [vmem:[#allocation2 + $0x1118] sm:$0xff]  ;;  %v7795_v47 = vcombine.low %v1671_v13, %v1675_v12 }
 0x5ea   :  { %6300 = vmatprep.subr.bf16.mxu1 %v7652_v23  ;;  %v1739_v62 = vld [vmem:[#allocation2 + $0x1138] sm:$0xff] }
 0x5eb   :  { %6326 = vmatpush1.bf16.msra.mxu0 %v7715_v16  ;;  %v7860_v11 = vcombine.high %v1735_v61, %v1739_v62  ;;  %v1663_v25 = vld [vmem:[#allocation2 + $0xed8] sm:$0xff]  ;;  %v7859_v15 = vcombine.low %v1735_v61, %v1739_v62 }
 0x5ec   :  { %6327 = vmatprep.subr.bf16.mxu0 %v7708_v32  ;;  %v1667_v23 = vld [vmem:[#allocation2 + $0xef8] sm:$0xff] }
 0x5ed   :  { %6301 = vmatpush2.bf16.msra.mxu1 %v7651_v18  ;;  %v1727_v14 = vld [vmem:[#allocation2 + $0x10d8] sm:$0xff]  ;;  %v7787_v20 = vcombine.low %v1663_v25, %v1667_v23 }
 0x5ee   :  { %6302 = vmatprep.subr.bf16.mxu1 %v7644_v19  ;;  %v1731_v36 = vld [vmem:[#allocation2 + $0x10f8] sm:$0xff] }
 0x5ef   :  { %6328 = vmatpush1.bf16.msra.mxu0 %v7707_v17  ;;  %v7852_v16 = vcombine.high %v1727_v14, %v1731_v36  ;;  %v1655_v18 = vld [vmem:[#allocation2 + $0xe98] sm:$0xff]  ;;  %v7851_v63 = vcombine.low %v1727_v14, %v1731_v36 }
 0x5f0   :  { %6329 = vmatprep.subr.bf16.mxu0 %v7700_v22  ;;  %v1659_v32 = vld [vmem:[#allocation2 + $0xeb8] sm:$0xff] }
 0x5f1   :  { %6303 = vmatpush2.bf16.msra.mxu1 %v7643_v21  ;;  %v1719_v19 = vld [vmem:[#allocation2 + $0x1098] sm:$0xff]  ;;  %v7780_v29 = vcombine.high %v1655_v18, %v1659_v32  ;;  %v7779_v30 = vcombine.low %v1655_v18, %v1659_v32 }
 0x5f2   :  { %6304 = vmatprep.subr.bf16.mxu1 %v7636_v26  ;;  %v1723_v34 = vld [vmem:[#allocation2 + $0x10b8] sm:$0xff] }
 0x5f3   :  { %6330 = vmatpush1.bf16.msra.mxu0 %v7699_v35  ;;  %v7844_v17 = vcombine.high %v1719_v19, %v1723_v34  ;;  %v1647_v21 = vld [vmem:[#allocation2 + $0xe58] sm:$0xff]  ;;  %v7843_v31 = vcombine.low %v1719_v19, %v1723_v34 }
 0x5f4   :  { %6331 = vmatprep.subr.bf16.mxu0 %v7820_v37  ;;  %v1651_v22 = vld [vmem:[#allocation2 + $0xe78] sm:$0xff] }
 0x5f5   :  { %6305 = vmatpush2.bf16.msra.mxu1 %v7635_v54  ;;  %v1711_v26 = vld [vmem:[#allocation2 + $0x1058] sm:$0xff]  ;;  %v7772_v33 = vcombine.high %v1647_v21, %v1651_v22  ;;  %v7771_v40 = vcombine.low %v1647_v21, %v1651_v22 }
 0x5f6   :  { %6356 = vmatprep.subr.bf16.mxu1 %v7884_v28  ;;  %v1715_v53 = vld [vmem:[#allocation2 + $0x1078] sm:$0xff] }
 0x5f7   :  { %6332 = vmatpush2.bf16.msra.mxu0 %v7819_v44  ;;  %v7836_v35 = vcombine.high %v1711_v26, %v1715_v53  ;;  %v1639_v54 = vld [vmem:[#allocation2 + $0xe18] sm:$0xff]  ;;  %v7835_v43 = vcombine.low %v1711_v26, %v1715_v53 }
 0x5f8   :  { %6307 = vmatmul.mubr.bf16.vlgmr.msra.gmra.mxu1 %v9106_v60  ;;  %6333 = vmatprep.subr.bf16.mxu0 %v7812_v45  ;;  %v7796_v60 = vcombine.high %v1671_v13, %v1675_v12  ;;  %v1643_v37 = vld [vmem:[#allocation2 + $0xe38] sm:$0xff] }
 0x5f9   :  { %6357 = vmatpush1.bf16.msra.mxu1 %v7883_v4  ;;  %6388 = vmatprep.mubr.bf16.mxu1 %v9118_v8  ;;  %v7788_v8 = vcombine.high %v1663_v25, %v1667_v23  ;;  %v1703_v28 = vld [vmem:[#allocation2 + $0x1018] sm:$0xff]  ;;  %v7764_v3 = vcombine.high %v1639_v54, %v1643_v37  ;;  %v7763_v51 = vcombine.low %v1639_v54, %v1643_v37 }
 0x5fa   :  { %6358 = vmatprep.subr.bf16.mxu1 %v7876_v55  ;;  %v1707_v39 = vld [vmem:[#allocation2 + $0x1038] sm:$0xff] }
 0x5fb   :  { %6334 = vmatpush2.bf16.msra.mxu0 %v7811_v57  ;;  %v7828_v44 = vcombine.high %v1703_v28, %v1707_v39  ;;  %v1887_v4 = vld [vmem:[#allocation2 + $0x15d8] sm:$0xff]  ;;  %v7827_v52 = vcombine.low %v1703_v28, %v1707_v39 }
 0x5fc   :  { %6335 = vmatprep.subr.bf16.mxu0 %v7804_v59  ;;  %v1891_v45 = vld [vmem:[#allocation2 + $0x15f8] sm:$0xff] }
 0x5fd   :  { %6359 = vmatpush1.bf16.msra.mxu1 %v7875_v58  ;;  %v1823_v55 = vld [vmem:[#allocation2 + $0x13d8] sm:$0xff]  ;;  %v8012_v56 = vcombine.high %v1887_v4, %v1891_v45  ;;  %v8011_v12 = vcombine.low %v1887_v4, %v1891_v45 }
 0x5fe   :  { %6360 = vmatprep.subr.bf16.mxu1 %v7868_v49  ;;  %v1827_v0 = vld [vmem:[#allocation2 + $0x13f8] sm:$0xff] }
 0x5ff   :  { %6336 = vmatpush2.bf16.msra.mxu0 %v7803_v2  ;;  %v7948_v57 = vcombine.high %v1823_v55, %v1827_v0  ;;  %v1879_v58 = vld [vmem:[#allocation2 + $0x1598] sm:$0xff]  ;;  %v7947_v61 = vcombine.low %v1823_v55, %v1827_v0 }
 0x600   :  { %6337 = vmatprep.subr.bf16.mxu0 %v7796_v60  ;;  %v1883_v59 = vld [vmem:[#allocation2 + $0x15b8] sm:$0xff] }
 0x601   :  { %6361 = vmatpush1.bf16.msra.mxu1 %v7867_v5  ;;  %v1815_v49 = vld [vmem:[#allocation2 + $0x1398] sm:$0xff]  ;;  %v8004_v62 = vcombine.high %v1879_v58, %v1883_v59 }
 0x602   :  { %6362 = vmatprep.subr.bf16.mxu1 %v7860_v11  ;;  %v1819_v13 = vld [vmem:[#allocation2 + $0x13b8] sm:$0xff] }
 0x603   :  { %6338 = vmatpush2.bf16.msra.mxu0 %v7795_v47  ;;  %v7940_v2 = vcombine.high %v1815_v49, %v1819_v13  ;;  %v1871_v5 = vld [vmem:[#allocation2 + $0x1558] sm:$0xff]  ;;  %v8003_v47 = vcombine.low %v1879_v58, %v1883_v59 }
 0x604   :  { %6339 = vmatprep.subr.bf16.mxu0 %v7788_v8  ;;  %v1875_v60 = vld [vmem:[#allocation2 + $0x1578] sm:$0xff]  ;;  %v7939_v8 = vcombine.low %v1815_v49, %v1819_v13 }
 0x605   :  { %6363 = vmatpush1.bf16.msra.mxu1 %v7859_v15  ;;  %v1807_v25 = vld [vmem:[#allocation2 + $0x1358] sm:$0xff] }
 0x606   :  { %6364 = vmatprep.subr.bf16.mxu1 %v7852_v16  ;;  %v1811_v23 = vld [vmem:[#allocation2 + $0x1378] sm:$0xff]  ;;  %v7996_v16 = vcombine.high %v1871_v5, %v1875_v60 }
 0x607   :  { %6340 = vmatpush2.bf16.msra.mxu0 %v7787_v20  ;;  %v1863_v19 = vld [vmem:[#allocation2 + $0x1518] sm:$0xff]  ;;  %v7931_v21 = vcombine.low %v1807_v25, %v1811_v23 }
 0x608   :  { %6341 = vmatprep.subr.bf16.mxu0 %v7780_v29  ;;  %v1867_v34 = vld [vmem:[#allocation2 + $0x1538] sm:$0xff] }
 0x609   :  { %6365 = vmatpush1.bf16.msra.mxu1 %v7851_v63  ;;  %v1799_v20 = vld [vmem:[#allocation2 + $0x1318] sm:$0xff]  ;;  %v7988_v22 = vcombine.high %v1863_v19, %v1867_v34  ;;  %v7987_v54 = vcombine.low %v1863_v19, %v1867_v34  ;;  %v8242_v34 = vld [vmem:[#allocation15 + $0xb8] sm:$0xff]  }
 0x60a   :  { %6366 = vmatprep.subr.bf16.mxu1 %v7844_v17  ;;  %v1803_v63 = vld [vmem:[#allocation2 + $0x1338] sm:$0xff] }
 0x60b   :  { %6342 = vmatpush2.bf16.msra.mxu0 %v7779_v30  ;;  %v7924_v53 = vcombine.high %v1799_v20, %v1803_v63  ;;  %v1855_v30 = vld [vmem:[#allocation2 + $0x14d8] sm:$0xff]  ;;  %v7923_v37 = vcombine.low %v1799_v20, %v1803_v63  ;;  %v8243_v20 = vld [vmem:[#allocation15 + $0x70] sm:$0xff]  }
 0x60c   :  { %6343 = vmatprep.subr.bf16.mxu0 %v7772_v33  ;;  %v1791_v33 = vld [vmem:[#allocation2 + $0x12d8] sm:$0xff] }
 0x60d   :  { %6367 = vmatpush1.bf16.msra.mxu1 %v7843_v31  ;;  %v1859_v31 = vld [vmem:[#allocation2 + $0x14f8] sm:$0xff] }
 0x60e   :  { %6368 = vmatprep.subr.bf16.mxu1 %v7836_v35  ;;  %v1795_v35 = vld [vmem:[#allocation2 + $0x12f8] sm:$0xff]  ;;  %v7980_v28 = vcombine.high %v1855_v30, %v1859_v31  ;;  %v7979_v4 = vcombine.low %v1855_v30, %v1859_v31 }
 0x60f   :  { %6344 = vmatpush2.bf16.msra.mxu0 %v7771_v40  ;;  %v7916_v39 = vcombine.high %v1791_v33, %v1795_v35  ;;  %v1847_v40 = vld [vmem:[#allocation2 + $0x1498] sm:$0xff]  ;;  %v7915_v45 = vcombine.low %v1791_v33, %v1795_v35 }
 0x610   :  { %6345 = vmatprep.subr.bf16.mxu0 %v7764_v3  ;;  %v1783_v3 = vld [vmem:[#allocation2 + $0x1298] sm:$0xff] }
 0x611   :  { %6369 = vmatpush1.bf16.msra.mxu1 %v7835_v43  ;;  %v1851_v43 = vld [vmem:[#allocation2 + $0x14b8] sm:$0xff] }
 0x612   :  { %6370 = vmatprep.subr.bf16.mxu1 %v7828_v44  ;;  %v1787_v44 = vld [vmem:[#allocation2 + $0x12b8] sm:$0xff]  ;;  %v7972_v55 = vcombine.high %v1847_v40, %v1851_v43  ;;  %v7971_v58 = vcombine.low %v1847_v40, %v1851_v43  ;;  %v8258_v40 = vld [vmem:[#allocation15 + $0x98] sm:$0xff]   ;;  %v8259_v43 = vld [vmem:[#allocation15 + $0x50] sm:$0xff]  }
 0x613   :  { %6346 = vmatpush2.bf16.msra.mxu0 %v7763_v51  ;;  %v7908_v0 = vcombine.high %v1783_v3, %v1787_v44  ;;  %v1839_v51 = vld [vmem:[#allocation2 + $0x1458] sm:$0xff]  ;;  %v7907_v59 = vcombine.low %v1783_v3, %v1787_v44  ;;  %v8260_v3 = vld [vmem:[#allocation15 + $0xd0] sm:$0xff]  }
 0x614   :  { %6397 = vmatprep.subr.bf16.mxu0 %v8012_v56  ;;  %v1775_v56 = vld [vmem:[#allocation2 + $0x1258] sm:$0xff]  ;;  %v8261_v44 = vld [vmem:[#allocation15 + $0x10] sm:$0xff]  }
 0x615   :  { %6371 = vmatpush1.bf16.msra.mxu1 %v7827_v52  ;;  %v1843_v52 = vld [vmem:[#allocation2 + $0x1478] sm:$0xff] }
 0x616   :  { %6372 = vmatprep.subr.bf16.mxu1 %v7948_v57  ;;  %v6062_v11 = vpop.f32.mrf.mxu0  ;;  %6348 = vmatmul.mubr.bf16.vlgmr.msra.gmra.mxu0 %v9110_v50  ;;  %v7932_v50 = vcombine.high %v1807_v25, %v1811_v23  ;;  %v1779_v57 = vld [vmem:[#allocation2 + $0x1278] sm:$0xff]  ;;  %v7964_v49 = vcombine.high %v1839_v51, %v1843_v52  ;;  %v6447_v23 = vmul.f32 0.2, %v9168_v10 }
 0x617   :  { %v6063_v14 = vadd.f32 %v6062_v11, %v9222_v38  ;;  %6398 = vmatpush1.bf16.msra.mxu0 %v8011_v12  ;;  %6429 = vmatprep.mubr.bf16.mxu0 %v8493_v48  ;;  %v7995_v48 = vcombine.low %v1871_v5, %v1875_v60  ;;  %v7900_v13 = vcombine.high %v1775_v56, %v1779_v57  ;;  %v1831_v12 = vld [vmem:[#allocation2 + $0x1418] sm:$0xff] }
 0x618   :  { %v6103_v36 = vpop.f32.mrf.mxu1  ;;  %v9231_v15 = vpop.f32.mrf.mxu0  ;;  %6399 = vmatprep.subr.bf16.mxu0 %v8004_v62  ;;  %v1767_v62 = vld [vmem:[#allocation2 + $0x1218] sm:$0xff]  ;;  %v7963_v5 = vcombine.low %v1839_v51, %v1843_v52  ;;  %v7899_v60 = vcombine.low %v1775_v56, %v1779_v57  ;;  %v6455_v19 = vsel %vm6439_vm5, %v9168_v10, %v6447_v23  ;;  %v8246_v10 = vld [vmem:[#allocation15 + $0xb0] sm:$0xff]   ;;  %v6446_v56 = vmul.f32 0.2, %v9164_v9 }
 0x619   :  { %6373 = vmatpush2.bf16.msra.mxu1 %v7947_v61  ;;  %v9233_v18 = vadd.f32 %v6103_v36, %v6063_v14  ;;  %v1835_v61 = vld [vmem:[#allocation2 + $0x1438] sm:$0xff]  ;;  %v6449_v36 = vmul.f32 0.2, %v9210_v46  ;;  %v6463_v63 = vpack.c.bf16 %v6455_v19, %v6455_v19  ;;  %v8288_v19 = vld [vmem:[#allocation15 + $0x1b8] sm:$0xff]  }
 0x61a   :  { %v9235_v32 = vpop.f32.mrf.mxu1  ;;  %6374 = vmatprep.subr.bf16.mxu1 %v7940_v2  ;;  %v6066_v38 = vpop.f32.mrf.mxu0  ;;  %v1771_v2 = vld [vmem:[#allocation2 + $0x1238] sm:$0xff]  ;;  %v7956_v11 = vcombine.high %v1831_v12, %v1835_v61  ;;  %v7955_v14 = vcombine.low %v1831_v12, %v1835_v61  ;;  %v6454_v12 = vsel %vm6438_vm7, %v9164_v9, %v6446_v56  ;;  %v8274_v9 = vld [vmem:[#allocation15 + $0x130] sm:$0xff]   ;;  %v1920_v56 = vsub.s32 6, %v8872_v24 }
 0x61b   :  { %6400 = vmatpush1.bf16.msra.mxu0 %v8003_v47  ;;  %v7892_v25 = vcombine.high %v1767_v62, %v1771_v2  ;;  %v7891_v47 = vcombine.low %v1767_v62, %v1771_v2  ;;  %v6457_v38 = vsel %vm6441_vm6, %v9210_v46, %v6449_v36  ;;  %v8248_v46 = vld [vmem:[#allocation15 + $0xe8] sm:$0xff]   ;;  %v8252_v33 = vld [vmem:[#allocation15 + $0xe0] sm:$0xff]   ;;  %v6065_v62 = vadd.f32 %v9231_v15, %v9224_v41  ;;  %v8272_v2 = vld [vmem:[#allocation15 + $0x138] sm:$0xff]  }
 0x61c   :  { %v6107_v29 = vpop.f32.mrf.mxu1  ;;  %v6067_v17 = vpop.f32.mrf.mxu0  ;;  %6401 = vmatprep.subr.bf16.mxu0 %v7996_v16  ;;  %v8240_v16 = vld [vmem:[#allocation15 + $0xf8] sm:$0xff]   ;;  %v8250_v30 = vld [vmem:[#allocation15 + $0xa8] sm:$0xff]   ;;  %v8253_v35 = vld [vmem:[#allocation15 + $0x20] sm:$0xff]  }
 0x61d   :  { %6375 = vmatpush2.bf16.msra.mxu1 %v7939_v8  ;;  %v8239_v8 = vld [vmem:[#allocation15 + $0x78] sm:$0xff]   ;;  %v8244_v29 = vld [vmem:[#allocation15 + $0xf0] sm:$0xff]   ;;  %v6465_v17 = vpack.c.bf16 %v6457_v38, %v6457_v38  ;;  %v8266_v51 = vld [vmem:[#allocation15 + $0x88] sm:$0xff]   ;;  %v6106_v23 = vadd.f32 %v9235_v32, %v6065_v62 }
 0x61e   :  { %v6108_v26 = vpop.f32.mrf.mxu1  ;;  %6376 = vmatprep.subr.bf16.mxu1 %v7932_v50  ;;  %v8241_v50 = vld [vmem:[#allocation15 + $0x38] sm:$0xff]   ;;  %v8267_v52 = vld [vmem:[#allocation15 + $0x40] sm:$0xff]   ;;  %v8276_v15 = vld [vmem:[#allocation15 + $0x128] sm:$0xff]  }
 0x61f   :  { %6402 = vmatpush1.bf16.msra.mxu0 %v7995_v48  ;;  %v8268_v57 = vld [vmem:[#allocation15 + $0xc0] sm:$0xff]  }
 0x620   :  { %6403 = vmatprep.subr.bf16.mxu0 %v7988_v22  ;;  %v8247_v22 = vld [vmem:[#allocation15 + $0x68] sm:$0xff]  }
 0x621   :  { %6377 = vmatpush2.bf16.msra.mxu1 %v7931_v21  ;;  %v8245_v21 = vld [vmem:[#allocation15 + $0x30] sm:$0xff]  }
 0x622   :  { %6378 = vmatprep.subr.bf16.mxu1 %v7924_v53  ;;  %v8249_v53 = vld [vmem:[#allocation15 + $0x28] sm:$0xff]  }
 0x623   :  { %6404 = vmatpush1.bf16.msra.mxu0 %v7987_v54  ;;  %v8254_v54 = vld [vmem:[#allocation15 + $0xa0] sm:$0xff]  }
 0x624   :  { %6405 = vmatprep.subr.bf16.mxu0 %v7980_v28  ;;  %v8256_v28 = vld [vmem:[#allocation15 + $0xd8] sm:$0xff]  }
 0x625   :  { %6379 = vmatpush2.bf16.msra.mxu1 %v7923_v37  ;;  %v8255_v37 = vld [vmem:[#allocation15 + $0x58] sm:$0xff]  }
 0x626   :  { %6380 = vmatprep.subr.bf16.mxu1 %v7916_v39  ;;  %v8257_v39 = vld [vmem:[#allocation15 + $0x18] sm:$0xff]  }
 0x627   :  { %6406 = vmatpush1.bf16.msra.mxu0 %v7979_v4  ;;  %v8262_v4 = vld [vmem:[#allocation15 + $0x90] sm:$0xff]  }
 0x628   :  { %6407 = vmatprep.subr.bf16.mxu0 %v7972_v55  ;;  %v8264_v55 = vld [vmem:[#allocation15 + $0xc8] sm:$0xff]  }
 0x629   :  { %6381 = vmatpush2.bf16.msra.mxu1 %v7915_v45  ;;  %v8263_v45 = vld [vmem:[#allocation15 + $0x48] sm:$0xff]  }
 0x62a   :  { %6382 = vmatprep.subr.bf16.mxu1 %v7908_v0  ;;  %v8265_v0 = vld [vmem:[#allocation15 + $0x8] sm:$0xff]  }
 0x62b   :  { %6408 = vmatpush1.bf16.msra.mxu0 %v7971_v58  ;;  %v6448_v58 = vmul.f32 0.2, %v9207_v42 }
 0x62c   :  { %6409 = vmatprep.subr.bf16.mxu0 %v7964_v49  ;;  %v8270_v49 = vld [vmem:[#allocation15 + $0x80] sm:$0xff]  }
 0x62d   :  { %6383 = vmatpush2.bf16.msra.mxu1 %v7907_v59  ;;  %v8269_v59 = vld [vmem:[#allocation15] sm:$0xff]   ;;  %v6456_v61 = vsel %vm6440_vm8, %v9207_v42, %v6448_v58  ;;  %v8275_v42 = vld [vmem:[#allocation15 + $0x168] sm:$0xff]   ;;  %v1921_v58 = vrot.slane %v9216_v27, %v1920_v56 }
 0x62e   :  { %6384 = vmatprep.subr.bf16.mxu1 %v7900_v13  ;;  %v8271_v13 = vld [vmem:[#allocation15 + $0x178] sm:$0xff]  }
 0x62f   :  { %6410 = vmatpush1.bf16.msra.mxu0 %v7963_v5  ;;  %v6462_v5 = vpack.c.bf16 %v6454_v12, %v6454_v12 }
 0x630   :  { %6411 = vmatprep.subr.bf16.mxu0 %v7956_v11  ;;  %v6464_v11 = vpack.c.bf16 %v6456_v61, %v6456_v61 }
 0x631   :  { %6385 = vmatpush2.bf16.msra.mxu1 %v7899_v60  ;;  %v8273_v60 = vld [vmem:[#allocation15 + $0x170] sm:$0xff]  }
 0x632   :  { %6386 = vmatprep.subr.bf16.mxu1 %v7892_v25 }
 0x633   :  { %6412 = vmatpush1.bf16.msra.mxu0 %v7955_v14 }
 0x634   :  { %8080 = vmatprep.subr.bf16.mxu0 %v8239_v8  ;;  %v8277_v8 = vld [vmem:[#allocation15 + $0x160] sm:$0xff]  }
 0x635   :  { %6387 = vmatpush2.bf16.msra.mxu1 %v7891_v47 }
 0x636   :  { %8102 = vmatprep.subr.bf16.mxu1 %v8240_v16  ;;  %6430 = vmatmul.mubr.bf16.vlgmr.msra.gmra.mxu0 %v9116_v7 }
 0x637   :  { %8081 = vmatpush3.bf16.msra.mxu0 %v8241_v50  ;;  %7021 = vmatprep.mubr.bf16.mxu0 %v6463_v63  ;;  %v8287_v50 = vld [vmem:[#allocation15 + $0x1f8] sm:$0xff]   ;;  %v8290_v63 = vld [vmem:[#allocation15 + $0x1b0] sm:$0xff]  }
 0x638   :  { %v9244_v48 = vpop.f32.mrf.mxu1  ;;  %6389 = vmatmul.mubr.bf16.vlgmr.msra.gmra.mxu1 %v9114_v6  ;;  %8082 = vmatprep.subr.bf16.mxu0 %v8243_v20  ;;  %v8251_v6 = vld [vmem:[#allocation15 + $0x60] sm:$0xff]  }
 0x639   :  { %8103 = vmatpush3.bf16.msra.mxu1 %v8242_v34  ;;  %7061 = vmatprep.mubr.bf16.mxu1 %v6465_v17  ;;  %v8289_v34 = vld [vmem:[#allocation15 + $0x1f0] sm:$0xff]   ;;  %v8278_v20 = vld [vmem:[#allocation15 + $0x120] sm:$0xff]   ;;  %v8279_v17 = vld [vmem:[#allocation15 + $0x158] sm:$0xff]  }
 0x63a   :  { %v9247_v26 = vpop.f32.mrf.mxu1  ;;  %8104 = vmatprep.subr.bf16.mxu1 %v8244_v29 }
 0x63b   :  { %8083 = vmatpush3.bf16.msra.mxu0 %v8245_v21  ;;  %v8291_v21 = vld [vmem:[#allocation15 + $0x1e8] sm:$0xff]  }
 0x63c   :  { %v6189_v7 = vpop.f32.mrf.mxu1  ;;  %8084 = vmatprep.subr.bf16.mxu0 %v8247_v22  ;;  %v8292_v22 = vld [vmem:[#allocation15 + $0x1a8] sm:$0xff]  }
 0x63d   :  { %8105 = vmatpush3.bf16.msra.mxu1 %v8246_v10  ;;  %v8280_v10 = vld [vmem:[#allocation15 + $0x118] sm:$0xff]  }
 0x63e   :  { %v6190_v31 = vpop.f32.mrf.mxu1  ;;  %8106 = vmatprep.subr.bf16.mxu1 %v8248_v46  ;;  %v8293_v46 = vld [vmem:[#allocation15 + $0x1e0] sm:$0xff]  }
 0x63f   :  { %8085 = vmatpush3.bf16.msra.mxu0 %v8249_v53  ;;  %v8282_v53 = vld [vmem:[#allocation15 + $0x110] sm:$0xff]   ;;  %v8295_v31 = vld [vmem:[#allocation15 + $0x1d8] sm:$0xff]  }
 0x640   :  { %8086 = vmatprep.subr.bf16.mxu0 %v8251_v6  ;;  %v8283_v6 = vld [vmem:[#allocation15 + $0x148] sm:$0xff]  }
 0x641   :  { %8107 = vmatpush3.bf16.msra.mxu1 %v8250_v30  ;;  %v8294_v30 = vld [vmem:[#allocation15 + $0x1a0] sm:$0xff]  }
 0x642   :  { %8108 = vmatprep.subr.bf16.mxu1 %v8252_v33 }
 0x643   :  { %8087 = vmatpush3.bf16.msra.mxu0 %v8253_v35  ;;  %v8284_v35 = vld [vmem:[#allocation15 + $0x108] sm:$0xff]  }
 0x644   :  { %8088 = vmatprep.subr.bf16.mxu0 %v8255_v37  ;;  %v8285_v37 = vld [vmem:[#allocation15 + $0x140] sm:$0xff]  }
 0x645   :  { %8109 = vmatpush3.bf16.msra.mxu1 %v8254_v54  ;;  %v8296_v54 = vld [vmem:[#allocation15 + $0x198] sm:$0xff]  }
 0x646   :  { %8110 = vmatprep.subr.bf16.mxu1 %v8256_v28 }
 0x647   :  { %8089 = vmatpush3.bf16.msra.mxu0 %v8257_v39 }
 0x648   :  { %8090 = vmatprep.subr.bf16.mxu0 %v8259_v43  ;;  %v8297_v43 = vld [vmem:[#allocation15 + $0x1d0] sm:$0xff]  }
 0x649   :  { %8111 = vmatpush3.bf16.msra.mxu1 %v8258_v40 }
 0x64a   :  { %8112 = vmatprep.subr.bf16.mxu1 %v8260_v3  ;;  %v8298_v3 = vld [vmem:[#allocation15 + $0x190] sm:$0xff]  }
 0x64b   :  { %8091 = vmatpush3.bf16.msra.mxu0 %v8261_v44 }
 0x64c   :  { %8092 = vmatprep.subr.bf16.mxu0 %v8263_v45  ;;  %v8299_v45 = vld [vmem:[#allocation15 + $0x1c8] sm:$0xff]  }
 0x64d   :  { %8113 = vmatpush3.bf16.msra.mxu1 %v8262_v4 }
 0x64e   :  { %8114 = vmatprep.subr.bf16.mxu1 %v8264_v55  ;;  %v8300_v55 = vld [vmem:[#allocation15 + $0x188] sm:$0xff]  }
 0x64f   :  { %8093 = vmatpush3.bf16.msra.mxu0 %v8265_v0 }
 0x650   :  { %8094 = vmatprep.subr.bf16.mxu0 %v8267_v52  ;;  %v8302_v52 = vld [vmem:[#allocation15 + $0x180] sm:$0xff]  }
 0x651   :  { %8115 = vmatpush3.bf16.msra.mxu1 %v8266_v51  ;;  %v8301_v51 = vld [vmem:[#allocation15 + $0x1c0] sm:$0xff]  }
 0x652   :  { %8116 = vmatprep.subr.bf16.mxu1 %v8268_v57  ;;  %v1924_v57 = vsub.s32 7, %v8872_v24  ;;  %v7166_v24 = vld [vmem:[%s9346_s13 + $0x70] sm:$0xff] }
 0x653   :  { %8095 = vmatpush3.bf16.msra.mxu0 %v8269_v59 }
 0x654   :  { %8124 = vmatprep.subr.bf16.mxu0 %v8271_v13  ;;  %v1925_v59 = vrot.slane %v9216_v27, %v1924_v57 }
 0x655   :  { %8117 = vmatpush3.bf16.msra.mxu1 %v8270_v49 }
 0x656   :  { %v6144_v25 = vpop.f32.mrf.mxu0  ;;  %7022 = vmatmul.mubr.bf16.vlgmr.msra.gmra.mxu0 %v6462_v5  ;;  %8146 = vmatprep.subr.bf16.mxu1 %v8287_v50  ;;  %v7157_v50 = vld [vmem:[%s9346_s13 + $0x28] sm:$0xff] }
 0x657   :  { %8125 = vmatpush3.bf16.msra.mxu0 %v8272_v2  ;;  %v6145_v7 = vadd.f32 %v6144_v25, %v9233_v18  ;;  %v8286_v18 = vld [vmem:[#allocation15 + $0x100] sm:$0xff]  }
 0x658   :  { %7062 = vmatmul.mubr.bf16.vlgmr.msra.gmra.mxu1 %v6464_v11  ;;  %v6146_v14 = vpop.f32.mrf.mxu0  ;;  %8126 = vmatprep.subr.bf16.mxu0 %v8273_v60 }
 0x659   :  { %v6147_v36 = vadd.f32 %v6146_v14, %v6106_v23  ;;  %8147 = vmatpush3.bf16.msra.mxu1 %v8288_v19  ;;  %v6186_v33 = vadd.f32 %v9244_v48, %v6145_v7  ;;  %v7165_v14 = vld [vmem:[%s9346_s13 + $0x68] sm:$0xff] }
 0x65a   :  { %v6148_v47 = vpop.f32.mrf.mxu0  ;;  %8148 = vmatprep.subr.bf16.mxu1 %v8289_v34 }
 0x65b   :  { %v6188_v41 = vadd.f32 %v9247_v26, %v6147_v36  ;;  %8127 = vmatpush3.bf16.msra.mxu0 %v8274_v9  ;;  %v8281_v26 = vld [vmem:[#allocation15 + $0x150] sm:$0xff]   ;;  %v6450_v28 = vmul.f32 0.2, %v6186_v33  ;;  %vm6442_vm10 = vcmp.gt.f32.partialorder %v6186_v33, 0.0  ;;  %v7167_v9 = vld [vmem:[%s9346_s13 + $0x78] sm:$0xff]  ;;  %v7162_v47 = vld [vmem:[%s9346_s13 + $0x50] sm:$0xff] }
 0x65c   :  { %v6149_v16 = vpop.f32.mrf.mxu0  ;;  %8128 = vmatprep.subr.bf16.mxu0 %v8275_v42  ;;  %v7164_v42 = vld [vmem:[%s9346_s13 + $0x60] sm:$0xff]  ;;  %v7163_v36 = vld [vmem:[%s9346_s13 + $0x58] sm:$0xff] }
 0x65d   :  { %v6451_v38 = vmul.f32 0.2, %v6188_v41  ;;  %vm6443_vm9 = vcmp.gt.f32.partialorder %v6188_v41, 0.0  ;;  %8149 = vmatpush3.bf16.msra.mxu1 %v8290_v63  ;;  %v6458_v39 = vsel %vm6442_vm10, %v6186_v33, %v6450_v28  ;;  %v7158_v16 = vld [vmem:[%s9346_s13 + $0x30] sm:$0xff] }
 0x65e   :  { %8150 = vmatprep.subr.bf16.mxu1 %v8291_v21  ;;  %v6466_v40 = vpack.c.bf16 %v6458_v39, %v6458_v39 }
 0x65f   :  { %8129 = vmatpush3.bf16.msra.mxu0 %v8276_v15  ;;  %v6459_v32 = vsel %vm6443_vm9, %v6188_v41, %v6451_v38  ;;  %v7161_v41 = vld [vmem:[%s9346_s13 + $0x48] sm:$0xff]  ;;  %v7160_v15 = vld [vmem:[%s9346_s13 + $0x40] sm:$0xff] }
 0x660   :  { %8130 = vmatprep.subr.bf16.mxu0 %v8277_v8  ;;  %v6467_v29 = vpack.c.bf16 %v6459_v32, %v6459_v32  ;;  %v7159_v8 = vld [vmem:[%s9346_s13 + $0x38] sm:$0xff] }
 0x661   :  { %8151 = vmatpush3.bf16.msra.mxu1 %v8292_v22 }
 0x662   :  { %7101 = vmatprep.mubr.bf16.mxu0 %v6467_v29  ;;  %8152 = vmatprep.subr.bf16.mxu1 %v8293_v46 }
 0x663   :  { %8131 = vmatpush3.bf16.msra.mxu0 %v8278_v20 }
 0x664   :  { %8132 = vmatprep.subr.bf16.mxu0 %v8279_v17 }
 0x665   :  { %8153 = vmatpush3.bf16.msra.mxu1 %v8294_v30 }
 0x666   :  { %8154 = vmatprep.subr.bf16.mxu1 %v8295_v31 }
 0x667   :  { %8133 = vmatpush3.bf16.msra.mxu0 %v8280_v10 }
 0x668   :  { %8134 = vmatprep.subr.bf16.mxu0 %v8281_v26 }
 0x669   :  { %8155 = vmatpush3.bf16.msra.mxu1 %v8296_v54 }
 0x66a   :  { %8156 = vmatprep.subr.bf16.mxu1 %v8297_v43 }
 0x66b   :  { %8135 = vmatpush3.bf16.msra.mxu0 %v8282_v53 }
 0x66c   :  { %8136 = vmatprep.subr.bf16.mxu0 %v8283_v6 }
 0x66d   :  { %8157 = vmatpush3.bf16.msra.mxu1 %v8298_v3  ;;  %v8013_v3 = vld [vmem:[#allocation17] ss:$0 sm:$0xff] }
 0x66e   :  { %8158 = vmatprep.subr.bf16.mxu1 %v8299_v45 }
 0x66f   :  { %8137 = vmatpush3.bf16.msra.mxu0 %v8284_v35 }
 0x670   :  { %8138 = vmatprep.subr.bf16.mxu0 %v8285_v37 }
 0x671   :  { %8159 = vmatpush3.bf16.msra.mxu1 %v8300_v55 }
 0x672   :  { %8160 = vmatprep.subr.bf16.mxu1 %v8301_v51 }
 0x673   :  { %8139 = vmatpush3.bf16.msra.mxu0 %v8286_v18 }
 0x674   :  { %8185 = vmatprep.subr.mxu0 %v8490_v1 }
 0x675   :  { %8161 = vmatpush3.bf16.msra.mxu1 %v8302_v52 }
 0x676   :  { %7102 = vmatmul.mubr.bf16.vlgmr.msra.gmra.mxu0 %v6466_v40 }
 0x677   :  { %8186 = vmatpush3.msra.mxu0 %v7167_v9  ;;  %8217 = vmatprep.mubr.msk.f32.mxu0 %vm8494_vm13, %v8490_v1 }
 0x678   :  { %v6226_v48 = vpop.f32.mrf.mxu1  ;;  %8187 = vmatprep.subr.mxu0 %v8490_v1 }
 0x679   :  { %v6227_v49 = vadd.f32 %v6226_v48, %v1921_v58  ;;  %8188 = vmatpush3.msra.mxu0 %v7166_v24 }
 0x67a   :  { %v6228_v44 = vpop.f32.mrf.mxu1  ;;  %8189 = vmatprep.subr.mxu0 %v8490_v1 }
 0x67b   :  { %v6229_v12 = vadd.f32 %v6228_v44, %v1925_v59  ;;  %8190 = vmatpush3.msra.mxu0 %v7165_v14 }
 0x67c   :  { %v6230_v4 = vpop.f32.mrf.mxu1  ;;  %8191 = vmatprep.subr.mxu0 %v8490_v1 }
 0x67d   :  { %8192 = vmatpush3.msra.mxu0 %v7164_v42 }
 0x67e   :  { %v6231_v0 = vpop.f32.mrf.mxu1  ;;  %8193 = vmatprep.subr.mxu0 %v8490_v1 }
 0x67f   :  { %8194 = vmatpush3.msra.mxu0 %v7163_v36 }
 0x680   :  { %8195 = vmatprep.subr.mxu0 %v8490_v1 }
 0x681   :  { %8196 = vmatpush3.msra.mxu0 %v7162_v47 }
 0x682   :  { %8197 = vmatprep.subr.mxu0 %v8490_v1 }
 0x683   :  { %8198 = vmatpush3.msra.mxu0 %v7161_v41  ;;  %v8078_v41 = vld [vmem:[#allocation6] ss:$0 sm:$0xff] }
 0x684   :  { %8199 = vmatprep.subr.mxu0 %v8490_v1 }
 0x685   :  { %8200 = vmatpush3.msra.mxu0 %v7160_v15 }
 0x686   :  { %8201 = vmatprep.subr.mxu0 %v8490_v1 }
 0x687   :  { %8202 = vmatpush3.msra.mxu0 %v7159_v8 }
 0x688   :  { %8203 = vmatprep.subr.mxu0 %v8490_v1 }
 0x689   :  { %8204 = vmatpush3.msra.mxu0 %v7158_v16 }
 0x68a   :  { %8205 = vmatprep.subr.mxu0 %v8490_v1 }
 0x68b   :  { %8206 = vmatpush3.msra.mxu0 %v7157_v50 }
 0x68c   :  { %8207 = vmatprep.subr.mxu0 %v8490_v1 }
 0x696   :  { %v6267_v13 = vpop.f32.mrf.mxu0 }
 0x697   :  { %v6268_v61 = vadd.f32 %v6267_v13, %v6227_v49 }
 0x698   :  { %v6269_v62 = vpop.f32.mrf.mxu0 }
 0x699   :  { %v6270_v2 = vadd.f32 %v6269_v62, %v6229_v12 }
 0x69a   :  { %v6271_v5 = vpop.f32.mrf.mxu0 }
 0x69b   :  { %v7155_v5 = vld [vmem:[%s9346_s13 + $0x18] sm:$0xff] }
 0x69c   :  { %v6272_v60 = vpop.f32.mrf.mxu0 }
 0x69d   :  { %v7154_v60 = vld [vmem:[%s9346_s13 + $0x10] sm:$0xff] }
 0x6b8   :  { %v6308_v11 = vpop.f32.mrf.mxu1 }
 0x6b9   :  { %v6309_v20 = vadd.f32 %v6308_v11, %v6268_v61  ;;  %v7153_v11 = vld [vmem:[%s9346_s13 + $0x8] sm:$0xff] }
 0x6ba   :  { %v6310_v25 = vpop.f32.mrf.mxu1 }
 0x6bb   :  { %v6311_v63 = vadd.f32 %v6310_v25, %v6270_v2  ;;  %v7156_v2 = vld [vmem:[%s9346_s13 + $0x20] sm:$0xff] }
 0x6bc   :  { %v6312_v23 = vpop.f32.mrf.mxu1  ;;  %8208 = vmatpush3.msra.mxu0 %v7156_v2  ;;  %v7152_v25 = vld [vmem:[%s9346_s13] sm:$0xff] }
 0x6bd   :  { %8209 = vmatprep.subr.mxu0 %v8490_v1 }
 0x6be   :  { %v6313_v27 = vpop.f32.mrf.mxu1  ;;  %8210 = vmatpush3.msra.mxu0 %v7155_v5 }
 0x6bf   :  { %8211 = vmatprep.subr.mxu0 %v8490_v1 }
 0x6c0   :  { %8212 = vmatpush3.msra.mxu0 %v7154_v60 }
 0x6c1   :  { %8213 = vmatprep.subr.mxu0 %v8490_v1 }
 0x6c2   :  { %8214 = vmatpush3.msra.mxu0 %v7153_v11 }
 0x6c3   :  { %8215 = vmatprep.subr.mxu0 %v8490_v1 }
 0x6c4   :  { %8216 = vmatpush3.msra.mxu0 %v7152_v25 }
 0x6d6   :  { %v6349_v19 = vpop.f32.mrf.mxu0 }
 0x6d7   :  { %v6350_v29 = vadd.f32 %v6349_v19, %v6309_v20 }
 0x6d8   :  { %v6351_v34 = vpop.f32.mrf.mxu0 }
 0x6d9   :  { %v6352_v10 = vadd.f32 %v6351_v34, %v6311_v63 }
 0x6da   :  { %v6353_v38 = vpop.f32.mrf.mxu0 }
 0x6dc   :  { %v6354_v32 = vpop.f32.mrf.mxu0 }
 0x6f6   :  { %v6431_v17 = vpop.f32.mrf.mxu0 }
 0x6f8   :  { %v6390_v21 = vpop.f32.mrf.mxu1  ;;  %v6433_v26 = vpop.f32.mrf.mxu0 }
 0x6f9   :  { %v6391_v22 = vadd.f32 %v6390_v21, %v6350_v29 }
 0x6fa   :  { %v6392_v46 = vpop.f32.mrf.mxu1  ;;  %v6435_v30 = vpop.f32.mrf.mxu0 }
 0x6fb   :  { %v6432_v7 = vadd.f32 %v6431_v17, %v6391_v22  ;;  %v6393_v53 = vadd.f32 %v6392_v46, %v6352_v10 }
 0x6fc   :  { %v6394_v6 = vpop.f32.mrf.mxu1  ;;  %v6436_v35 = vpop.f32.mrf.mxu0 }
 0x6fd   :  { %vm6444_vm11 = vcmp.gt.f32.partialorder %v6432_v7, 0.0  ;;  %v6452_v31 = vmul.f32 0.2, %v6432_v7  ;;  %v6434_v33 = vadd.f32 %v6433_v26, %v6393_v53 }
 0x6fe   :  { %v6395_v54 = vpop.f32.mrf.mxu1 }
 0x6ff   :  { %vm6445_vm12 = vcmp.gt.f32.partialorder %v6434_v33, 0.0  ;;  %v6453_v37 = vmul.f32 0.2, %v6434_v33  ;;  %v6460_v28 = vsel %vm6444_vm11, %v6432_v7, %v6452_v31 }
 0x700   :  { %v6468_v40 = vpack.c.bf16 %v6460_v28, %v6460_v28 }
 0x701   :  { %v6461_v18 = vsel %vm6445_vm12, %v6434_v33, %v6453_v37 }
 0x702   :  { %v6469_v39 = vpack.c.bf16 %v6461_v18, %v6461_v18 }
 0x704   :  { %7141 = vmatprep.mubr.bf16.mxu1 %v6469_v39 }
 0x705   :  { %7142 = vmatmul.mubr.bf16.vlgmr.msra.gmra.mxu1 %v6468_v40 }
 0x716   :  { %v8096_v48 = vpop.f32.mrf.mxu0 }
 0x718   :  { %v8118_v43 = vpop.f32.mrf.mxu1  ;;  %v8097_v44 = vpop.f32.mrf.mxu0 }
 0x719   :  { %v8098_v4 = vadd.f32 %v8097_v44, %v8096_v48 }
 0x71a   :  { %v8119_v45 = vpop.f32.mrf.mxu1  ;;  %v8099_v0 = vpop.f32.mrf.mxu0 }
 0x71b   :  { %v8120_v55 = vadd.f32 %v8119_v45, %v8118_v43  ;;  %v7024_v51 = vadd.f32 %v8098_v4, %v8013_v3 }
 0x71c   :  { %v8121_v52 = vpop.f32.mrf.mxu1  ;;  %v8100_v56 = vpop.f32.mrf.mxu0 }
 0x71d   :  { %v7064_v57 = vadd.f32 %v8120_v55, %v7024_v51 }
 0x71e   :  { %v8122_v58 = vpop.f32.mrf.mxu1 }
 0x736   :  { %v8140_v59 = vpop.f32.mrf.mxu0 }
 0x738   :  { %v8141_v49 = vpop.f32.mrf.mxu0 }
 0x739   :  { %v8142_v13 = vadd.f32 %v8141_v49, %v8140_v59 }
 0x73a   :  { %v8143_v12 = vpop.f32.mrf.mxu0 }
 0x73b   :  { %v7104_v61 = vadd.f32 %v8142_v13, %v7064_v57 }
 0x73c   :  { %v8144_v62 = vpop.f32.mrf.mxu0 }
 0x7c5   :  { %v8162_v23 = vpop.f32.mrf.mxu1 }
 0x7c7   :  { %v8163_v9 = vpop.f32.mrf.mxu1 }
 0x7c8   :  { %v8164_v24 = vadd.f32 %v8163_v9, %v8162_v23 }
 0x7c9   :  { %v8165_v27 = vpop.f32.mrf.mxu1 }
 0x7ca   :  { %v7144_v14 = vadd.f32 %v8164_v24, %v7104_v61 }
 0x7cb   :  { %v8166_v42 = vpop.f32.mrf.mxu1 }
 0x7cc   :  { %v7150_v36 = vmul.f32 0.2, %v7144_v14  ;;  %vm7149_vm14 = vcmp.gt.f32.partialorder %v7144_v14, 0.0 }
 0x7ce   :  { %v7151_v47 = vsel %vm7149_vm14, %v7144_v14, %v7150_v36 }
 0x7cf   :  { %8218 = vmatmul.mubr.f32.vlgmr.msra.gmra.mxu0 %v7151_v47 }
 0x88f   :  { %v7241_v15 = vpop.f32.mrf.mxu0 }
 0x890   :  { %v7242_v8 = vadd.f32 %v8078_v41, %v7241_v15 }
 0x891   :  { %v8219_v16 = vpop.f32.mrf.mxu0 }
 0x892   :  { %v7245_v50 = vsub.f32 0.0, %v7242_v8 }
 0x894   :  { %v7246_v19 = vmul.f32 1.442695, %v7245_v50 }
 0x896   :  { %8303 = vpow2.f32 %v7246_v19 }
 0x8a3   :  { %v8304_v34 = vpop.eup %8303 }
 0x8a4   :  { %v7248_v1 = vadd.f32 1.0, %v8304_v34 }
 0x8a6   :  { %8305 = vrcp.f32 %v7248_v1 }
 0x8b3   :  { %v8306_v38 = vpop.eup %8305 }
 0x8b4   :  { %7251 = vst.msk [vmem:[%s9348_s15] sm:$0x3] %vm7250_vm15, %v8306_v38 }
 0x8b5   :  { %7256 = vsyncpa [#allocation8], 1 }
 0x8b6   :  { %7257 = vsyncpa [#allocation10], 1 }
 0x8b7   :  { %7258 = vsyncpa [#allocation13], 1 }
 0x8b8   :  { %7259 = vsyncpa [#allocation16], 1 }
 0x8b9   :  { %7260 = vsyncmov [#allocation3] }
 0x8bc   :  { %s7261_s17 = vpop.sfrf %7260 }
 0x8bd   :  { %p8079_p12 = scmp.ne.s32.totalorder %s7261_s17, 0 }
 0x8bf   :  { %7265 = shalt.err (%p8079_p12)  }

</bundles_post_ra>
